<compile_context>
chip_gen: v6e
topology: v6e:2x2x1
jax: 0.10.0
libtpu: 0.0.40
codegen_flags: <defaults>
</compile_context>

<pallas_src>
import jax
import jax.numpy as jnp
from jax.experimental import pallas as pl
from jax.experimental.pallas import tpu as pltpu


# ----------------------------------------------------------------------------
# Architecture bookkeeping (mirrors the PyTorch constructor exactly).
# ----------------------------------------------------------------------------
def _padding(downsample, kernel_size):
    return max(0, (kernel_size - downsample + 1) // 2)


def _downsample(n_in, n_out):
    d = n_in // n_out
    if d < 1:
        raise ValueError("Number of samples should always decrease")
    if n_in % n_out != 0:
        raise ValueError("Consecutive sample counts must decrease by an integer factor")
    return d


def build_arch(n_channels, n_samples, net_filter_size, net_seq_length,
               n_classes, kernel_size):
    if kernel_size % 2 == 0:
        raise ValueError("Only odd kernel sizes are supported")
    n_out = 1 if n_classes == 2 else n_classes
    blocks_dim = list(zip(net_filter_size, net_seq_length))
    c0, l0 = blocks_dim[0]
    ds0 = _downsample(n_samples, l0)
    blocks = []
    c_prev, l_prev = c0, l0
    for c, l in blocks_dim:
        ds = _downsample(l_prev, l)
        blocks.append(dict(c_in=c_prev, c_out=c, l_in=l_prev, l_out=l, ds=ds,
                           pad1=_padding(1, kernel_size),
                           pad2=_padding(ds, kernel_size),
                           has_pool=(ds > 1), has_1x1=(c_prev != c)))
        c_prev, l_prev = c, l
    return dict(n_channels=n_channels, n_samples=n_samples,
                kernel_size=kernel_size, c0=c0, l0=l0, ds0=ds0,
                pad0=_padding(ds0, kernel_size), blocks=blocks,
                c_last=c_prev, l_last=l_prev, n_out=n_out,
                n_out_pad=((n_out + 127) // 128) * 128)


# ----------------------------------------------------------------------------
# Pallas kernel + wrapper.
# ----------------------------------------------------------------------------
def make_forward(arch):
    K = arch["kernel_size"]

    def dotf(a, b):
        # bf16 operands, f32 accumulation on the MXU.
        return jnp.dot(a.astype(jnp.bfloat16), b.astype(jnp.bfloat16),
                       preferred_element_type=jnp.float32)

    def kernel(x_ref, *refs):
        *p, out_ref = refs
        it = iter(p)

        def sel_bf16(l_in, l_out, stride, offset):
            # 0/1 matrix S with S[l, t] = 1 iff l == stride*t + offset.
            # Out-of-range targets give all-zero columns -> implicit zero pad.
            # Built locally (per conv / per pool), bf16, never cached.
            rows = jax.lax.broadcasted_iota(jnp.int32, (l_in, l_out), 0)
            cols = jax.lax.broadcasted_iota(jnp.int32, (l_in, l_out), 1)
            return jnp.where(rows == cols * stride + offset,
                             1.0, 0.0).astype(jnp.bfloat16)

        def conv1d(x, w2_ref, stride, pad, l_out):
            # x: (Cin, L_in); w2_ref: (Cout, K*Cin) bf16.  One im2col matmul.
            cin, l_in = x.shape
            xb = x.astype(jnp.bfloat16)
            if stride == 1:
                # zero-padded activation; taps are plain static slices.
                if pad > 0:
                    zpad = jnp.zeros((cin, pad), jnp.bfloat16)
                    xp = jnp.concatenate([zpad, xb, zpad], axis=1)
                else:
                    xp = xb
                taps = [xp[:, k:k + l_out] for k in range(K)]
            else:
                # polyphase decomposition: phase_p[ci, q] = x[ci, stride*q + p - pad]
                # (ds tiny 0/1 matmuls instead of K of them), then static slices.
                n_q = (K - 1) // stride + 1
                l_ph = l_out + n_q - 1
                phases = [
                    dotf(xb, sel_bf16(l_in, l_ph, stride, ph - pad)
                         ).astype(jnp.bfloat16)
                    for ph in range(min(stride, K))]
                taps = [phases[k % stride][:, (k // stride):(k // stride) + l_out]
                        for k in range(K)]
            xcol = jnp.concatenate(taps, axis=0)          # (K*Cin, l_out) bf16
            return dotf(w2_ref[...], xcol)                # (Cout, l_out) f32

        def maxpool(yv, ds, l_out):
            cin, l_in = yv.shape
            yb = yv.astype(jnp.bfloat16)
            out = dotf(yb, sel_bf16(l_in, l_out, ds, 0))
            for ph in range(1, ds):
                out = jnp.maximum(out, dotf(yb, sel_bf16(l_in, l_out, ds, ph)))
            return out

        # ---- stem: Conv1d(stride=ds0) -> BatchNorm1d (no ReLU, per reference) ----
        x = x_ref[0].astype(jnp.float32)                  # (Cin, L_in)
        w0, s0, b0 = next(it), next(it), next(it)
        h = conv1d(x, w0, arch["ds0"], arch["pad0"], arch["l0"])
        h = h * s0[...] + b0[...]                         # folded (eval) BN
        y = h

        # ---- residual blocks ----
        for blk in arch["blocks"]:
            w1, s1, b1 = next(it), next(it), next(it)
            w2, s2, b2 = next(it), next(it), next(it)
            wskip = next(it) if blk["has_1x1"] else None

            ys = y
            if blk["has_pool"]:
                ys = maxpool(ys, blk["ds"], blk["l_out"])
            if wskip is not None:
                ys = dotf(wskip[...], ys)                 # 1x1 conv on skip

            h = conv1d(h, w1, 1, blk["pad1"], blk["l_in"])
            h = jnp.maximum(h * s1[...] + b1[...], 0.0)
            # TODO(synk): nn.Dropout is identity in eval mode; train-mode dropout
            # and BatchNorm batch statistics are not implemented.
            h = conv1d(h, w2, blk["ds"], blk["pad2"], blk["l_out"])
            h = h + ys
            y = h
            h = jnp.maximum(h * s2[...] + b2[...], 0.0)

        # ---- head: flatten channels-first (matches torch .view) -> one matmul ----
        wlin, blin = next(it), next(it)
        hflat = jnp.concatenate([h[c:c + 1, :] for c in range(arch["c_last"])],
                                axis=1)                   # (1, C_last*L_last)
        out = dotf(hflat, wlin[...]) + blin[...]          # (1, n_out_pad) lane-dense
        out_ref[...] = out[None].astype(out_ref.dtype)    # (1, 1, n_out_pad) store

    def forward(x, params):
        B = x.shape[0]
        in_specs = [pl.BlockSpec((1, arch["n_channels"], arch["n_samples"]),
                                 lambda i: (i, 0, 0))]
        for prm in params:
            # constant index_map -> parameter stays resident in VMEM, no re-DMA
            in_specs.append(pl.BlockSpec(prm.shape, lambda i, nd=prm.ndim: (0,) * nd))
        out_spec = pl.BlockSpec((1, 1, arch["n_out_pad"]), lambda i: (i, 0, 0))

        out_padded = pl.pallas_call(
            kernel,
            grid=(B,),
            in_specs=in_specs,
            out_specs=out_spec,
            out_shape=jax.ShapeDtypeStruct((B, 1, arch["n_out_pad"]), jnp.float32),
            compiler_params=pltpu.CompilerParams(
                # per-example disjoint output blocks -> batch axis is parallel
                dimension_semantics=("parallel",),
                vmem_limit_bytes=32 * 1024 * 1024),
        )(x, *params)
        return out_padded[:, 0, :arch["n_out"]]

    return forward


# ----------------------------------------------------------------------------
# Parameter construction (PyTorch-layout) and packing into kernel layout.
# ----------------------------------------------------------------------------
def init_params_torch(key, arch):
    keys = iter(jax.random.split(key, 64))
    K = arch["kernel_size"]

    def nrm(shape, scale):
        return scale * jax.random.normal(next(keys), shape, jnp.float32)

    def bn_fold(c):
        gamma = 1.0 + 0.1 * jax.random.normal(next(keys), (c,), jnp.float32)
        beta = 0.1 * jax.random.normal(next(keys), (c,), jnp.float32)
        mean = 0.1 * jax.random.normal(next(keys), (c,), jnp.float32)
        var = jax.random.uniform(next(keys), (c,), jnp.float32, 0.5, 1.5)
        scale = gamma / jnp.sqrt(var + 1e-5)
        shift = beta - mean * scale
        return scale, shift

    stem_w = nrm((arch["c0"], arch["n_channels"], K), 0.1)
    stem_s, stem_b = bn_fold(arch["c0"])
    blocks = []
    for blk in arch["blocks"]:
        w1 = nrm((blk["c_out"], blk["c_in"], K), 0.1)
        s1, b1 = bn_fold(blk["c_out"])
        w2 = nrm((blk["c_out"], blk["c_out"], K), 0.1)
        s2, b2 = bn_fold(blk["c_out"])
        wskip = nrm((blk["c_out"], blk["c_in"]), 0.2) if blk["has_1x1"] else None
        blocks.append((w1, s1, b1, w2, s2, b2, wskip))
    wlin = nrm((arch["n_out"], arch["c_last"] * arch["l_last"]), 0.05)
    blin = nrm((arch["n_out"],), 0.05)
    return dict(stem=(stem_w, stem_s, stem_b), blocks=blocks, lin=(wlin, blin))


def pack_params(tp, arch):
    def conv_w(w):
        # (Cout, Cin, K) -> (Cout, K*Cin) bf16, row index k*Cin + ci (im2col order)
        cout, cin, k = w.shape
        return jnp.transpose(w, (0, 2, 1)).reshape(cout, k * cin).astype(jnp.bfloat16)

    def bn_p(v):          # (C,) -> (C, 1) for channels-first broadcasting (f32)
        return v.reshape(-1, 1)

    out = []
    sw, ss, sb = tp["stem"]
    out += [conv_w(sw), bn_p(ss), bn_p(sb)]
    for (w1, s1, b1, w2, s2, b2, wskip), blk in zip(tp["blocks"], arch["blocks"]):
        out += [conv_w(w1), bn_p(s1), bn_p(b1), conv_w(w2), bn_p(s2), bn_p(b2)]
        if blk["has_1x1"]:
            out.append(wskip.astype(jnp.bfloat16))
    wlin, blin = tp["lin"]
    npad, nout = arch["n_out_pad"], arch["n_out"]
    wl = jnp.zeros((arch["c_last"] * arch["l_last"], npad), jnp.float32)
    wl = wl.at[:, :nout].set(wlin.T)           # zero-padded lane-dense classifier
    bl = jnp.zeros((1, npad), jnp.float32).at[:, :nout].set(blin[None, :])
    out += [wl.astype(jnp.bfloat16), bl]
    return out


# ----------------------------------------------------------------------------
# Plain-JAX reference of the same (eval-mode) forward pass.
# ----------------------------------------------------------------------------
def reference_forward(x, tp, arch):
    prec = jax.lax.Precision.HIGHEST

    def conv(h, w, stride, pad):
        return jax.lax.conv_general_dilated(
            h, w, window_strides=(stride,), padding=[(pad, pad)],
            dimension_numbers=("NCH", "OIH", "NCH"), precision=prec)

    def bn(h, s, b):
        return h * s[None, :, None] + b[None, :, None]

    def maxpool(h, ds):
        return jax.lax.reduce_window(h, jnp.array(-jnp.inf, h.dtype), jax.lax.max,
                                     (1, 1, ds), (1, 1, ds), "VALID")

    sw, ss, sb = tp["stem"]
    h = bn(conv(x, sw, arch["ds0"], arch["pad0"]), ss, sb)
    y = h
    for (w1, s1, b1, w2, s2, b2, wskip), blk in zip(tp["blocks"], arch["blocks"]):
        ys = y
        if blk["has_pool"]:
            ys = maxpool(ys, blk["ds"])
        if blk["has_1x1"]:
            ys = conv(ys, wskip[:, :, None], 1, 0)
        h = jnp.maximum(bn(conv(h, w1, 1, blk["pad1"]), s1, b1), 0.0)
        h = conv(h, w2, blk["ds"], blk["pad2"])
        h = h + ys
        y = h
        h = jnp.maximum(bn(h, s2, b2), 0.0)
    wlin, blin = tp["lin"]
    flat = h.reshape(h.shape[0], -1)
    return jnp.dot(flat, wlin.T, precision=prec) + blin[None, :]


# ----------------------------------------------------------------------------
if __name__ == "__main__":
    key = jax.random.PRNGKey(0)
    k_x, k_p = jax.random.split(key)

    # small, divisibility-consistent ResNet1d configuration
    n_channels, n_samples = 8, 256
    net_filter_size = (16, 32, 32)
    net_seq_length = (128, 64, 32)
    n_classes, kernel_size = 3, 5
    B = 2

    arch = build_arch(n_channels, n_samples, net_filter_size, net_seq_length,
                      n_classes, kernel_size)
    tp = init_params_torch(k_p, arch)
    kparams = pack_params(tp, arch)

    x = jax.random.normal(k_x, (B, n_channels, n_samples), jnp.float32)

    forward = make_forward(arch)
    out = forward(x, kparams)
    out = jax.block_until_ready(out)

    ref = reference_forward(x, tp, arch)
    assert out.shape == (B, arch["n_out"]), out.shape
    # Kernel uses bf16 MXU operands (f32 accumulation); reference is f32 HIGHEST,
    # so allow a slightly wider tolerance than pure-f32 would need.
    assert jnp.allclose(out, ref, atol=5e-2, rtol=5e-2), (out, ref)

    print("KERNEL_OK")
</pallas_src>

<mosaic_0001>
module attributes {stable_mosaic.version = 11 : i64} {
  func.func @kernel(%arg0: i32, %arg1: memref<1x8x256xf32, #tpu.memory_space<vmem>>, %arg2: memref<16x40xbf16, #tpu.memory_space<vmem>>, %arg3: memref<16x1xf32, #tpu.memory_space<vmem>>, %arg4: memref<16x1xf32, #tpu.memory_space<vmem>>, %arg5: memref<16x80xbf16, #tpu.memory_space<vmem>>, %arg6: memref<16x1xf32, #tpu.memory_space<vmem>>, %arg7: memref<16x1xf32, #tpu.memory_space<vmem>>, %arg8: memref<16x80xbf16, #tpu.memory_space<vmem>>, %arg9: memref<16x1xf32, #tpu.memory_space<vmem>>, %arg10: memref<16x1xf32, #tpu.memory_space<vmem>>, %arg11: memref<32x80xbf16, #tpu.memory_space<vmem>>, %arg12: memref<32x1xf32, #tpu.memory_space<vmem>>, %arg13: memref<32x1xf32, #tpu.memory_space<vmem>>, %arg14: memref<32x160xbf16, #tpu.memory_space<vmem>>, %arg15: memref<32x1xf32, #tpu.memory_space<vmem>>, %arg16: memref<32x1xf32, #tpu.memory_space<vmem>>, %arg17: memref<32x16xbf16, #tpu.memory_space<vmem>>, %arg18: memref<32x160xbf16, #tpu.memory_space<vmem>>, %arg19: memref<32x1xf32, #tpu.memory_space<vmem>>, %arg20: memref<32x1xf32, #tpu.memory_space<vmem>>, %arg21: memref<32x160xbf16, #tpu.memory_space<vmem>>, %arg22: memref<32x1xf32, #tpu.memory_space<vmem>>, %arg23: memref<32x1xf32, #tpu.memory_space<vmem>>, %arg24: memref<1024x128xbf16, #tpu.memory_space<vmem>>, %arg25: memref<1x128xf32, #tpu.memory_space<vmem>>, %arg26: memref<1x1x128xf32, #tpu.memory_space<vmem>>) attributes {dimension_semantics = [#tpu.dimension_semantics<parallel>], iteration_bounds = array<i64: 2>, scalar_prefetch = 0 : i64, scratch_operands = 0 : i64, tpu.core_type = #tpu.core_type<tc>, window_params = [{transform_indices = @transform_0, window_bounds = array<i64: 1, 8, 256>}, {pipeline_mode = #tpu.pipeline_mode<synchronous>, transform_indices = @transform_1, window_bounds = array<i64: 16, 40>}, {pipeline_mode = #tpu.pipeline_mode<synchronous>, transform_indices = @transform_2, window_bounds = array<i64: 16, 1>}, {pipeline_mode = #tpu.pipeline_mode<synchronous>, transform_indices = @transform_3, window_bounds = array<i64: 16, 1>}, {pipeline_mode = #tpu.pipeline_mode<synchronous>, transform_indices = @transform_4, window_bounds = array<i64: 16, 80>}, {pipeline_mode = #tpu.pipeline_mode<synchronous>, transform_indices = @transform_5, window_bounds = array<i64: 16, 1>}, {pipeline_mode = #tpu.pipeline_mode<synchronous>, transform_indices = @transform_6, window_bounds = array<i64: 16, 1>}, {pipeline_mode = #tpu.pipeline_mode<synchronous>, transform_indices = @transform_7, window_bounds = array<i64: 16, 80>}, {pipeline_mode = #tpu.pipeline_mode<synchronous>, transform_indices = @transform_8, window_bounds = array<i64: 16, 1>}, {pipeline_mode = #tpu.pipeline_mode<synchronous>, transform_indices = @transform_9, window_bounds = array<i64: 16, 1>}, {pipeline_mode = #tpu.pipeline_mode<synchronous>, transform_indices = @transform_10, window_bounds = array<i64: 32, 80>}, {pipeline_mode = #tpu.pipeline_mode<synchronous>, transform_indices = @transform_11, window_bounds = array<i64: 32, 1>}, {pipeline_mode = #tpu.pipeline_mode<synchronous>, transform_indices = @transform_12, window_bounds = array<i64: 32, 1>}, {pipeline_mode = #tpu.pipeline_mode<synchronous>, transform_indices = @transform_13, window_bounds = array<i64: 32, 160>}, {pipeline_mode = #tpu.pipeline_mode<synchronous>, transform_indices = @transform_14, window_bounds = array<i64: 32, 1>}, {pipeline_mode = #tpu.pipeline_mode<synchronous>, transform_indices = @transform_15, window_bounds = array<i64: 32, 1>}, {pipeline_mode = #tpu.pipeline_mode<synchronous>, transform_indices = @transform_16, window_bounds = array<i64: 32, 16>}, {pipeline_mode = #tpu.pipeline_mode<synchronous>, transform_indices = @transform_17, window_bounds = array<i64: 32, 160>}, {pipeline_mode = #tpu.pipeline_mode<synchronous>, transform_indices = @transform_18, window_bounds = array<i64: 32, 1>}, {pipeline_mode = #tpu.pipeline_mode<synchronous>, transform_indices = @transform_19, window_bounds = array<i64: 32, 1>}, {pipeline_mode = #tpu.pipeline_mode<synchronous>, transform_indices = @transform_20, window_bounds = array<i64: 32, 160>}, {pipeline_mode = #tpu.pipeline_mode<synchronous>, transform_indices = @transform_21, window_bounds = array<i64: 32, 1>}, {pipeline_mode = #tpu.pipeline_mode<synchronous>, transform_indices = @transform_22, window_bounds = array<i64: 32, 1>}, {pipeline_mode = #tpu.pipeline_mode<synchronous>, transform_indices = @transform_23, window_bounds = array<i64: 1024, 128>}, {pipeline_mode = #tpu.pipeline_mode<synchronous>, transform_indices = @transform_24, window_bounds = array<i64: 1, 128>}, {transform_indices = @transform_25, window_bounds = array<i64: 1, 1, 128>}]} {
    %c0 = arith.constant 0 : index
    %c0_0 = arith.constant 0 : index
    %c0_1 = arith.constant 0 : index
    %0 = vector.load %arg1[%c0, %c0_0, %c0_1] : memref<1x8x256xf32, #tpu.memory_space<vmem>>, vector<1x8x256xf32>
    %1 = vector.shape_cast %0 : vector<1x8x256xf32> to vector<8x256xf32>
    %2 = arith.truncf %1 : vector<8x256xf32> to vector<8x256xbf16>
    %3 = tpu.iota {dimensions = array<i32: 0>} : vector<256x130xi32>
    %4 = tpu.iota {dimensions = array<i32: 1>} : vector<256x130xi32>
    %c2_i32 = arith.constant 2 : i32
    %5 = vector.broadcast %c2_i32 : i32 to vector<256x130xi32>
    %6 = arith.muli %4, %5 : vector<256x130xi32>
    %c-2_i32 = arith.constant -2 : i32
    %7 = vector.broadcast %c-2_i32 : i32 to vector<256x130xi32>
    %8 = arith.addi %6, %7 : vector<256x130xi32>
    %9 = arith.cmpi eq, %3, %8 : vector<256x130xi32>
    %cst = arith.constant 1.000000e+00 : f32
    %cst_2 = arith.constant 0.000000e+00 : f32
    %10 = vector.broadcast %cst : f32 to vector<256x130xf32>
    %11 = vector.broadcast %cst_2 : f32 to vector<256x130xf32>
    %12 = arith.select %9, %10, %11 : vector<256x130xi1>, vector<256x130xf32>
    %13 = arith.truncf %12 : vector<256x130xf32> to vector<256x130xbf16>
    %cst_3 = arith.constant dense<0.000000e+00> : vector<8x130xf32>
    %14 = tpu.matmul %2, %13, %cst_3 {dimension_numbers = #tpu.dot_dimension_numbers<[1], [0], [0], [1], [0, 0, 1, 1], [], []>} : vector<8x256xbf16>, vector<256x130xbf16>, vector<8x130xf32> -> vector<8x130xf32>
    %15 = arith.truncf %14 : vector<8x130xf32> to vector<8x130xbf16>
    %16 = tpu.iota {dimensions = array<i32: 0>} : vector<256x130xi32>
    %17 = tpu.iota {dimensions = array<i32: 1>} : vector<256x130xi32>
    %c2_i32_4 = arith.constant 2 : i32
    %18 = vector.broadcast %c2_i32_4 : i32 to vector<256x130xi32>
    %19 = arith.muli %17, %18 : vector<256x130xi32>
    %c-1_i32 = arith.constant -1 : i32
    %20 = vector.broadcast %c-1_i32 : i32 to vector<256x130xi32>
    %21 = arith.addi %19, %20 : vector<256x130xi32>
    %22 = arith.cmpi eq, %16, %21 : vector<256x130xi32>
    %cst_5 = arith.constant 1.000000e+00 : f32
    %cst_6 = arith.constant 0.000000e+00 : f32
    %23 = vector.broadcast %cst_5 : f32 to vector<256x130xf32>
    %24 = vector.broadcast %cst_6 : f32 to vector<256x130xf32>
    %25 = arith.select %22, %23, %24 : vector<256x130xi1>, vector<256x130xf32>
    %26 = arith.truncf %25 : vector<256x130xf32> to vector<256x130xbf16>
    %cst_7 = arith.constant dense<0.000000e+00> : vector<8x130xf32>
    %27 = tpu.matmul %2, %26, %cst_7 {dimension_numbers = #tpu.dot_dimension_numbers<[1], [0], [0], [1], [0, 0, 1, 1], [], []>} : vector<8x256xbf16>, vector<256x130xbf16>, vector<8x130xf32> -> vector<8x130xf32>
    %28 = arith.truncf %27 : vector<8x130xf32> to vector<8x130xbf16>
    %29 = vector.extract_strided_slice %15 {offsets = [0, 0], sizes = [8, 128], strides = [1, 1]} : vector<8x130xbf16> to vector<8x128xbf16>
    %30 = vector.extract_strided_slice %28 {offsets = [0, 0], sizes = [8, 128], strides = [1, 1]} : vector<8x130xbf16> to vector<8x128xbf16>
    %31 = vector.extract_strided_slice %15 {offsets = [0, 1], sizes = [8, 128], strides = [1, 1]} : vector<8x130xbf16> to vector<8x128xbf16>
    %32 = vector.extract_strided_slice %28 {offsets = [0, 1], sizes = [8, 128], strides = [1, 1]} : vector<8x130xbf16> to vector<8x128xbf16>
    %33 = vector.extract_strided_slice %15 {offsets = [0, 2], sizes = [8, 128], strides = [1, 1]} : vector<8x130xbf16> to vector<8x128xbf16>
    %34 = tpu.concatenate %29, %30, %31, %32, %33 in 0 : vector<8x128xbf16>, vector<8x128xbf16>, vector<8x128xbf16>, vector<8x128xbf16>, vector<8x128xbf16> -> vector<40x128xbf16>
    %c0_8 = arith.constant 0 : index
    %c0_9 = arith.constant 0 : index
    %35 = vector.load %arg2[%c0_8, %c0_9] : memref<16x40xbf16, #tpu.memory_space<vmem>>, vector<16x40xbf16>
    %cst_10 = arith.constant dense<0.000000e+00> : vector<16x128xf32>
    %36 = tpu.matmul %35, %34, %cst_10 {dimension_numbers = #tpu.dot_dimension_numbers<[1], [0], [0], [1], [0, 0, 1, 1], [], []>} : vector<16x40xbf16>, vector<40x128xbf16>, vector<16x128xf32> -> vector<16x128xf32>
    %c0_11 = arith.constant 0 : index
    %c0_12 = arith.constant 0 : index
    %37 = vector.load %arg3[%c0_11, %c0_12] : memref<16x1xf32, #tpu.memory_space<vmem>>, vector<16x1xf32>
    %38 = vector.broadcast %37 : vector<16x1xf32> to vector<16x128xf32>
    %39 = arith.mulf %36, %38 : vector<16x128xf32>
    %c0_13 = arith.constant 0 : index
    %c0_14 = arith.constant 0 : index
    %40 = vector.load %arg4[%c0_13, %c0_14] : memref<16x1xf32, #tpu.memory_space<vmem>>, vector<16x1xf32>
    %41 = vector.broadcast %40 : vector<16x1xf32> to vector<16x128xf32>
    %42 = arith.addf %39, %41 : vector<16x128xf32>
    %43 = arith.truncf %42 : vector<16x128xf32> to vector<16x128xbf16>
    %cst_15 = arith.constant 0.000000e+00 : bf16
    %44 = vector.broadcast %cst_15 : bf16 to vector<16x2xbf16>
    %45 = tpu.concatenate %44, %43, %44 in 1 : vector<16x2xbf16>, vector<16x128xbf16>, vector<16x2xbf16> -> vector<16x132xbf16>
    %46 = vector.extract_strided_slice %45 {offsets = [0, 0], sizes = [16, 128], strides = [1, 1]} : vector<16x132xbf16> to vector<16x128xbf16>
    %47 = vector.extract_strided_slice %45 {offsets = [0, 1], sizes = [16, 128], strides = [1, 1]} : vector<16x132xbf16> to vector<16x128xbf16>
    %48 = vector.extract_strided_slice %45 {offsets = [0, 2], sizes = [16, 128], strides = [1, 1]} : vector<16x132xbf16> to vector<16x128xbf16>
    %49 = vector.extract_strided_slice %45 {offsets = [0, 3], sizes = [16, 128], strides = [1, 1]} : vector<16x132xbf16> to vector<16x128xbf16>
    %50 = vector.extract_strided_slice %45 {offsets = [0, 4], sizes = [16, 128], strides = [1, 1]} : vector<16x132xbf16> to vector<16x128xbf16>
    %51 = tpu.concatenate %46, %47, %48, %49, %50 in 0 : vector<16x128xbf16>, vector<16x128xbf16>, vector<16x128xbf16>, vector<16x128xbf16>, vector<16x128xbf16> -> vector<80x128xbf16>
    %c0_16 = arith.constant 0 : index
    %c0_17 = arith.constant 0 : index
    %52 = vector.load %arg5[%c0_16, %c0_17] : memref<16x80xbf16, #tpu.memory_space<vmem>>, vector<16x80xbf16>
    %cst_18 = arith.constant dense<0.000000e+00> : vector<16x128xf32>
    %53 = tpu.matmul %52, %51, %cst_18 {dimension_numbers = #tpu.dot_dimension_numbers<[1], [0], [0], [1], [0, 0, 1, 1], [], []>} : vector<16x80xbf16>, vector<80x128xbf16>, vector<16x128xf32> -> vector<16x128xf32>
    %c0_19 = arith.constant 0 : index
    %c0_20 = arith.constant 0 : index
    %54 = vector.load %arg6[%c0_19, %c0_20] : memref<16x1xf32, #tpu.memory_space<vmem>>, vector<16x1xf32>
    %55 = vector.broadcast %54 : vector<16x1xf32> to vector<16x128xf32>
    %56 = arith.mulf %53, %55 : vector<16x128xf32>
    %c0_21 = arith.constant 0 : index
    %c0_22 = arith.constant 0 : index
    %57 = vector.load %arg7[%c0_21, %c0_22] : memref<16x1xf32, #tpu.memory_space<vmem>>, vector<16x1xf32>
    %58 = vector.broadcast %57 : vector<16x1xf32> to vector<16x128xf32>
    %59 = arith.addf %56, %58 : vector<16x128xf32>
    %cst_23 = arith.constant 0.000000e+00 : f32
    %60 = vector.broadcast %cst_23 : f32 to vector<16x128xf32>
    %61 = arith.maximumf %59, %60 : vector<16x128xf32>
    %62 = arith.truncf %61 : vector<16x128xf32> to vector<16x128xbf16>
    %cst_24 = arith.constant 0.000000e+00 : bf16
    %63 = vector.broadcast %cst_24 : bf16 to vector<16x2xbf16>
    %64 = tpu.concatenate %63, %62, %63 in 1 : vector<16x2xbf16>, vector<16x128xbf16>, vector<16x2xbf16> -> vector<16x132xbf16>
    %65 = vector.extract_strided_slice %64 {offsets = [0, 0], sizes = [16, 128], strides = [1, 1]} : vector<16x132xbf16> to vector<16x128xbf16>
    %66 = vector.extract_strided_slice %64 {offsets = [0, 1], sizes = [16, 128], strides = [1, 1]} : vector<16x132xbf16> to vector<16x128xbf16>
    %67 = vector.extract_strided_slice %64 {offsets = [0, 2], sizes = [16, 128], strides = [1, 1]} : vector<16x132xbf16> to vector<16x128xbf16>
    %68 = vector.extract_strided_slice %64 {offsets = [0, 3], sizes = [16, 128], strides = [1, 1]} : vector<16x132xbf16> to vector<16x128xbf16>
    %69 = vector.extract_strided_slice %64 {offsets = [0, 4], sizes = [16, 128], strides = [1, 1]} : vector<16x132xbf16> to vector<16x128xbf16>
    %70 = tpu.concatenate %65, %66, %67, %68, %69 in 0 : vector<16x128xbf16>, vector<16x128xbf16>, vector<16x128xbf16>, vector<16x128xbf16>, vector<16x128xbf16> -> vector<80x128xbf16>
    %c0_25 = arith.constant 0 : index
    %c0_26 = arith.constant 0 : index
    %71 = vector.load %arg8[%c0_25, %c0_26] : memref<16x80xbf16, #tpu.memory_space<vmem>>, vector<16x80xbf16>
    %cst_27 = arith.constant dense<0.000000e+00> : vector<16x128xf32>
    %72 = tpu.matmul %71, %70, %cst_27 {dimension_numbers = #tpu.dot_dimension_numbers<[1], [0], [0], [1], [0, 0, 1, 1], [], []>} : vector<16x80xbf16>, vector<80x128xbf16>, vector<16x128xf32> -> vector<16x128xf32>
    %73 = arith.addf %72, %42 : vector<16x128xf32>
    %c0_28 = arith.constant 0 : index
    %c0_29 = arith.constant 0 : index
    %74 = vector.load %arg9[%c0_28, %c0_29] : memref<16x1xf32, #tpu.memory_space<vmem>>, vector<16x1xf32>
    %75 = vector.broadcast %74 : vector<16x1xf32> to vector<16x128xf32>
    %76 = arith.mulf %73, %75 : vector<16x128xf32>
    %c0_30 = arith.constant 0 : index
    %c0_31 = arith.constant 0 : index
    %77 = vector.load %arg10[%c0_30, %c0_31] : memref<16x1xf32, #tpu.memory_space<vmem>>, vector<16x1xf32>
    %78 = vector.broadcast %77 : vector<16x1xf32> to vector<16x128xf32>
    %79 = arith.addf %76, %78 : vector<16x128xf32>
    %cst_32 = arith.constant 0.000000e+00 : f32
    %80 = vector.broadcast %cst_32 : f32 to vector<16x128xf32>
    %81 = arith.maximumf %79, %80 : vector<16x128xf32>
    %82 = arith.truncf %73 : vector<16x128xf32> to vector<16x128xbf16>
    %83 = tpu.iota {dimensions = array<i32: 0>} : vector<128x64xi32>
    %84 = tpu.iota {dimensions = array<i32: 1>} : vector<128x64xi32>
    %c2_i32_33 = arith.constant 2 : i32
    %85 = vector.broadcast %c2_i32_33 : i32 to vector<128x64xi32>
    %86 = arith.muli %84, %85 : vector<128x64xi32>
    %c0_i32 = arith.constant 0 : i32
    %87 = vector.broadcast %c0_i32 : i32 to vector<128x64xi32>
    %88 = arith.addi %86, %87 : vector<128x64xi32>
    %89 = arith.cmpi eq, %83, %88 : vector<128x64xi32>
    %cst_34 = arith.constant 1.000000e+00 : f32
    %cst_35 = arith.constant 0.000000e+00 : f32
    %90 = vector.broadcast %cst_34 : f32 to vector<128x64xf32>
    %91 = vector.broadcast %cst_35 : f32 to vector<128x64xf32>
    %92 = arith.select %89, %90, %91 : vector<128x64xi1>, vector<128x64xf32>
    %93 = arith.truncf %92 : vector<128x64xf32> to vector<128x64xbf16>
    %cst_36 = arith.constant dense<0.000000e+00> : vector<16x64xf32>
    %94 = tpu.matmul %82, %93, %cst_36 {dimension_numbers = #tpu.dot_dimension_numbers<[1], [0], [0], [1], [0, 0, 1, 1], [], []>} : vector<16x128xbf16>, vector<128x64xbf16>, vector<16x64xf32> -> vector<16x64xf32>
    %95 = tpu.iota {dimensions = array<i32: 0>} : vector<128x64xi32>
    %96 = tpu.iota {dimensions = array<i32: 1>} : vector<128x64xi32>
    %c2_i32_37 = arith.constant 2 : i32
    %97 = vector.broadcast %c2_i32_37 : i32 to vector<128x64xi32>
    %98 = arith.muli %96, %97 : vector<128x64xi32>
    %c1_i32 = arith.constant 1 : i32
    %99 = vector.broadcast %c1_i32 : i32 to vector<128x64xi32>
    %100 = arith.addi %98, %99 : vector<128x64xi32>
    %101 = arith.cmpi eq, %95, %100 : vector<128x64xi32>
    %cst_38 = arith.constant 1.000000e+00 : f32
    %cst_39 = arith.constant 0.000000e+00 : f32
    %102 = vector.broadcast %cst_38 : f32 to vector<128x64xf32>
    %103 = vector.broadcast %cst_39 : f32 to vector<128x64xf32>
    %104 = arith.select %101, %102, %103 : vector<128x64xi1>, vector<128x64xf32>
    %105 = arith.truncf %104 : vector<128x64xf32> to vector<128x64xbf16>
    %cst_40 = arith.constant dense<0.000000e+00> : vector<16x64xf32>
    %106 = tpu.matmul %82, %105, %cst_40 {dimension_numbers = #tpu.dot_dimension_numbers<[1], [0], [0], [1], [0, 0, 1, 1], [], []>} : vector<16x128xbf16>, vector<128x64xbf16>, vector<16x64xf32> -> vector<16x64xf32>
    %107 = arith.maximumf %94, %106 : vector<16x64xf32>
    %c0_41 = arith.constant 0 : index
    %c0_42 = arith.constant 0 : index
    %108 = vector.load %arg17[%c0_41, %c0_42] : memref<32x16xbf16, #tpu.memory_space<vmem>>, vector<32x16xbf16>
    %109 = arith.truncf %107 : vector<16x64xf32> to vector<16x64xbf16>
    %cst_43 = arith.constant dense<0.000000e+00> : vector<32x64xf32>
    %110 = tpu.matmul %108, %109, %cst_43 {dimension_numbers = #tpu.dot_dimension_numbers<[1], [0], [0], [1], [0, 0, 1, 1], [], []>} : vector<32x16xbf16>, vector<16x64xbf16>, vector<32x64xf32> -> vector<32x64xf32>
    %111 = arith.truncf %81 : vector<16x128xf32> to vector<16x128xbf16>
    %cst_44 = arith.constant 0.000000e+00 : bf16
    %112 = vector.broadcast %cst_44 : bf16 to vector<16x2xbf16>
    %113 = tpu.concatenate %112, %111, %112 in 1 : vector<16x2xbf16>, vector<16x128xbf16>, vector<16x2xbf16> -> vector<16x132xbf16>
    %114 = vector.extract_strided_slice %113 {offsets = [0, 0], sizes = [16, 128], strides = [1, 1]} : vector<16x132xbf16> to vector<16x128xbf16>
    %115 = vector.extract_strided_slice %113 {offsets = [0, 1], sizes = [16, 128], strides = [1, 1]} : vector<16x132xbf16> to vector<16x128xbf16>
    %116 = vector.extract_strided_slice %113 {offsets = [0, 2], sizes = [16, 128], strides = [1, 1]} : vector<16x132xbf16> to vector<16x128xbf16>
    %117 = vector.extract_strided_slice %113 {offsets = [0, 3], sizes = [16, 128], strides = [1, 1]} : vector<16x132xbf16> to vector<16x128xbf16>
    %118 = vector.extract_strided_slice %113 {offsets = [0, 4], sizes = [16, 128], strides = [1, 1]} : vector<16x132xbf16> to vector<16x128xbf16>
    %119 = tpu.concatenate %114, %115, %116, %117, %118 in 0 : vector<16x128xbf16>, vector<16x128xbf16>, vector<16x128xbf16>, vector<16x128xbf16>, vector<16x128xbf16> -> vector<80x128xbf16>
    %c0_45 = arith.constant 0 : index
    %c0_46 = arith.constant 0 : index
    %120 = vector.load %arg11[%c0_45, %c0_46] : memref<32x80xbf16, #tpu.memory_space<vmem>>, vector<32x80xbf16>
    %cst_47 = arith.constant dense<0.000000e+00> : vector<32x128xf32>
    %121 = tpu.matmul %120, %119, %cst_47 {dimension_numbers = #tpu.dot_dimension_numbers<[1], [0], [0], [1], [0, 0, 1, 1], [], []>} : vector<32x80xbf16>, vector<80x128xbf16>, vector<32x128xf32> -> vector<32x128xf32>
    %c0_48 = arith.constant 0 : index
    %c0_49 = arith.constant 0 : index
    %122 = vector.load %arg12[%c0_48, %c0_49] : memref<32x1xf32, #tpu.memory_space<vmem>>, vector<32x1xf32>
    %123 = vector.broadcast %122 : vector<32x1xf32> to vector<32x128xf32>
    %124 = arith.mulf %121, %123 : vector<32x128xf32>
    %c0_50 = arith.constant 0 : index
    %c0_51 = arith.constant 0 : index
    %125 = vector.load %arg13[%c0_50, %c0_51] : memref<32x1xf32, #tpu.memory_space<vmem>>, vector<32x1xf32>
    %126 = vector.broadcast %125 : vector<32x1xf32> to vector<32x128xf32>
    %127 = arith.addf %124, %126 : vector<32x128xf32>
    %cst_52 = arith.constant 0.000000e+00 : f32
    %128 = vector.broadcast %cst_52 : f32 to vector<32x128xf32>
    %129 = arith.maximumf %127, %128 : vector<32x128xf32>
    %130 = arith.truncf %129 : vector<32x128xf32> to vector<32x128xbf16>
    %131 = tpu.iota {dimensions = array<i32: 0>} : vector<128x66xi32>
    %132 = tpu.iota {dimensions = array<i32: 1>} : vector<128x66xi32>
    %c2_i32_53 = arith.constant 2 : i32
    %133 = vector.broadcast %c2_i32_53 : i32 to vector<128x66xi32>
    %134 = arith.muli %132, %133 : vector<128x66xi32>
    %c-2_i32_54 = arith.constant -2 : i32
    %135 = vector.broadcast %c-2_i32_54 : i32 to vector<128x66xi32>
    %136 = arith.addi %134, %135 : vector<128x66xi32>
    %137 = arith.cmpi eq, %131, %136 : vector<128x66xi32>
    %cst_55 = arith.constant 1.000000e+00 : f32
    %cst_56 = arith.constant 0.000000e+00 : f32
    %138 = vector.broadcast %cst_55 : f32 to vector<128x66xf32>
    %139 = vector.broadcast %cst_56 : f32 to vector<128x66xf32>
    %140 = arith.select %137, %138, %139 : vector<128x66xi1>, vector<128x66xf32>
    %141 = arith.truncf %140 : vector<128x66xf32> to vector<128x66xbf16>
    %cst_57 = arith.constant dense<0.000000e+00> : vector<32x66xf32>
    %142 = tpu.matmul %130, %141, %cst_57 {dimension_numbers = #tpu.dot_dimension_numbers<[1], [0], [0], [1], [0, 0, 1, 1], [], []>} : vector<32x128xbf16>, vector<128x66xbf16>, vector<32x66xf32> -> vector<32x66xf32>
    %143 = arith.truncf %142 : vector<32x66xf32> to vector<32x66xbf16>
    %144 = tpu.iota {dimensions = array<i32: 0>} : vector<128x66xi32>
    %145 = tpu.iota {dimensions = array<i32: 1>} : vector<128x66xi32>
    %c2_i32_58 = arith.constant 2 : i32
    %146 = vector.broadcast %c2_i32_58 : i32 to vector<128x66xi32>
    %147 = arith.muli %145, %146 : vector<128x66xi32>
    %c-1_i32_59 = arith.constant -1 : i32
    %148 = vector.broadcast %c-1_i32_59 : i32 to vector<128x66xi32>
    %149 = arith.addi %147, %148 : vector<128x66xi32>
    %150 = arith.cmpi eq, %144, %149 : vector<128x66xi32>
    %cst_60 = arith.constant 1.000000e+00 : f32
    %cst_61 = arith.constant 0.000000e+00 : f32
    %151 = vector.broadcast %cst_60 : f32 to vector<128x66xf32>
    %152 = vector.broadcast %cst_61 : f32 to vector<128x66xf32>
    %153 = arith.select %150, %151, %152 : vector<128x66xi1>, vector<128x66xf32>
    %154 = arith.truncf %153 : vector<128x66xf32> to vector<128x66xbf16>
    %cst_62 = arith.constant dense<0.000000e+00> : vector<32x66xf32>
    %155 = tpu.matmul %130, %154, %cst_62 {dimension_numbers = #tpu.dot_dimension_numbers<[1], [0], [0], [1], [0, 0, 1, 1], [], []>} : vector<32x128xbf16>, vector<128x66xbf16>, vector<32x66xf32> -> vector<32x66xf32>
    %156 = arith.truncf %155 : vector<32x66xf32> to vector<32x66xbf16>
    %157 = vector.extract_strided_slice %143 {offsets = [0, 0], sizes = [32, 64], strides = [1, 1]} : vector<32x66xbf16> to vector<32x64xbf16>
    %158 = vector.extract_strided_slice %156 {offsets = [0, 0], sizes = [32, 64], strides = [1, 1]} : vector<32x66xbf16> to vector<32x64xbf16>
    %159 = vector.extract_strided_slice %143 {offsets = [0, 1], sizes = [32, 64], strides = [1, 1]} : vector<32x66xbf16> to vector<32x64xbf16>
    %160 = vector.extract_strided_slice %156 {offsets = [0, 1], sizes = [32, 64], strides = [1, 1]} : vector<32x66xbf16> to vector<32x64xbf16>
    %161 = vector.extract_strided_slice %143 {offsets = [0, 2], sizes = [32, 64], strides = [1, 1]} : vector<32x66xbf16> to vector<32x64xbf16>
    %162 = tpu.concatenate %157, %158, %159, %160, %161 in 0 : vector<32x64xbf16>, vector<32x64xbf16>, vector<32x64xbf16>, vector<32x64xbf16>, vector<32x64xbf16> -> vector<160x64xbf16>
    %c0_63 = arith.constant 0 : index
    %c0_64 = arith.constant 0 : index
    %163 = vector.load %arg14[%c0_63, %c0_64] : memref<32x160xbf16, #tpu.memory_space<vmem>>, vector<32x160xbf16>
    %cst_65 = arith.constant dense<0.000000e+00> : vector<32x64xf32>
    %164 = tpu.matmul %163, %162, %cst_65 {dimension_numbers = #tpu.dot_dimension_numbers<[1], [0], [0], [1], [0, 0, 1, 1], [], []>} : vector<32x160xbf16>, vector<160x64xbf16>, vector<32x64xf32> -> vector<32x64xf32>
    %165 = arith.addf %164, %110 : vector<32x64xf32>
    %c0_66 = arith.constant 0 : index
    %c0_67 = arith.constant 0 : index
    %166 = vector.load %arg15[%c0_66, %c0_67] : memref<32x1xf32, #tpu.memory_space<vmem>>, vector<32x1xf32>
    %167 = vector.broadcast %166 : vector<32x1xf32> to vector<32x64xf32>
    %168 = arith.mulf %165, %167 : vector<32x64xf32>
    %c0_68 = arith.constant 0 : index
    %c0_69 = arith.constant 0 : index
    %169 = vector.load %arg16[%c0_68, %c0_69] : memref<32x1xf32, #tpu.memory_space<vmem>>, vector<32x1xf32>
    %170 = vector.broadcast %169 : vector<32x1xf32> to vector<32x64xf32>
    %171 = arith.addf %168, %170 : vector<32x64xf32>
    %cst_70 = arith.constant 0.000000e+00 : f32
    %172 = vector.broadcast %cst_70 : f32 to vector<32x64xf32>
    %173 = arith.maximumf %171, %172 : vector<32x64xf32>
    %174 = arith.truncf %165 : vector<32x64xf32> to vector<32x64xbf16>
    %175 = tpu.iota {dimensions = array<i32: 0>} : vector<64x32xi32>
    %176 = tpu.iota {dimensions = array<i32: 1>} : vector<64x32xi32>
    %c2_i32_71 = arith.constant 2 : i32
    %177 = vector.broadcast %c2_i32_71 : i32 to vector<64x32xi32>
    %178 = arith.muli %176, %177 : vector<64x32xi32>
    %c0_i32_72 = arith.constant 0 : i32
    %179 = vector.broadcast %c0_i32_72 : i32 to vector<64x32xi32>
    %180 = arith.addi %178, %179 : vector<64x32xi32>
    %181 = arith.cmpi eq, %175, %180 : vector<64x32xi32>
    %cst_73 = arith.constant 1.000000e+00 : f32
    %cst_74 = arith.constant 0.000000e+00 : f32
    %182 = vector.broadcast %cst_73 : f32 to vector<64x32xf32>
    %183 = vector.broadcast %cst_74 : f32 to vector<64x32xf32>
    %184 = arith.select %181, %182, %183 : vector<64x32xi1>, vector<64x32xf32>
    %185 = arith.truncf %184 : vector<64x32xf32> to vector<64x32xbf16>
    %cst_75 = arith.constant dense<0.000000e+00> : vector<32x32xf32>
    %186 = tpu.matmul %174, %185, %cst_75 {dimension_numbers = #tpu.dot_dimension_numbers<[1], [0], [0], [1], [0, 0, 1, 1], [], []>} : vector<32x64xbf16>, vector<64x32xbf16>, vector<32x32xf32> -> vector<32x32xf32>
    %187 = tpu.iota {dimensions = array<i32: 0>} : vector<64x32xi32>
    %188 = tpu.iota {dimensions = array<i32: 1>} : vector<64x32xi32>
    %c2_i32_76 = arith.constant 2 : i32
    %189 = vector.broadcast %c2_i32_76 : i32 to vector<64x32xi32>
    %190 = arith.muli %188, %189 : vector<64x32xi32>
    %c1_i32_77 = arith.constant 1 : i32
    %191 = vector.broadcast %c1_i32_77 : i32 to vector<64x32xi32>
    %192 = arith.addi %190, %191 : vector<64x32xi32>
    %193 = arith.cmpi eq, %187, %192 : vector<64x32xi32>
    %cst_78 = arith.constant 1.000000e+00 : f32
    %cst_79 = arith.constant 0.000000e+00 : f32
    %194 = vector.broadcast %cst_78 : f32 to vector<64x32xf32>
    %195 = vector.broadcast %cst_79 : f32 to vector<64x32xf32>
    %196 = arith.select %193, %194, %195 : vector<64x32xi1>, vector<64x32xf32>
    %197 = arith.truncf %196 : vector<64x32xf32> to vector<64x32xbf16>
    %cst_80 = arith.constant dense<0.000000e+00> : vector<32x32xf32>
    %198 = tpu.matmul %174, %197, %cst_80 {dimension_numbers = #tpu.dot_dimension_numbers<[1], [0], [0], [1], [0, 0, 1, 1], [], []>} : vector<32x64xbf16>, vector<64x32xbf16>, vector<32x32xf32> -> vector<32x32xf32>
    %199 = arith.maximumf %186, %198 : vector<32x32xf32>
    %200 = arith.truncf %173 : vector<32x64xf32> to vector<32x64xbf16>
    %cst_81 = arith.constant 0.000000e+00 : bf16
    %201 = vector.broadcast %cst_81 : bf16 to vector<32x2xbf16>
    %202 = tpu.concatenate %201, %200, %201 in 1 : vector<32x2xbf16>, vector<32x64xbf16>, vector<32x2xbf16> -> vector<32x68xbf16>
    %203 = vector.extract_strided_slice %202 {offsets = [0, 0], sizes = [32, 64], strides = [1, 1]} : vector<32x68xbf16> to vector<32x64xbf16>
    %204 = vector.extract_strided_slice %202 {offsets = [0, 1], sizes = [32, 64], strides = [1, 1]} : vector<32x68xbf16> to vector<32x64xbf16>
    %205 = vector.extract_strided_slice %202 {offsets = [0, 2], sizes = [32, 64], strides = [1, 1]} : vector<32x68xbf16> to vector<32x64xbf16>
    %206 = vector.extract_strided_slice %202 {offsets = [0, 3], sizes = [32, 64], strides = [1, 1]} : vector<32x68xbf16> to vector<32x64xbf16>
    %207 = vector.extract_strided_slice %202 {offsets = [0, 4], sizes = [32, 64], strides = [1, 1]} : vector<32x68xbf16> to vector<32x64xbf16>
    %208 = tpu.concatenate %203, %204, %205, %206, %207 in 0 : vector<32x64xbf16>, vector<32x64xbf16>, vector<32x64xbf16>, vector<32x64xbf16>, vector<32x64xbf16> -> vector<160x64xbf16>
    %c0_82 = arith.constant 0 : index
    %c0_83 = arith.constant 0 : index
    %209 = vector.load %arg18[%c0_82, %c0_83] : memref<32x160xbf16, #tpu.memory_space<vmem>>, vector<32x160xbf16>
    %cst_84 = arith.constant dense<0.000000e+00> : vector<32x64xf32>
    %210 = tpu.matmul %209, %208, %cst_84 {dimension_numbers = #tpu.dot_dimension_numbers<[1], [0], [0], [1], [0, 0, 1, 1], [], []>} : vector<32x160xbf16>, vector<160x64xbf16>, vector<32x64xf32> -> vector<32x64xf32>
    %c0_85 = arith.constant 0 : index
    %c0_86 = arith.constant 0 : index
    %211 = vector.load %arg19[%c0_85, %c0_86] : memref<32x1xf32, #tpu.memory_space<vmem>>, vector<32x1xf32>
    %212 = vector.broadcast %211 : vector<32x1xf32> to vector<32x64xf32>
    %213 = arith.mulf %210, %212 : vector<32x64xf32>
    %c0_87 = arith.constant 0 : index
    %c0_88 = arith.constant 0 : index
    %214 = vector.load %arg20[%c0_87, %c0_88] : memref<32x1xf32, #tpu.memory_space<vmem>>, vector<32x1xf32>
    %215 = vector.broadcast %214 : vector<32x1xf32> to vector<32x64xf32>
    %216 = arith.addf %213, %215 : vector<32x64xf32>
    %cst_89 = arith.constant 0.000000e+00 : f32
    %217 = vector.broadcast %cst_89 : f32 to vector<32x64xf32>
    %218 = arith.maximumf %216, %217 : vector<32x64xf32>
    %219 = arith.truncf %218 : vector<32x64xf32> to vector<32x64xbf16>
    %220 = tpu.iota {dimensions = array<i32: 0>} : vector<64x34xi32>
    %221 = tpu.iota {dimensions = array<i32: 1>} : vector<64x34xi32>
    %c2_i32_90 = arith.constant 2 : i32
    %222 = vector.broadcast %c2_i32_90 : i32 to vector<64x34xi32>
    %223 = arith.muli %221, %222 : vector<64x34xi32>
    %c-2_i32_91 = arith.constant -2 : i32
    %224 = vector.broadcast %c-2_i32_91 : i32 to vector<64x34xi32>
    %225 = arith.addi %223, %224 : vector<64x34xi32>
    %226 = arith.cmpi eq, %220, %225 : vector<64x34xi32>
    %cst_92 = arith.constant 1.000000e+00 : f32
    %cst_93 = arith.constant 0.000000e+00 : f32
    %227 = vector.broadcast %cst_92 : f32 to vector<64x34xf32>
    %228 = vector.broadcast %cst_93 : f32 to vector<64x34xf32>
    %229 = arith.select %226, %227, %228 : vector<64x34xi1>, vector<64x34xf32>
    %230 = arith.truncf %229 : vector<64x34xf32> to vector<64x34xbf16>
    %cst_94 = arith.constant dense<0.000000e+00> : vector<32x34xf32>
    %231 = tpu.matmul %219, %230, %cst_94 {dimension_numbers = #tpu.dot_dimension_numbers<[1], [0], [0], [1], [0, 0, 1, 1], [], []>} : vector<32x64xbf16>, vector<64x34xbf16>, vector<32x34xf32> -> vector<32x34xf32>
    %232 = arith.truncf %231 : vector<32x34xf32> to vector<32x34xbf16>
    %233 = tpu.iota {dimensions = array<i32: 0>} : vector<64x34xi32>
    %234 = tpu.iota {dimensions = array<i32: 1>} : vector<64x34xi32>
    %c2_i32_95 = arith.constant 2 : i32
    %235 = vector.broadcast %c2_i32_95 : i32 to vector<64x34xi32>
    %236 = arith.muli %234, %235 : vector<64x34xi32>
    %c-1_i32_96 = arith.constant -1 : i32
    %237 = vector.broadcast %c-1_i32_96 : i32 to vector<64x34xi32>
    %238 = arith.addi %236, %237 : vector<64x34xi32>
    %239 = arith.cmpi eq, %233, %238 : vector<64x34xi32>
    %cst_97 = arith.constant 1.000000e+00 : f32
    %cst_98 = arith.constant 0.000000e+00 : f32
    %240 = vector.broadcast %cst_97 : f32 to vector<64x34xf32>
    %241 = vector.broadcast %cst_98 : f32 to vector<64x34xf32>
    %242 = arith.select %239, %240, %241 : vector<64x34xi1>, vector<64x34xf32>
    %243 = arith.truncf %242 : vector<64x34xf32> to vector<64x34xbf16>
    %cst_99 = arith.constant dense<0.000000e+00> : vector<32x34xf32>
    %244 = tpu.matmul %219, %243, %cst_99 {dimension_numbers = #tpu.dot_dimension_numbers<[1], [0], [0], [1], [0, 0, 1, 1], [], []>} : vector<32x64xbf16>, vector<64x34xbf16>, vector<32x34xf32> -> vector<32x34xf32>
    %245 = arith.truncf %244 : vector<32x34xf32> to vector<32x34xbf16>
    %246 = vector.extract_strided_slice %232 {offsets = [0, 0], sizes = [32, 32], strides = [1, 1]} : vector<32x34xbf16> to vector<32x32xbf16>
    %247 = vector.extract_strided_slice %245 {offsets = [0, 0], sizes = [32, 32], strides = [1, 1]} : vector<32x34xbf16> to vector<32x32xbf16>
    %248 = vector.extract_strided_slice %232 {offsets = [0, 1], sizes = [32, 32], strides = [1, 1]} : vector<32x34xbf16> to vector<32x32xbf16>
    %249 = vector.extract_strided_slice %245 {offsets = [0, 1], sizes = [32, 32], strides = [1, 1]} : vector<32x34xbf16> to vector<32x32xbf16>
    %250 = vector.extract_strided_slice %232 {offsets = [0, 2], sizes = [32, 32], strides = [1, 1]} : vector<32x34xbf16> to vector<32x32xbf16>
    %251 = tpu.concatenate %246, %247, %248, %249, %250 in 0 : vector<32x32xbf16>, vector<32x32xbf16>, vector<32x32xbf16>, vector<32x32xbf16>, vector<32x32xbf16> -> vector<160x32xbf16>
    %c0_100 = arith.constant 0 : index
    %c0_101 = arith.constant 0 : index
    %252 = vector.load %arg21[%c0_100, %c0_101] : memref<32x160xbf16, #tpu.memory_space<vmem>>, vector<32x160xbf16>
    %cst_102 = arith.constant dense<0.000000e+00> : vector<32x32xf32>
    %253 = tpu.matmul %252, %251, %cst_102 {dimension_numbers = #tpu.dot_dimension_numbers<[1], [0], [0], [1], [0, 0, 1, 1], [], []>} : vector<32x160xbf16>, vector<160x32xbf16>, vector<32x32xf32> -> vector<32x32xf32>
    %254 = arith.addf %253, %199 : vector<32x32xf32>
    %c0_103 = arith.constant 0 : index
    %c0_104 = arith.constant 0 : index
    %255 = vector.load %arg22[%c0_103, %c0_104] : memref<32x1xf32, #tpu.memory_space<vmem>>, vector<32x1xf32>
    %256 = vector.broadcast %255 : vector<32x1xf32> to vector<32x32xf32>
    %257 = arith.mulf %254, %256 : vector<32x32xf32>
    %c0_105 = arith.constant 0 : index
    %c0_106 = arith.constant 0 : index
    %258 = vector.load %arg23[%c0_105, %c0_106] : memref<32x1xf32, #tpu.memory_space<vmem>>, vector<32x1xf32>
    %259 = vector.broadcast %258 : vector<32x1xf32> to vector<32x32xf32>
    %260 = arith.addf %257, %259 : vector<32x32xf32>
    %cst_107 = arith.constant 0.000000e+00 : f32
    %261 = vector.broadcast %cst_107 : f32 to vector<32x32xf32>
    %262 = arith.maximumf %260, %261 : vector<32x32xf32>
    %263 = vector.extract_strided_slice %262 {offsets = [0, 0], sizes = [1, 32], strides = [1, 1]} : vector<32x32xf32> to vector<1x32xf32>
    %264 = vector.extract_strided_slice %262 {offsets = [1, 0], sizes = [1, 32], strides = [1, 1]} : vector<32x32xf32> to vector<1x32xf32>
    %265 = vector.extract_strided_slice %262 {offsets = [2, 0], sizes = [1, 32], strides = [1, 1]} : vector<32x32xf32> to vector<1x32xf32>
    %266 = vector.extract_strided_slice %262 {offsets = [3, 0], sizes = [1, 32], strides = [1, 1]} : vector<32x32xf32> to vector<1x32xf32>
    %267 = vector.extract_strided_slice %262 {offsets = [4, 0], sizes = [1, 32], strides = [1, 1]} : vector<32x32xf32> to vector<1x32xf32>
    %268 = vector.extract_strided_slice %262 {offsets = [5, 0], sizes = [1, 32], strides = [1, 1]} : vector<32x32xf32> to vector<1x32xf32>
    %269 = vector.extract_strided_slice %262 {offsets = [6, 0], sizes = [1, 32], strides = [1, 1]} : vector<32x32xf32> to vector<1x32xf32>
    %270 = vector.extract_strided_slice %262 {offsets = [7, 0], sizes = [1, 32], strides = [1, 1]} : vector<32x32xf32> to vector<1x32xf32>
    %271 = vector.extract_strided_slice %262 {offsets = [8, 0], sizes = [1, 32], strides = [1, 1]} : vector<32x32xf32> to vector<1x32xf32>
    %272 = vector.extract_strided_slice %262 {offsets = [9, 0], sizes = [1, 32], strides = [1, 1]} : vector<32x32xf32> to vector<1x32xf32>
    %273 = vector.extract_strided_slice %262 {offsets = [10, 0], sizes = [1, 32], strides = [1, 1]} : vector<32x32xf32> to vector<1x32xf32>
    %274 = vector.extract_strided_slice %262 {offsets = [11, 0], sizes = [1, 32], strides = [1, 1]} : vector<32x32xf32> to vector<1x32xf32>
    %275 = vector.extract_strided_slice %262 {offsets = [12, 0], sizes = [1, 32], strides = [1, 1]} : vector<32x32xf32> to vector<1x32xf32>
    %276 = vector.extract_strided_slice %262 {offsets = [13, 0], sizes = [1, 32], strides = [1, 1]} : vector<32x32xf32> to vector<1x32xf32>
    %277 = vector.extract_strided_slice %262 {offsets = [14, 0], sizes = [1, 32], strides = [1, 1]} : vector<32x32xf32> to vector<1x32xf32>
    %278 = vector.extract_strided_slice %262 {offsets = [15, 0], sizes = [1, 32], strides = [1, 1]} : vector<32x32xf32> to vector<1x32xf32>
    %279 = vector.extract_strided_slice %262 {offsets = [16, 0], sizes = [1, 32], strides = [1, 1]} : vector<32x32xf32> to vector<1x32xf32>
    %280 = vector.extract_strided_slice %262 {offsets = [17, 0], sizes = [1, 32], strides = [1, 1]} : vector<32x32xf32> to vector<1x32xf32>
    %281 = vector.extract_strided_slice %262 {offsets = [18, 0], sizes = [1, 32], strides = [1, 1]} : vector<32x32xf32> to vector<1x32xf32>
    %282 = vector.extract_strided_slice %262 {offsets = [19, 0], sizes = [1, 32], strides = [1, 1]} : vector<32x32xf32> to vector<1x32xf32>
    %283 = vector.extract_strided_slice %262 {offsets = [20, 0], sizes = [1, 32], strides = [1, 1]} : vector<32x32xf32> to vector<1x32xf32>
    %284 = vector.extract_strided_slice %262 {offsets = [21, 0], sizes = [1, 32], strides = [1, 1]} : vector<32x32xf32> to vector<1x32xf32>
    %285 = vector.extract_strided_slice %262 {offsets = [22, 0], sizes = [1, 32], strides = [1, 1]} : vector<32x32xf32> to vector<1x32xf32>
    %286 = vector.extract_strided_slice %262 {offsets = [23, 0], sizes = [1, 32], strides = [1, 1]} : vector<32x32xf32> to vector<1x32xf32>
    %287 = vector.extract_strided_slice %262 {offsets = [24, 0], sizes = [1, 32], strides = [1, 1]} : vector<32x32xf32> to vector<1x32xf32>
    %288 = vector.extract_strided_slice %262 {offsets = [25, 0], sizes = [1, 32], strides = [1, 1]} : vector<32x32xf32> to vector<1x32xf32>
    %289 = vector.extract_strided_slice %262 {offsets = [26, 0], sizes = [1, 32], strides = [1, 1]} : vector<32x32xf32> to vector<1x32xf32>
    %290 = vector.extract_strided_slice %262 {offsets = [27, 0], sizes = [1, 32], strides = [1, 1]} : vector<32x32xf32> to vector<1x32xf32>
    %291 = vector.extract_strided_slice %262 {offsets = [28, 0], sizes = [1, 32], strides = [1, 1]} : vector<32x32xf32> to vector<1x32xf32>
    %292 = vector.extract_strided_slice %262 {offsets = [29, 0], sizes = [1, 32], strides = [1, 1]} : vector<32x32xf32> to vector<1x32xf32>
    %293 = vector.extract_strided_slice %262 {offsets = [30, 0], sizes = [1, 32], strides = [1, 1]} : vector<32x32xf32> to vector<1x32xf32>
    %294 = vector.extract_strided_slice %262 {offsets = [31, 0], sizes = [1, 32], strides = [1, 1]} : vector<32x32xf32> to vector<1x32xf32>
    %295 = tpu.concatenate %263, %264, %265, %266, %267, %268, %269, %270, %271, %272, %273, %274, %275, %276, %277, %278 in 1 : vector<1x32xf32>, vector<1x32xf32>, vector<1x32xf32>, vector<1x32xf32>, vector<1x32xf32>, vector<1x32xf32>, vector<1x32xf32>, vector<1x32xf32>, vector<1x32xf32>, vector<1x32xf32>, vector<1x32xf32>, vector<1x32xf32>, vector<1x32xf32>, vector<1x32xf32>, vector<1x32xf32>, vector<1x32xf32> -> vector<1x512xf32>
    %296 = tpu.concatenate %279, %280, %281, %282, %283, %284, %285, %286, %287, %288, %289, %290, %291, %292, %293, %294 in 1 : vector<1x32xf32>, vector<1x32xf32>, vector<1x32xf32>, vector<1x32xf32>, vector<1x32xf32>, vector<1x32xf32>, vector<1x32xf32>, vector<1x32xf32>, vector<1x32xf32>, vector<1x32xf32>, vector<1x32xf32>, vector<1x32xf32>, vector<1x32xf32>, vector<1x32xf32>, vector<1x32xf32>, vector<1x32xf32> -> vector<1x512xf32>
    %297 = tpu.concatenate %295, %296 in 1 : vector<1x512xf32>, vector<1x512xf32> -> vector<1x1024xf32>
    %c0_108 = arith.constant 0 : index
    %c0_109 = arith.constant 0 : index
    %298 = vector.load %arg24[%c0_108, %c0_109] : memref<1024x128xbf16, #tpu.memory_space<vmem>>, vector<1024x128xbf16>
    %299 = arith.truncf %297 : vector<1x1024xf32> to vector<1x1024xbf16>
    %cst_110 = arith.constant dense<0.000000e+00> : vector<1x128xf32>
    %300 = tpu.matmul %299, %298, %cst_110 {dimension_numbers = #tpu.dot_dimension_numbers<[1], [0], [0], [1], [0, 0, 1, 1], [], []>} : vector<1x1024xbf16>, vector<1024x128xbf16>, vector<1x128xf32> -> vector<1x128xf32>
    %c0_111 = arith.constant 0 : index
    %c0_112 = arith.constant 0 : index
    %301 = vector.load %arg25[%c0_111, %c0_112] : memref<1x128xf32, #tpu.memory_space<vmem>>, vector<1x128xf32>
    %302 = arith.addf %300, %301 : vector<1x128xf32>
    %303 = vector.shape_cast %302 : vector<1x128xf32> to vector<1x1x128xf32>
    %c0_113 = arith.constant 0 : index
    %c0_114 = arith.constant 0 : index
    %c0_115 = arith.constant 0 : index
    %304 = vector.load %arg26[%c0_113, %c0_114, %c0_115] : memref<1x1x128xf32, #tpu.memory_space<vmem>>, vector<1x1x128xf32>
    tpu.vector_store %arg26[%c0_113, %c0_114, %c0_115], %303 {strides = array<i32>} : memref<1x1x128xf32, #tpu.memory_space<vmem>>, vector<1x1x128xf32>,
    return
  }
  func.func @transform_0(%arg0: i32) -> (i32, i32, i32) {
    %c0_i32 = arith.constant 0 : i32
    %c0_i32_0 = arith.constant 0 : i32
    %c0_i32_1 = arith.constant 0 : i32
    return %arg0, %c0_i32, %c0_i32_0 : i32, i32, i32
  }
  func.func @transform_1(%arg0: i32) -> (i32, i32) {
    %c0_i32 = arith.constant 0 : i32
    %c0_i32_0 = arith.constant 0 : i32
    %c0_i32_1 = arith.constant 0 : i32
    return %c0_i32, %c0_i32_0 : i32, i32
  }
  func.func @transform_2(%arg0: i32) -> (i32, i32) {
    %c0_i32 = arith.constant 0 : i32
    %c0_i32_0 = arith.constant 0 : i32
    %c0_i32_1 = arith.constant 0 : i32
    return %c0_i32, %c0_i32_0 : i32, i32
  }
  func.func @transform_3(%arg0: i32) -> (i32, i32) {
    %c0_i32 = arith.constant 0 : i32
    %c0_i32_0 = arith.constant 0 : i32
    %c0_i32_1 = arith.constant 0 : i32
    return %c0_i32, %c0_i32_0 : i32, i32
  }
  func.func @transform_4(%arg0: i32) -> (i32, i32) {
    %c0_i32 = arith.constant 0 : i32
    %c0_i32_0 = arith.constant 0 : i32
    %c0_i32_1 = arith.constant 0 : i32
    return %c0_i32, %c0_i32_0 : i32, i32
  }
  func.func @transform_5(%arg0: i32) -> (i32, i32) {
    %c0_i32 = arith.constant 0 : i32
    %c0_i32_0 = arith.constant 0 : i32
    %c0_i32_1 = arith.constant 0 : i32
    return %c0_i32, %c0_i32_0 : i32, i32
  }
  func.func @transform_6(%arg0: i32) -> (i32, i32) {
    %c0_i32 = arith.constant 0 : i32
    %c0_i32_0 = arith.constant 0 : i32
    %c0_i32_1 = arith.constant 0 : i32
    return %c0_i32, %c0_i32_0 : i32, i32
  }
  func.func @transform_7(%arg0: i32) -> (i32, i32) {
    %c0_i32 = arith.constant 0 : i32
    %c0_i32_0 = arith.constant 0 : i32
    %c0_i32_1 = arith.constant 0 : i32
    return %c0_i32, %c0_i32_0 : i32, i32
  }
  func.func @transform_8(%arg0: i32) -> (i32, i32) {
    %c0_i32 = arith.constant 0 : i32
    %c0_i32_0 = arith.constant 0 : i32
    %c0_i32_1 = arith.constant 0 : i32
    return %c0_i32, %c0_i32_0 : i32, i32
  }
  func.func @transform_9(%arg0: i32) -> (i32, i32) {
    %c0_i32 = arith.constant 0 : i32
    %c0_i32_0 = arith.constant 0 : i32
    %c0_i32_1 = arith.constant 0 : i32
    return %c0_i32, %c0_i32_0 : i32, i32
  }
  func.func @transform_10(%arg0: i32) -> (i32, i32) {
    %c0_i32 = arith.constant 0 : i32
    %c0_i32_0 = arith.constant 0 : i32
    %c0_i32_1 = arith.constant 0 : i32
    return %c0_i32, %c0_i32_0 : i32, i32
  }
  func.func @transform_11(%arg0: i32) -> (i32, i32) {
    %c0_i32 = arith.constant 0 : i32
    %c0_i32_0 = arith.constant 0 : i32
    %c0_i32_1 = arith.constant 0 : i32
    return %c0_i32, %c0_i32_0 : i32, i32
  }
  func.func @transform_12(%arg0: i32) -> (i32, i32) {
    %c0_i32 = arith.constant 0 : i32
    %c0_i32_0 = arith.constant 0 : i32
    %c0_i32_1 = arith.constant 0 : i32
    return %c0_i32, %c0_i32_0 : i32, i32
  }
  func.func @transform_13(%arg0: i32) -> (i32, i32) {
    %c0_i32 = arith.constant 0 : i32
    %c0_i32_0 = arith.constant 0 : i32
    %c0_i32_1 = arith.constant 0 : i32
    return %c0_i32, %c0_i32_0 : i32, i32
  }
  func.func @transform_14(%arg0: i32) -> (i32, i32) {
    %c0_i32 = arith.constant 0 : i32
    %c0_i32_0 = arith.constant 0 : i32
    %c0_i32_1 = arith.constant 0 : i32
    return %c0_i32, %c0_i32_0 : i32, i32
  }
  func.func @transform_15(%arg0: i32) -> (i32, i32) {
    %c0_i32 = arith.constant 0 : i32
    %c0_i32_0 = arith.constant 0 : i32
    %c0_i32_1 = arith.constant 0 : i32
    return %c0_i32, %c0_i32_0 : i32, i32
  }
  func.func @transform_16(%arg0: i32) -> (i32, i32) {
    %c0_i32 = arith.constant 0 : i32
    %c0_i32_0 = arith.constant 0 : i32
    %c0_i32_1 = arith.constant 0 : i32
    return %c0_i32, %c0_i32_0 : i32, i32
  }
  func.func @transform_17(%arg0: i32) -> (i32, i32) {
    %c0_i32 = arith.constant 0 : i32
    %c0_i32_0 = arith.constant 0 : i32
    %c0_i32_1 = arith.constant 0 : i32
    return %c0_i32, %c0_i32_0 : i32, i32
  }
  func.func @transform_18(%arg0: i32) -> (i32, i32) {
    %c0_i32 = arith.constant 0 : i32
    %c0_i32_0 = arith.constant 0 : i32
    %c0_i32_1 = arith.constant 0 : i32
    return %c0_i32, %c0_i32_0 : i32, i32
  }
  func.func @transform_19(%arg0: i32) -> (i32, i32) {
    %c0_i32 = arith.constant 0 : i32
    %c0_i32_0 = arith.constant 0 : i32
    %c0_i32_1 = arith.constant 0 : i32
    return %c0_i32, %c0_i32_0 : i32, i32
  }
  func.func @transform_20(%arg0: i32) -> (i32, i32) {
    %c0_i32 = arith.constant 0 : i32
    %c0_i32_0 = arith.constant 0 : i32
    %c0_i32_1 = arith.constant 0 : i32
    return %c0_i32, %c0_i32_0 : i32, i32
  }
  func.func @transform_21(%arg0: i32) -> (i32, i32) {
    %c0_i32 = arith.constant 0 : i32
    %c0_i32_0 = arith.constant 0 : i32
    %c0_i32_1 = arith.constant 0 : i32
    return %c0_i32, %c0_i32_0 : i32, i32
  }
  func.func @transform_22(%arg0: i32) -> (i32, i32) {
    %c0_i32 = arith.constant 0 : i32
    %c0_i32_0 = arith.constant 0 : i32
    %c0_i32_1 = arith.constant 0 : i32
    return %c0_i32, %c0_i32_0 : i32, i32
  }
  func.func @transform_23(%arg0: i32) -> (i32, i32) {
    %c0_i32 = arith.constant 0 : i32
    %c0_i32_0 = arith.constant 0 : i32
    %c0_i32_1 = arith.constant 0 : i32
    return %c0_i32, %c0_i32_0 : i32, i32
  }
  func.func @transform_24(%arg0: i32) -> (i32, i32) {
    %c0_i32 = arith.constant 0 : i32
    %c0_i32_0 = arith.constant 0 : i32
    %c0_i32_1 = arith.constant 0 : i32
    return %c0_i32, %c0_i32_0 : i32, i32
  }
  func.func @transform_25(%arg0: i32) -> (i32, i32, i32) {
    %c0_i32 = arith.constant 0 : i32
    %c0_i32_0 = arith.constant 0 : i32
    %c0_i32_1 = arith.constant 0 : i32
    return %arg0, %c0_i32, %c0_i32_0 : i32, i32, i32
  }
}

</mosaic_0001>

<bundles_post_ra>
// kernel: tpu_custom_call.1
= control target key start
LH: loop header
LB: loop body
LE: loop exit
PB: predicated region body
PF: predicated region fallthrough
CT: control target
= control target key end

     0   :  { %s6265_s0 = inlined_call_operand.vmem [shape: f32[2,8,256], index: 0, kind: input, shape index: {}]   ;;  %s6266_s1 = inlined_call_operand.vmem [shape: bf16[16,40], index: 1, kind: input, shape index: {}]   ;;  %s6267_s2 = inlined_call_operand.vmem [shape: f32[16,1], index: 2, kind: input, shape index: {}]   ;;  %s6268_s3 = inlined_call_operand.vmem [shape: f32[16,1], index: 3, kind: input, shape index: {}]   ;;  %s6269_s4 = inlined_call_operand.vmem [shape: bf16[16,80], index: 4, kind: input, shape index: {}]   ;;  %s6270_s5 = inlined_call_operand.vmem [shape: f32[16,1], index: 5, kind: input, shape index: {}]   ;;  %s6271_s6 = inlined_call_operand.vmem [shape: f32[16,1], index: 6, kind: input, shape index: {}]   ;;  %s6272_s7 = inlined_call_operand.vmem [shape: bf16[16,80], index: 7, kind: input, shape index: {}]   ;;  %s6273_s8 = inlined_call_operand.vmem [shape: f32[16,1], index: 8, kind: input, shape index: {}]   ;;  %s6274_s9 = inlined_call_operand.vmem [shape: f32[16,1], index: 9, kind: input, shape index: {}]   ;;  %s6275_s10 = inlined_call_operand.vmem [shape: bf16[32,80], index: 10, kind: input, shape index: {}]   ;;  %s6276_s11 = inlined_call_operand.vmem [shape: f32[32,1], index: 11, kind: input, shape index: {}]   ;;  %s6277_s12 = inlined_call_operand.vmem [shape: f32[32,1], index: 12, kind: input, shape index: {}]   ;;  %s6278_s13 = inlined_call_operand.vmem [shape: bf16[32,160], index: 13, kind: input, shape index: {}]   ;;  %s6279_s14 = inlined_call_operand.vmem [shape: f32[32,1], index: 14, kind: input, shape index: {}]   ;;  %s6280_s15 = inlined_call_operand.vmem [shape: f32[32,1], index: 15, kind: input, shape index: {}]   ;;  %s6281_s16 = inlined_call_operand.vmem [shape: bf16[32,16], index: 16, kind: input, shape index: {}]   ;;  %s6282_s17 = inlined_call_operand.vmem [shape: bf16[32,160], index: 17, kind: input, shape index: {}]   ;;  %s6283_s18 = inlined_call_operand.vmem [shape: f32[32,1], index: 18, kind: input, shape index: {}]   ;;  %s6284_s19 = inlined_call_operand.vmem [shape: f32[32,1], index: 19, kind: input, shape index: {}]   ;;  %s6285_s20 = inlined_call_operand.vmem [shape: bf16[32,160], index: 20, kind: input, shape index: {}]   ;;  %s6286_s21 = inlined_call_operand.vmem [shape: f32[32,1], index: 21, kind: input, shape index: {}]   ;;  %s6287_s22 = inlined_call_operand.vmem [shape: f32[32,1], index: 22, kind: input, shape index: {}]   ;;  %s6288_s23 = inlined_call_operand.hbm [shape: bf16[1024,128], index: 23, kind: input, shape index: {}]   ;;  %s6289_s24 = inlined_call_operand.vmem [shape: f32[1,128], index: 24, kind: input, shape index: {}]   ;;  %s6290_s25 = inlined_call_operand.hbm [shape: f32[2,1,128], index: 25, kind: output, shape index: {}]  }
   0x1   :  { %6360 = sst [smem:[#allocation15_spill]] %s6265_s0 }
   0x2   :  { %6361 = sst [smem:[#allocation16_spill]] %s6266_s1 }
   0x3   :  { %6362 = sst [smem:[#allocation17_spill]] %s6267_s2 }
   0x4   :  { %6363 = sst [smem:[#allocation18_spill]] %s6268_s3 }
   0x5   :  { %6364 = sst [smem:[#allocation19_spill]] %s6269_s4 }
   0x6   :  { %6365 = sst [smem:[#allocation20_spill]] %s6270_s5 }
   0x7   :  { %6366 = sst [smem:[#allocation21_spill]] %s6271_s6 }
   0x8   :  { %6367 = sst [smem:[#allocation22_spill]] %s6272_s7 }
   0x9   :  { %6368 = sst [smem:[#allocation23_spill]] %s6273_s8 }
   0xa   :  { %6369 = sst [smem:[#allocation24_spill]] %s6274_s9 }
   0xb   :  { %6370 = sst [smem:[#allocation25_spill]] %s6288_s23 }
   0xc   :  { %6371 = sst [smem:[#allocation26_spill]] %s6290_s25 }
   0xd   :  { %30 = vsyncpa [#allocation3], 0 }
   0xe   :  { %31 = vsyncpa [#allocation4], 0 }
   0xf   :  { %33 = vsyncpa [#allocation4 + $0x1], 0  ;;  %s4860_s29 = smov 0   ;;  %s4862_s2 = smov 0  }
  0x10   :  { %s4864_s6 = smov 0   ;;  %s4866_s30 = smov 0  }
  0x11 LB: > { %6372 = sst [smem:[#allocation8_spill]] %s4700_s29  ;;  %s4881_s7 = sadd.s32 4294967295, %s4712_s30   ;;  %s4712_s30 = sphi %s4866_s30, %s6480_s30   ;;  %s4708_s6 = sphi %s4864_s6, %s6482_s6   ;;  %s4704_s2 = sphi %s4862_s2, %s6484_s2   ;;  %s4700_s29 = sphi %s4860_s29, %s6483_s29  }
  0x12   : > { %6373 = sst [smem:[#allocation9_spill]] %s4708_s6  ;;  %s3699_s3 = sadd.s32 4294967294, %s4712_s30  }
  0x13   : > { %6374 = sst [smem:[#allocation10_spill]] %s4712_s30  ;;  %s4885_s26 = sadd.s32 1, %s4712_s30  }
  0x14   : > { %6375 = sst [smem:[#allocation11_spill]] %s4885_s26  ;;  %s576_s1 = sadd.s32 1, %s4708_s6 }
  0x15   : > { %s573_s8 = ssub.s32 %s4712_s30, %s4885_s26  ;;  %p586_p0 = scmp.ne.s32.totalorder %s4708_s6, %s4704_s2 }
  0x16   : > { %p574_p1 = scmp.eq.s32.totalorder %s573_s8, 0  ;;  %p587_p2 = scmp.eq.s32.totalorder %s4881_s7, 1 }
  0x17   : > { %p592_p3 = scmp.ne.s32.totalorder %s4704_s2, %s4700_s29  ;;  %p593_p4 = scmp.eq.s32.totalorder %s3699_s3, 1 }
  0x18   : > { %s4896_s27 = scalar_select %p574_p1, %s4708_s6, %s576_s1  }
  0x19   : > { %p4898_p5 = por %p587_p2, %p586_p0  ;;  %p4902_p6 = por %p593_p4, %p592_p3 }
  0x1a   : > { %6376 = sst [smem:[#allocation12_spill]] %s4896_s27  ;;  %p3700_p7 = scmp.ge.s32.totalorder %s4712_s30, 1 }
  0x1b   : > { %s6377_s4 = scalar_select %p4898_p5, 1, 0 }
  0x1c   : > { %s6379_s28 = scalar_select %p4902_p6, 1, 0 }
  0x1d   : > { %6378 = sst [smem:[#allocation13_spill]] %s6377_s4  ;;  %p600_p8 = scmp.lt.s32.totalorder %s4712_s30, 3 }
  0x1e   : > { %6380 = sst [smem:[#allocation14_spill]] %s6379_s28  ;;  %p4421_p9 = scmp.eq.s32.totalorder %s4881_s7, 0 }
  0x1f   : > { %p4909_p10 = pnand %p3700_p7, %p600_p8  ;;  %s4714_s5 = smov [#allocation2]  }
  0x20   : > { %s678_s0 = sshll.u32 %s4714_s5, 4  ;;  %s679_s0 = int_to_ptr.vmem [resolvable:$true] %s678_s0 }
  0x21   : > { %p4413_p11 = pneg %p4909_p10  ;;  %s4633_s3 = scalar_lea.vmem %s679_s0, 8192 }
  0x22   : > { %p4634_p0 = scmp.ne.s32.totalorder %s679_s0, %s4633_s3  ;;  %p4641_p3 = scmp.lt.s32.totalorder %s679_s0, %s679_s0 }
  0x23   : > { %p4414_p12 = pnand %p4421_p9, %p4413_p11  ;;  %p4642_p4 = scmp.lt.s32.totalorder %s4633_s3, %s4633_s3 }
  0x25   : > { %p4624_p13 = pneg %p4414_p12  ;;  %p4643_p6 = por %p4642_p4, %p4641_p3 }
  0x27   : > { %p4636_p1 = pnand %p4634_p0, %p4624_p13 }
  0x29   : > { %p4637_p2 = pneg %p4636_p1 }
  0x2b   : > { %p4644_p7 = pnand %p4643_p6, %p4637_p2 }
  0x2d   : > { %4647 = shalt.err (!%p4644_p7)
}
  0x2e   : > { %s4715_s1 = smov 64   ;;  %s4716_s8 = smov 4  }
  0x2f   : > { %s6382_s23 = sld [smem:[#allocation25_spill]] }
  0x31   : > { %705 = sbr.rel (%p4909_p10) target bundleno = 4062 (0xfde), region = 120 }
  0x35   : > { %4416 = dma.hbm_to_vmem [thread:$0]  (!%p4414_p12), %s6382_s23, 8192, %s679_s0, [#allocation3], %s4715_s1, %s4715_s1, %s4716_s8  }
  0x36   : > { %v782_v0 = vlaneseq }
  0x37   : > { %4691 = dma.done.wait (%p4421_p9), [#allocation3], 8192  }
  0x38   : > { %4693 = vsyncadd (%p4421_p9), [#allocation3], 4294959104  ;;  %v4926_v1 = vshrl.u32 %v782_v0, 7  ;;  %v816_v2 = vand.u32 127, %v782_v0  ;;  %v6383_v14 = vmov 0  ;;  %v6385_v17 = vmov 0 }
  0x39   : > { %v4717_v18 = vmov 1.0|1.0   ;;  %v6387_v21 = vmov 0  ;;  %v6389_v22 = vmov 0  ;;  %v6391_v25 = vmov 0  ;;  %p772_p6 = scmp.lt.s32.totalorder %s4881_s7, 1 }
  0x3a   : > { %v4929_v3 = vadd.s32 112, %v4926_v1  ;;  %v4932_v4 = vadd.s32 120, %v4926_v1  ;;  %v817_v5 = vadd.s32 128, %v816_v2  ;;  %v4934_v6 = vmul.u32 2, %v816_v2  ;;  %s6408_s0 = sld [smem:[#allocation15_spill]]  ;;  %s6344_s1 = smov 127  }
  0x3b   : > { %v4943_v10 = vadd.s32 96, %v4926_v1  ;;  %v4946_v11 = vadd.s32 104, %v4926_v1  ;;  %v4965_v15 = vadd.s32 80, %v4926_v1  ;;  %v4968_v16 = vadd.s32 88, %v4926_v1  ;;  %s5127_s6 = scalar_select %p772_p6, %s4881_s7, 1 }
  0x3c   : > { %v819_v7 = vmul.u32 2, %v817_v5  ;;  %v4937_v8 = vadd.s32 4294967294, %v4934_v6  ;;  %v4940_v9 = vadd.s32 4294967295, %v4934_v6  ;;  %v5012_v19 = vadd.s32 64, %v4926_v1  ;;  %s6330_s8 = smov 126   ;;  %s6419_s9 = sld [smem:[#allocation17_spill]] }
  0x3d   : > { %v5015_v20 = vadd.s32 72, %v4926_v1  ;;  %v5053_v23 = vadd.s32 48, %v4926_v1  ;;  %v5056_v24 = vadd.s32 56, %v4926_v1  ;;  %v6393_v26 = vmov 0  ;;  %s4044_s27 = sshll.u32 %s5127_s6, 4  ;;  %s6420_s23 = sld [smem:[#allocation18_spill]] }
  0x3e   : > { %v4948_v12 = vadd.s32 4294967294, %v819_v7  ;;  %v4950_v13 = vadd.s32 4294967295, %v819_v7  ;;  %vm850_vm0 = vcmp.eq.s32.totalorder %v4929_v3, %v4937_v8  ;;  %vm852_vm1 = vcmp.eq.s32.totalorder %v4932_v4, %v4937_v8  ;;  %s6335_s6 = smov 2   ;;  %s6339_s5 = smov 125  }
  0x3f   : > { %vm4956_vm2 = vmpackc.low %vm852_vm1, %vm850_vm0  ;;  %vm1055_vm3 = vcmp.eq.s32.totalorder %v4929_v3, %v4940_v9  ;;  %vm1057_vm4 = vcmp.eq.s32.totalorder %v4932_v4, %v4940_v9  ;;  %vm846_vm0 = vcmp.eq.s32.totalorder %v4943_v10, %v4937_v8  ;;  %vm848_vm1 = vcmp.eq.s32.totalorder %v4946_v11, %v4937_v8  ;;  %s6423_s28 = sld [smem:[#allocation20_spill]] }
  0x40   : > { %v6384_v14 = vsel %vm4956_vm2, 4294967295, %v6383_v14  ;;  %vm851_vm5 = vcmp.eq.s32.totalorder %v4929_v3, %v4948_v12  ;;  %vm853_vm6 = vcmp.eq.s32.totalorder %v4932_v4, %v4948_v12  ;;  %vm1056_vm7 = vcmp.eq.s32.totalorder %v4929_v3, %v4950_v13  ;;  %vm4978_vm9 = vmpackc.low %vm1057_vm4, %vm1055_vm3  ;;  %s5202_s3 = scalar_lea.vmem %s6408_s0, %s4044_s27  ;;  %s6337_s27 = smov 124  }
  0x41   : > { %vm1058_vm8 = vcmp.eq.s32.totalorder %v4932_v4, %v4950_v13  ;;  %v6386_v17 = vsel %vm4978_vm9, 4294967295, %v6385_v17  ;;  %vm3707_vm10 = vmpackc.low %vm853_vm6, %vm851_vm5  ;;  %vm847_vm11 = vcmp.eq.s32.totalorder %v4943_v10, %v4948_v12  ;;  %vm849_vm12 = vcmp.eq.s32.totalorder %v4946_v11, %v4948_v12  ;;  %v779_v41 = vld [vmem:[%s5202_s3 + $0x8] sm:$0xff]  ;;  %v778_v60 = vld [vmem:[%s5202_s3] sm:$0xff]  ;;  %s6422_s0 = smov 126   ;;  %s6430_s3 = smov 125  }
  0x42   : > { %vm1052_vm13 = vcmp.eq.s32.totalorder %v4943_v10, %v4950_v13  ;;  %vm1054_vm14 = vcmp.eq.s32.totalorder %v4946_v11, %v4950_v13  ;;  %3708 = vmatprep.subr.msk.bf16.mxu0 %vm3707_vm10, %v4717_v18  ;;  %vm3771_vm15 = vmpackc.low %vm1058_vm8, %vm1056_vm7  ;;  %vm1051_vm4 = vcmp.eq.s32.totalorder %v4943_v10, %v4940_v9  ;;  %vm1053_vm5 = vcmp.eq.s32.totalorder %v4946_v11, %v4940_v9  ;;  %s6437_s29 = sld [smem:[#allocation22_spill]] }
  0x43   : > { %3772 = vmatprep.subr.msk.bf16.mxu1 %vm3771_vm15, %v4717_v18  ;;  %3710 = vmatpush1.bf16.msk.msra.mxu0 %vm4956_vm2, %v4717_v18  ;;  %vm3711_vm3 = vmpackc.low %vm849_vm12, %vm847_vm11  ;;  %vm843_vm7 = vcmp.eq.s32.totalorder %v4965_v15, %v4948_v12  ;;  %vm845_vm8 = vcmp.eq.s32.totalorder %v4968_v16, %v4948_v12  ;;  %vm1048_vm11 = vcmp.eq.s32.totalorder %v4965_v15, %v4950_v13  ;;  %v5092_v27 = vadd.s32 32, %v4926_v1 }
  0x44   : > { %3774 = vmatpush1.bf16.msk.msra.mxu1 %vm4978_vm9, %v4717_v18  ;;  %3712 = vmatprep.subr.msk.bf16.mxu0 %vm3711_vm3, %v4717_v18  ;;  %vm3775_vm6 = vmpackc.low %vm1054_vm14, %vm1052_vm13  ;;  %vm1050_vm12 = vcmp.eq.s32.totalorder %v4968_v16, %v4950_v13  ;;  %vm842_vm14 = vcmp.eq.s32.totalorder %v4965_v15, %v4937_v8  ;;  %vm844_vm15 = vcmp.eq.s32.totalorder %v4968_v16, %v4937_v8  ;;  %v5095_v28 = vadd.s32 40, %v4926_v1 }
  0x45   : > { %3776 = vmatprep.subr.msk.bf16.mxu1 %vm3775_vm6, %v4717_v18  ;;  %vm5021_vm10 = vmpackc.low %vm848_vm1, %vm846_vm0  ;;  %vm1047_vm1 = vcmp.eq.s32.totalorder %v4965_v15, %v4940_v9  ;;  %vm1049_vm3 = vcmp.eq.s32.totalorder %v4968_v16, %v4940_v9  ;;  %vm841_vm6 = vcmp.eq.s32.totalorder %v5015_v20, %v4948_v12  ;;  %v6396_v29 = vmov 0 }
  0x46   : > { %v6388_v21 = vsel %vm5021_vm10, 4294967295, %v6387_v21  ;;  %vm5029_vm13 = vmpackc.low %vm1053_vm5, %vm1051_vm4  ;;  %vm839_vm5 = vcmp.eq.s32.totalorder %v5012_v19, %v4948_v12  ;;  %v6398_v30 = vmov 0  ;;  %v5138_v31 = vadd.s32 16, %v4926_v1 }
  0x47   : > { %v6390_v22 = vsel %vm5029_vm13, 4294967295, %v6389_v22  ;;  %3714 = vmatpush1.bf16.msk.msra.mxu0 %vm5021_vm10, %v4717_v18  ;;  %vm3715_vm0 = vmpackc.low %vm845_vm8, %vm843_vm7  ;;  %vm1044_vm8 = vcmp.eq.s32.totalorder %v5012_v19, %v4950_v13  ;;  %v5141_v32 = vadd.s32 24, %v4926_v1  ;;  %v6400_v33 = vmov 0 }
  0x48   : > { %3778 = vmatpush1.bf16.msk.msra.mxu1 %vm5029_vm13, %v4717_v18  ;;  %3716 = vmatprep.subr.msk.bf16.mxu0 %vm3715_vm0, %v4717_v18  ;;  %vm3779_vm4 = vmpackc.low %vm1050_vm12, %vm1048_vm11  ;;  %vm1046_vm11 = vcmp.eq.s32.totalorder %v5015_v20, %v4950_v13  ;;  %vm835_vm0 = vcmp.eq.s32.totalorder %v5053_v23, %v4948_v12  ;;  %vm836_vm13 = vcmp.eq.s32.totalorder %v5056_v24, %v4937_v8  ;;  %v6402_v34 = vmov 0 }
  0x49   : > { %3780 = vmatprep.subr.msk.bf16.mxu1 %vm3779_vm4, %v4717_v18  ;;  %vm5059_vm7 = vmpackc.low %vm844_vm15, %vm842_vm14  ;;  %vm840_vm4 = vcmp.eq.s32.totalorder %v5015_v20, %v4937_v8  ;;  %vm1043_vm15 = vcmp.eq.s32.totalorder %v5012_v19, %v4940_v9  ;;  %vm832_vm9 = vcmp.eq.s32.totalorder %v5095_v28, %v4937_v8  ;;  %v5180_v35 = vadd.s32 8, %v4926_v1 }
  0x4a   : > { %v6392_v25 = vsel %vm5059_vm7, 4294967295, %v6391_v25  ;;  %vm5067_vm12 = vmpackc.low %vm1049_vm3, %vm1047_vm1  ;;  %vm1045_vm1 = vcmp.eq.s32.totalorder %v5015_v20, %v4940_v9  ;;  %v6404_v36 = vmov 0  ;;  %v6406_v37 = vmov 0 }
  0x4b   : > { %v6394_v26 = vsel %vm5067_vm12, 4294967295, %v6393_v26  ;;  %3718 = vmatpush1.bf16.msk.msra.mxu0 %vm5059_vm7, %v4717_v18  ;;  %vm3719_vm14 = vmpackc.low %vm841_vm6, %vm839_vm5  ;;  %vm837_vm5 = vcmp.eq.s32.totalorder %v5056_v24, %v4948_v12  ;;  %vm6395_vm6 = vcmp.eq.s32.totalorder %v5012_v19, %v4937_v8  ;;  %v813_v38 = vadd.s32 240, %v4926_v1 }
  0x4c   : > { %3782 = vmatpush1.bf16.msk.msra.mxu1 %vm5067_vm12, %v4717_v18  ;;  %3720 = vmatprep.subr.msk.bf16.mxu0 %vm3719_vm14, %v4717_v18  ;;  %vm3783_vm3 = vmpackc.low %vm1046_vm11, %vm1044_vm8  ;;  %vm1040_vm11 = vcmp.eq.s32.totalorder %v5053_v23, %v4950_v13  ;;  %vm1042_vm14 = vcmp.eq.s32.totalorder %v5056_v24, %v4950_v13  ;;  %v814_v39 = vadd.s32 248, %v4926_v1  ;;  %v6410_v40 = vmov 0 }
  0x4d   : > { %3784 = vmatprep.subr.msk.bf16.mxu1 %vm3783_vm3, %v4717_v18  ;;  %vm5101_vm8 = vmpackc.low %vm840_vm4, %vm6395_vm6  ;;  %vm834_vm3 = vcmp.eq.s32.totalorder %v5053_v23, %v4937_v8  ;;  %vm1039_vm6 = vcmp.eq.s32.totalorder %v5053_v23, %v4940_v9  ;;  %v6412_v42 = vmov 0  ;;  %v811_v43 = vadd.s32 224, %v4926_v1 }
  0x4e   : > { %v6397_v29 = vsel %vm5101_vm8, 4294967295, %v6396_v29  ;;  %vm5109_vm12 = vmpackc.low %vm1045_vm1, %vm1043_vm15  ;;  %vm1041_vm15 = vcmp.eq.s32.totalorder %v5056_v24, %v4940_v9  ;;  %vm885_vm7 = vcmp.eq.s32.totalorder %v814_v39, %v4948_v12  ;;  %v812_v44 = vadd.s32 232, %v4926_v1 }
  0x4f   : > { %v6399_v30 = vsel %vm5109_vm12, 4294967295, %v6398_v30  ;;  %3722 = vmatpush1.bf16.msk.msra.mxu0 %vm5101_vm8, %v4717_v18  ;;  %vm3723_vm4 = vmpackc.low %vm837_vm5, %vm835_vm0  ;;  %vm831_vm0 = vcmp.eq.s32.totalorder %v5092_v27, %v4948_v12  ;;  %vm833_vm5 = vcmp.eq.s32.totalorder %v5095_v28, %v4948_v12  ;;  %vm827_vm8 = vcmp.eq.s32.totalorder %v5138_v31, %v4948_v12 }
  0x50   : > { %3786 = vmatpush1.bf16.msk.msra.mxu1 %vm5109_vm12, %v4717_v18  ;;  %3724 = vmatprep.subr.msk.bf16.mxu0 %vm3723_vm4, %v4717_v18  ;;  %vm3787_vm1 = vmpackc.low %vm1042_vm14, %vm1040_vm11  ;;  %vm1036_vm11 = vcmp.eq.s32.totalorder %v5092_v27, %v4950_v13  ;;  %vm1038_vm14 = vcmp.eq.s32.totalorder %v5095_v28, %v4950_v13  ;;  %v6414_v45 = vmov 0  ;;  %v6416_v46 = vmov 0 }
  0x51   : > { %3788 = vmatprep.subr.msk.bf16.mxu1 %vm3787_vm1, %v4717_v18  ;;  %vm5147_vm4 = vmpackc.low %vm836_vm13, %vm834_vm3  ;;  %vm830_vm1 = vcmp.eq.s32.totalorder %v5092_v27, %v4937_v8  ;;  %vm1035_vm3 = vcmp.eq.s32.totalorder %v5092_v27, %v4940_v9  ;;  %v781_v47 = vpack.c.bf16 %v779_v41, %v779_v41  ;;  %v809_v48 = vadd.s32 208, %v4926_v1 }
  0x52   : > { %v6401_v33 = vsel %vm5147_vm4, 4294967295, %v6400_v33  ;;  %vm5155_vm12 = vmpackc.low %vm1041_vm15, %vm1039_vm6  ;;  %vm1037_vm6 = vcmp.eq.s32.totalorder %v5095_v28, %v4940_v9  ;;  %v810_v49 = vadd.s32 216, %v4926_v1  ;;  %vm1083_vm10 = vcmp.eq.s32.totalorder %v811_v43, %v4940_v9 }
  0x53   : > { %v6403_v34 = vsel %vm5155_vm12, 4294967295, %v6402_v34  ;;  %3726 = vmatpush1.bf16.msk.msra.mxu0 %vm5147_vm4, %v4717_v18  ;;  %vm3727_vm13 = vmpackc.low %vm833_vm5, %vm831_vm0  ;;  %vm829_vm0 = vcmp.eq.s32.totalorder %v5141_v32, %v4948_v12  ;;  %vm883_vm4 = vcmp.eq.s32.totalorder %v813_v38, %v4948_v12  ;;  %1014 = vmatprep.mubr.bf16.mxu0 %v781_v47  ;;  %v807_v50 = vadd.s32 192, %v4926_v1 }
  0x54   : > { %3790 = vmatpush1.bf16.msk.msra.mxu1 %vm5155_vm12, %v4717_v18  ;;  %3728 = vmatprep.subr.msk.bf16.mxu0 %vm3727_vm13, %v4717_v18  ;;  %vm3791_vm15 = vmpackc.low %vm1038_vm14, %vm1036_vm11  ;;  %vm1032_vm12 = vcmp.eq.s32.totalorder %v5138_v31, %v4950_v13  ;;  %vm1034_vm11 = vcmp.eq.s32.totalorder %v5141_v32, %v4950_v13  ;;  %vm823_vm13 = vcmp.eq.s32.totalorder %v4926_v1, %v4948_v12  ;;  %v808_v51 = vadd.s32 200, %v4926_v1 }
  0x55   : > { %3792 = vmatprep.subr.msk.bf16.mxu1 %vm3791_vm15, %v4717_v18  ;;  %vm5183_vm5 = vmpackc.low %vm832_vm9, %vm830_vm1  ;;  %vm828_vm15 = vcmp.eq.s32.totalorder %v5141_v32, %v4937_v8  ;;  %vm1031_vm1 = vcmp.eq.s32.totalorder %v5138_v31, %v4940_v9  ;;  %1219 = vmatprep.mubr.bf16.mxu1 %v781_v47  ;;  %v805_v52 = vadd.s32 176, %v4926_v1  ;;  %v806_v53 = vadd.s32 184, %v4926_v1 }
  0x56   : > { %v6405_v36 = vsel %vm5183_vm5, 4294967295, %v6404_v36  ;;  %vm5191_vm14 = vmpackc.low %vm1037_vm6, %vm1035_vm3  ;;  %vm1033_vm3 = vcmp.eq.s32.totalorder %v5141_v32, %v4940_v9  ;;  %vm1077_vm2 = vcmp.eq.s32.totalorder %v808_v51, %v4940_v9  ;;  %v803_v54 = vadd.s32 160, %v4926_v1 }
  0x57   : > { %v6407_v37 = vsel %vm5191_vm14, 4294967295, %v6406_v37  ;;  %3730 = vmatpush1.bf16.msk.msra.mxu0 %vm5183_vm5, %v4717_v18  ;;  %vm3731_vm9 = vmpackc.low %vm829_vm0, %vm827_vm8  ;;  %vm825_vm5 = vcmp.eq.s32.totalorder %v5180_v35, %v4948_v12  ;;  %vm6409_vm8 = vcmp.eq.s32.totalorder %v5138_v31, %v4937_v8  ;;  %v804_v55 = vadd.s32 168, %v4926_v1 }
  0x58   : > { %3794 = vmatpush1.bf16.msk.msra.mxu1 %vm5191_vm14, %v4717_v18  ;;  %3732 = vmatprep.subr.msk.bf16.mxu0 %vm3731_vm9, %v4717_v18  ;;  %vm3795_vm6 = vmpackc.low %vm1034_vm11, %vm1032_vm12  ;;  %vm1028_vm12 = vcmp.eq.s32.totalorder %v4926_v1, %v4950_v13  ;;  %vm1030_vm11 = vcmp.eq.s32.totalorder %v5180_v35, %v4950_v13  ;;  %vm1027_vm14 = vcmp.eq.s32.totalorder %v4926_v1, %v4940_v9  ;;  %v801_v56 = vadd.s32 144, %v4926_v1 }
  0x59   : > { %3796 = vmatprep.subr.msk.bf16.mxu1 %vm3795_vm6, %v4717_v18  ;;  %vm5225_vm0 = vmpackc.low %vm828_vm15, %vm6409_vm8  ;;  %vm822_vm6 = vcmp.eq.s32.totalorder %v4926_v1, %v4937_v8  ;;  %vm824_vm15 = vcmp.eq.s32.totalorder %v5180_v35, %v4937_v8  ;;  %v802_v57 = vadd.s32 152, %v4926_v1  ;;  %v799_v58 = vadd.s32 128, %v4926_v1 }
  0x5a   : > { %v6411_v40 = vsel %vm5225_vm0, 4294967295, %v6410_v40  ;;  %vm5234_vm9 = vmpackc.low %vm1033_vm3, %vm1031_vm1  ;;  %vm1029_vm1 = vcmp.eq.s32.totalorder %v5180_v35, %v4940_v9  ;;  %v800_v59 = vadd.s32 136, %v4926_v1  ;;  %v780_v61 = vpack.c.bf16 %v778_v60, %v778_v60 }
  0x5b   : > { %v6413_v42 = vsel %vm5234_vm9, 4294967295, %v6412_v42  ;;  %3734 = vmatpush1.bf16.msk.msra.mxu0 %vm5225_vm0, %v4717_v18  ;;  %vm3735_vm8 = vmpackc.low %vm825_vm5, %vm823_vm13  ;;  %vm1088_vm13 = vcmp.eq.s32.totalorder %v813_v38, %v4950_v13  ;;  %v4718_v62 = vmov 0.0   ;;  %v4722_v47 = vmov 0  }
  0x5c   : > { %3798 = vmatpush1.bf16.msk.msra.mxu1 %vm5234_vm9, %v4717_v18  ;;  %3736 = vmatprep.subr.msk.bf16.mxu0 %vm3735_vm8, %v4717_v18  ;;  %vm3799_vm3 = vmpackc.low %vm1030_vm11, %vm1028_vm12  ;;  %vm1090_vm9 = vcmp.eq.s32.totalorder %v814_v39, %v4950_v13  ;;  %vm884_vm11 = vcmp.eq.s32.totalorder %v814_v39, %v4937_v8  ;;  %vm881_vm12 = vcmp.eq.s32.totalorder %v812_v44, %v4948_v12 }
  0x5d   : > { %3800 = vmatprep.subr.msk.bf16.mxu1 %vm3799_vm3, %v4717_v18  ;;  %vm5258_vm5 = vmpackc.low %vm824_vm15, %vm822_vm6  ;;  %vm1087_vm15 = vcmp.eq.s32.totalorder %v813_v38, %v4940_v9  ;;  %vm1089_vm3 = vcmp.eq.s32.totalorder %v814_v39, %v4940_v9  ;;  %4472 = vset.pattern.permute.xlu1 %v4722_v47 }
  0x5e   : > { %v6415_v45 = vsel %vm5258_vm5, 4294967295, %v6414_v45  ;;  %vm5264_vm8 = vmpackc.low %vm1029_vm1, %vm1027_vm14  ;;  %vm879_vm1 = vcmp.eq.s32.totalorder %v811_v43, %v4948_v12  ;;  %4471 = vset.pattern.permute.xlu0 %v4722_v47 }
  0x5f   : > { %v6417_v46 = vsel %vm5264_vm8, 4294967295, %v6416_v46  ;;  %3738 = vmatpush1.bf16.msk.msra.mxu0 %vm5258_vm5, %v4717_v18  ;;  %vm3739_vm6 = vmpackc.low %vm885_vm7, %vm883_vm4  ;;  %vm6418_vm7 = vcmp.eq.s32.totalorder %v813_v38, %v4937_v8  ;;  %vm1084_vm5 = vcmp.eq.s32.totalorder %v811_v43, %v4950_v13 }
  0x60   : > { %3802 = vmatpush1.bf16.msk.msra.mxu1 %vm5264_vm8, %v4717_v18  ;;  %3740 = vmatprep.subr.msk.bf16.mxu0 %vm3739_vm6, %v4717_v18  ;;  %vm3803_vm14 = vmpackc.low %vm1090_vm9, %vm1088_vm13  ;;  %vm1086_vm8 = vcmp.eq.s32.totalorder %v812_v44, %v4950_v13  ;;  %vm878_vm9 = vcmp.eq.s32.totalorder %v811_v43, %v4937_v8  ;;  %vm880_vm13 = vcmp.eq.s32.totalorder %v812_v44, %v4937_v8 }
  0x61   : > { %3804 = vmatprep.subr.msk.bf16.mxu1 %vm3803_vm14, %v4717_v18  ;;  %vm3741_vm4 = vmpackc.low %vm884_vm11, %vm6418_vm7  ;;  %vm1085_vm14 = vcmp.eq.s32.totalorder %v812_v44, %v4940_v9  ;;  %vm875_vm7 = vcmp.eq.s32.totalorder %v809_v48, %v4948_v12 }
  0x62   : > { %vm3805_vm0 = vmpackc.low %vm1089_vm3, %vm1087_vm15  ;;  %vm877_vm15 = vcmp.eq.s32.totalorder %v810_v49, %v4948_v12  ;;  %vm1080_vm3 = vcmp.eq.s32.totalorder %v809_v48, %v4950_v13 }
  0x63   : > { %3742 = vmatpush2.bf16.msk.msra.mxu0 %vm3741_vm4, %v4717_v18  ;;  %vm3743_vm6 = vmpackc.low %vm881_vm12, %vm879_vm1 }
  0x64   : > { %3806 = vmatpush2.bf16.msk.msra.mxu1 %vm3805_vm0, %v4717_v18  ;;  %3744 = vmatprep.subr.msk.bf16.mxu0 %vm3743_vm6, %v4717_v18  ;;  %vm3807_vm11 = vmpackc.low %vm1086_vm8, %vm1084_vm5  ;;  %vm1082_vm0 = vcmp.eq.s32.totalorder %v810_v49, %v4950_v13  ;;  %vm874_vm5 = vcmp.eq.s32.totalorder %v809_v48, %v4937_v8  ;;  %vm876_vm8 = vcmp.eq.s32.totalorder %v810_v49, %v4937_v8 }
  0x65   : > { %3808 = vmatprep.subr.msk.bf16.mxu1 %vm3807_vm11, %v4717_v18  ;;  %vm3745_vm12 = vmpackc.low %vm880_vm13, %vm878_vm9  ;;  %vm1079_vm6 = vcmp.eq.s32.totalorder %v809_v48, %v4940_v9  ;;  %vm1081_vm11 = vcmp.eq.s32.totalorder %v810_v49, %v4940_v9  ;;  %vm871_vm13 = vcmp.eq.s32.totalorder %v807_v50, %v4948_v12  ;;  %v1318_v49 = vld [vmem:[%s6419_s9 + $0x8] sm:$0xff] }
  0x66   : > { %vm3809_vm1 = vmpackc.low %vm1085_vm14, %vm1083_vm10  ;;  %vm873_vm10 = vcmp.eq.s32.totalorder %v808_v51, %v4948_v12 }
  0x67   : > { %3746 = vmatpush2.bf16.msk.msra.mxu0 %vm3745_vm12, %v4717_v18  ;;  %vm3747_vm4 = vmpackc.low %vm877_vm15, %vm875_vm7  ;;  %vm1076_vm7 = vcmp.eq.s32.totalorder %v807_v50, %v4950_v13  ;;  %vm1078_vm15 = vcmp.eq.s32.totalorder %v808_v51, %v4950_v13 }
  0x68   : > { %3810 = vmatpush2.bf16.msk.msra.mxu1 %vm3809_vm1, %v4717_v18  ;;  %3748 = vmatprep.subr.msk.bf16.mxu0 %vm3747_vm4, %v4717_v18  ;;  %vm3811_vm9 = vmpackc.low %vm1082_vm0, %vm1080_vm3  ;;  %vm870_vm1 = vcmp.eq.s32.totalorder %v807_v50, %v4937_v8  ;;  %vm872_vm3 = vcmp.eq.s32.totalorder %v808_v51, %v4937_v8  ;;  %vm1075_vm4 = vcmp.eq.s32.totalorder %v807_v50, %v4940_v9  ;;  %v1317_v50 = vld [vmem:[%s6419_s9] sm:$0xff]  ;;  %s6424_s9 = sld [smem:[#allocation21_spill]] }
  0x69   : > { %3812 = vmatprep.subr.msk.bf16.mxu1 %vm3811_vm9, %v4717_v18  ;;  %vm3749_vm14 = vmpackc.low %vm876_vm8, %vm874_vm5  ;;  %vm867_vm8 = vcmp.eq.s32.totalorder %v805_v52, %v4948_v12  ;;  %vm1072_vm9 = vcmp.eq.s32.totalorder %v805_v52, %v4950_v13  ;;  %v1331_v51 = vld [vmem:[%s6420_s23] sm:$0xff] }
  0x6a   : > { %vm3813_vm12 = vmpackc.low %vm1081_vm11, %vm1079_vm6  ;;  %vm869_vm6 = vcmp.eq.s32.totalorder %v806_v53, %v4948_v12 }
  0x6b   : > { %3750 = vmatpush2.bf16.msk.msra.mxu0 %vm3749_vm14, %v4717_v18  ;;  %vm3751_vm0 = vmpackc.low %vm873_vm10, %vm871_vm13  ;;  %vm1074_vm13 = vcmp.eq.s32.totalorder %v806_v53, %v4950_v13  ;;  %vm866_vm14 = vcmp.eq.s32.totalorder %v805_v52, %v4937_v8 }
  0x6c   : > { %3814 = vmatpush2.bf16.msk.msra.mxu1 %vm3813_vm12, %v4717_v18  ;;  %3752 = vmatprep.subr.msk.bf16.mxu0 %vm3751_vm0, %v4717_v18  ;;  %vm3815_vm5 = vmpackc.low %vm1078_vm15, %vm1076_vm7  ;;  %vm868_vm7 = vcmp.eq.s32.totalorder %v806_v53, %v4937_v8  ;;  %vm1071_vm12 = vcmp.eq.s32.totalorder %v805_v52, %v4940_v9  ;;  %vm1073_vm0 = vcmp.eq.s32.totalorder %v806_v53, %v4940_v9  ;;  %v1332_v52 = vld [vmem:[%s6420_s23 + $0x8] sm:$0xff]  ;;  %s6431_s23 = sld [smem:[#allocation23_spill]] }
  0x6d   : > { %3816 = vmatprep.subr.msk.bf16.mxu1 %vm3815_vm5, %v4717_v18  ;;  %vm3753_vm11 = vmpackc.low %vm872_vm3, %vm870_vm1  ;;  %vm863_vm3 = vcmp.eq.s32.totalorder %v803_v54, %v4948_v12  ;;  %vm1068_vm5 = vcmp.eq.s32.totalorder %v803_v54, %v4950_v13 }
  0x6e   : > { %vm3817_vm10 = vmpackc.low %vm1077_vm2, %vm1075_vm4  ;;  %vm865_vm2 = vcmp.eq.s32.totalorder %v804_v55, %v4948_v12 }
  0x6f   : > { %3754 = vmatpush2.bf16.msk.msra.mxu0 %vm3753_vm11, %v4717_v18  ;;  %vm3755_vm15 = vmpackc.low %vm869_vm6, %vm867_vm8  ;;  %vm1070_vm8 = vcmp.eq.s32.totalorder %v804_v55, %v4950_v13  ;;  %vm862_vm11 = vcmp.eq.s32.totalorder %v803_v54, %v4937_v8 }
  0x70   : > { %3818 = vmatpush2.bf16.msk.msra.mxu1 %vm3817_vm10, %v4717_v18  ;;  %3756 = vmatprep.subr.msk.bf16.mxu0 %vm3755_vm15, %v4717_v18  ;;  %vm3819_vm1 = vmpackc.low %vm1074_vm13, %vm1072_vm9  ;;  %vm864_vm9 = vcmp.eq.s32.totalorder %v804_v55, %v4937_v8  ;;  %vm1067_vm10 = vcmp.eq.s32.totalorder %v803_v54, %v4940_v9  ;;  %vm1069_vm15 = vcmp.eq.s32.totalorder %v804_v55, %v4940_v9 }
  0x71   : > { %3820 = vmatprep.subr.msk.bf16.mxu1 %vm3819_vm1, %v4717_v18  ;;  %vm3757_vm4 = vmpackc.low %vm868_vm7, %vm866_vm14  ;;  %vm859_vm7 = vcmp.eq.s32.totalorder %v801_v56, %v4948_v12  ;;  %vm1064_vm1 = vcmp.eq.s32.totalorder %v801_v56, %v4950_v13 }
  0x72   : > { %vm3821_vm6 = vmpackc.low %vm1073_vm0, %vm1071_vm12  ;;  %vm861_vm12 = vcmp.eq.s32.totalorder %v802_v57, %v4948_v12 }
  0x73   : > { %3758 = vmatpush2.bf16.msk.msra.mxu0 %vm3757_vm4, %v4717_v18  ;;  %vm3759_vm13 = vmpackc.low %vm865_vm2, %vm863_vm3  ;;  %vm1066_vm3 = vcmp.eq.s32.totalorder %v802_v57, %v4950_v13  ;;  %vm858_vm4 = vcmp.eq.s32.totalorder %v801_v56, %v4937_v8 }
  0x74   : > { %3822 = vmatpush2.bf16.msk.msra.mxu1 %vm3821_vm6, %v4717_v18  ;;  %3760 = vmatprep.subr.msk.bf16.mxu0 %vm3759_vm13, %v4717_v18  ;;  %vm3823_vm14 = vmpackc.low %vm1070_vm8, %vm1068_vm5  ;;  %vm860_vm5 = vcmp.eq.s32.totalorder %v802_v57, %v4937_v8  ;;  %vm1063_vm6 = vcmp.eq.s32.totalorder %v801_v56, %v4940_v9  ;;  %vm1065_vm13 = vcmp.eq.s32.totalorder %v802_v57, %v4940_v9 }
  0x75   : > { %3824 = vmatprep.subr.msk.bf16.mxu1 %vm3823_vm14, %v4717_v18  ;;  %vm3761_vm0 = vmpackc.low %vm864_vm9, %vm862_vm11  ;;  %vm855_vm9 = vcmp.eq.s32.totalorder %v799_v58, %v4948_v12  ;;  %vm1060_vm14 = vcmp.eq.s32.totalorder %v799_v58, %v4950_v13 }
  0x76   : > { %vm3825_vm2 = vmpackc.low %vm1069_vm15, %vm1067_vm10  ;;  %vm857_vm10 = vcmp.eq.s32.totalorder %v800_v59, %v4948_v12 }
  0x77   : > { %3762 = vmatpush2.bf16.msk.msra.mxu0 %vm3761_vm0, %v4717_v18  ;;  %vm3763_vm8 = vmpackc.low %vm861_vm12, %vm859_vm7  ;;  %vm1062_vm7 = vcmp.eq.s32.totalorder %v800_v59, %v4950_v13  ;;  %vm854_vm0 = vcmp.eq.s32.totalorder %v799_v58, %v4937_v8 }
  0x78   : > { %3826 = vmatpush2.bf16.msk.msra.mxu1 %vm3825_vm2, %v4717_v18  ;;  %3764 = vmatprep.subr.msk.bf16.mxu0 %vm3763_vm8, %v4717_v18  ;;  %vm3827_vm11 = vmpackc.low %vm1066_vm3, %vm1064_vm1  ;;  %vm856_vm2 = vcmp.eq.s32.totalorder %v800_v59, %v4937_v8  ;;  %vm1059_vm3 = vcmp.eq.s32.totalorder %v799_v58, %v4940_v9  ;;  %vm1061_vm8 = vcmp.eq.s32.totalorder %v800_v59, %v4940_v9 }
  0x79   : > { %3828 = vmatprep.subr.msk.bf16.mxu1 %vm3827_vm11, %v4717_v18  ;;  %vm3765_vm15 = vmpackc.low %vm860_vm5, %vm858_vm4  ;;  %vm4721_vm11 = vmmov 0  }
  0x7a   : > { %vm3829_vm12 = vmpackc.low %vm1065_vm13, %vm1063_vm6  ;;  %vm1253_vm13 = vcmask 1043456  }
  0x7b   : > { %3766 = vmatpush2.bf16.msk.msra.mxu0 %vm3765_vm15, %v4717_v18  ;;  %vm3767_vm1 = vmpackc.low %vm857_vm10, %vm855_vm9  ;;  %vm6347_vm9 = vcmask 1031168   ;;  %vm6346_vm10 = vcmask 1039360   ;;  %vm1269_vm15 = vcmask 326656  }
  0x7c   : > { %3830 = vmatpush2.bf16.msk.msra.mxu1 %vm3829_vm12, %v4717_v18  ;;  %3768 = vmatprep.subr.msk.bf16.mxu0 %vm3767_vm1, %v4717_v18  ;;  %vm3831_vm4 = vmpackc.low %vm1062_vm7, %vm1060_vm14  ;;  %vm6357_vm14 = vcmask 15360   ;;  %vm1380_vm7 = vcmask 1014784   ;;  %vm6348_vm12 = vcmask 1022976   ;;  %vm1595_vm1 = vcmp.eq.s32.totalorder %v4929_v3, %v4934_v6 }
  0x7d   : > { %3832 = vmatprep.subr.msk.bf16.mxu1 %vm3831_vm4, %v4717_v18  ;;  %vm3769_vm5 = vmpackc.low %vm856_vm2, %vm854_vm0  ;;  %vm6358_vm2 = vcmask 654336  }
  0x7e   : > { %vm3833_vm6 = vmpackc.low %vm1061_vm8, %vm1059_vm3  ;;  %vm1596_vm3 = vcmp.eq.s32.totalorder %v4932_v4, %v4934_v6  ;;  %vm1593_vm8 = vcmp.eq.s32.totalorder %v4943_v10, %v4934_v6 }
  0x7f   : > { %3770 = vmatpush2.bf16.msk.msra.mxu0 %vm3769_vm5, %v4717_v18  ;;  %vm5461_vm0 = vmneg %vm6357_vm14  ;;  %vm1594_vm5 = vcmp.eq.s32.totalorder %v4946_v11, %v4934_v6 }
  0x80   : > { %3834 = vmatpush2.bf16.msk.msra.mxu1 %vm3833_vm6, %v4717_v18  ;;  %4221 = vmatprep.subr.bf16.mxu0 %v4718_v62  ;;  %vm3845_vm4 = vmpackc.low %vm1596_vm3, %vm1595_vm1  ;;  %vm1589_vm3 = vcmp.eq.s32.totalorder %v5012_v19, %v4934_v6 }
  0x81   : > { %4231 = vmatprep.subr.bf16.mxu1 %v4718_v62  ;;  %vm3847_vm6 = vmpackc.low %vm1594_vm5, %vm1593_vm8  ;;  %vm1587_vm5 = vcmp.eq.s32.totalorder %v5053_v23, %v4934_v6 }
  0x82   : > { %1015 = vmatmul.mubr.bf16.vlgmr.msra.gmra.mxu0 %v780_v61 }
  0x83   : > { %1220 = vmatmul.mubr.bf16.vlgmr.msra.gmra.mxu1 %v780_v61  ;;  %4227 = vmatprep.mubr.msk.bf16.mxu0 %vm4721_vm11, %v4718_v62 }
  0x84   : > { %4241 = vmatprep.mubr.msk.bf16.mxu1 %vm4721_vm11, %v4718_v62 }
 0x142   : > { %v1016_v63 = vpop.f32.mrf.mxu0 }
 0x143   : > { %v1023_v0 = vpack.c.bf16 %v1016_v63, %v1016_v63  ;;  %v1221_v2 = vpop.f32.mrf.mxu1 }
 0x144   : > { %v1228_v5 = vpack.c.bf16 %v1221_v2, %v1221_v2  ;;  %v1018_v7 = vpop.f32.mrf.mxu0 }
 0x145   : > { %v1223_v8 = vpop.f32.mrf.mxu1  ;;  %1234 = vrot.lane.b32.xlu1 %v1023_v0, %s6344_s1  ;;  %1247 = vrot.lane.b32.xlu0 %v1023_v0, %s6330_s8  ;;  %v1024_v13 = vpack.c.bf16 %v1018_v7, %v1018_v7 }
 0x146   : > { %v1231_v9 = vrot.slane %v1228_v5, 4  ;;  %v1020_v12 = vpop.f32.mrf.mxu0  ;;  %v1229_v38 = vpack.c.bf16 %v1223_v8, %v1223_v8 }
 0x147   : > { %v1225_v39 = vpop.f32.mrf.mxu1 }
 0x148   : > { %v1021_v41 = vpop.f32.mrf.mxu0  ;;  %v1256_v43 = vsel %vm1253_vm13, %v1023_v0, %v1231_v9  ;;  %v1241_v48 = vrot.slane %v1229_v38, 4 }
 0x149   : > { %v1226_v44 = vpop.f32.mrf.mxu1  ;;  %1236 = vrot.lane.b32.xlu1 %v1024_v13, %s6344_s1  ;;  %1249 = vrot.lane.b32.xlu0 %v1024_v13, %s6330_s8  ;;  %s6421_s8 = sld [smem:[#allocation16_spill]] }
 0x14d   : > { %1244 = vrot.lane.b32.xlu1 %v1241_v48, %s6344_s1  ;;  %1242 = vrot.lane.b32.xlu0 %v1231_v9, %s6344_s1 }
 0x14f   : > { %v4533_v2 = vld [vmem:[%s6421_s8] sm:$0xff]   ;;  %s6450_s8 = smov 127  }
 0x151   : > { %1326 = vperm.xlu1 %4472, %v1318_v49   ;;  %1321 = vperm.xlu0 %4471, %v1317_v50  }
 0x155   : > { %1335 = vperm.xlu1 %4472, %v1331_v51   ;;  %1340 = vperm.xlu0 %4471, %v1332_v52  }
 0x1b7   : > { %v1235_v53 = vpop.permute.xlu1 %1234  ;;  %v1248_v54 = vpop.permute.xlu0 %1247 }
 0x1bb   : > { %v1237_v55 = vpop.permute.xlu1 %1236  ;;  %v1250_v56 = vpop.permute.xlu0 %1249 }
 0x1bc   : > { %v1252_v57 = vsel %vm6347_vm9, %v1248_v54, %v1250_v56  ;;  %v1239_v61 = vsel %vm6346_vm10, %v1235_v53, %v1237_v55  ;;  %v1436_v53 = vld [vmem:[%s6423_s28 + $0x8] sm:$0xff]  ;;  %v1435_v54 = vld [vmem:[%s6423_s28] sm:$0xff] }
 0x1bd   : > { %v1274_v58 = vsel %vm1253_vm13, %v1252_v57, 0  ;;  %v1450_v55 = vld [vmem:[%s6424_s9 + $0x8] sm:$0xff]  ;;  %v1449_v56 = vld [vmem:[%s6424_s9] sm:$0xff] }
 0x1be   : > { %4222 = vmatpush3.bf16.msra.mxu0 %v1274_v58 }
 0x1bf   : > { %v1245_v59 = vpop.permute.xlu1 %1244  ;;  %v1243_v60 = vpop.permute.xlu0 %1242  ;;  %4223 = vmatprep.subr.bf16.mxu0 %v4718_v62 }
 0x1c0   : > { %v1246_v63 = vsel %vm6346_vm10, %v1243_v60, %v1245_v59 }
 0x1c1   : > { %v1260_v0 = vsel %vm1253_vm13, %v1239_v61, %v1246_v63  ;;  %vm1591_vm13 = vcmp.eq.s32.totalorder %v4965_v15, %v4934_v6 }
 0x1c2   : > { %4224 = vmatpush3.bf16.msra.mxu0 %v1260_v0 }
 0x1c3   : > { %4225 = vmatprep.subr.bf16.mxu0 %v4718_v62 }
 0x1c6   : > { %4226 = vmatpush3.bf16.msra.mxu0 %v1256_v43 }
 0x1c7   : > { %4245 = vmatprep.subr.bf16.mxu0 %v4718_v62 }
 0x1c9   : > { %4228 = vmatmul.mubr.msk.bf16.vlgmr.msra.gmra.mxu0 %vm1269_vm15, %v4533_v2  ;;  %vm1592_vm15 = vcmp.eq.s32.totalorder %v4968_v16, %v4934_v6 }
 0x1ca   : > { %4255 = vmatprep.mubr.msk.bf16.mxu0 %vm4721_vm11, %v4718_v62  ;;  %vm3849_vm1 = vmpackc.low %vm1592_vm15, %vm1591_vm13  ;;  %vm1585_vm15 = vcmp.eq.s32.totalorder %v5092_v27, %v4934_v6 }
 0x1cc   : > { %v1327_v5 = vpop.permute.xlu1 %1326  ;;  %v1322_v7 = vpop.permute.xlu0 %1321 }
 0x1d0   : > { %v1336_v13 = vpop.permute.xlu1 %1335  ;;  %v1341_v41 = vpop.permute.xlu0 %1340 }
 0x289   : > { %v1310_v8 = vpop.f32.mrf.mxu0 }
 0x28a   : > { %v1329_v12 = vmul.f32 %v1322_v7, %v1310_v8 }
 0x28b   : > { %v4229_v9 = vpop.f32.mrf.mxu0 }
 0x28c   : > { %v5423_v48 = vadd.f32 %v1336_v13, %v1329_v12 }
 0x28d   : > { %v1313_v38 = vpop.f32.mrf.mxu0 }
 0x28e   : > { %v1330_v39 = vmul.f32 %v1327_v5, %v1313_v38 }
 0x28f   : > { %v4230_v44 = vpop.f32.mrf.mxu0 }
 0x290   : > { %v5425_v43 = vadd.f32 %v1341_v41, %v1330_v39 }
 0x292   : > { %v1345_v49 = vpack.c.bf16 %v5425_v43, %v5423_v48 }
 0x294   : > { %1347 = vrot.lane.b32.xlu1 %v1345_v49, %s6335_s6  ;;  %s6427_s6 = sld [smem:[#allocation19_spill]] }
 0x29a   : > { %v4534_v13 = vld [vmem:[%s6427_s6] sm:$0xff]   ;;  %s770_s6 = sand.u32 1, %s4704_s2  }
 0x29b   : > { %s3620_s4 = scalar_lea.sflag [#allocation4], %s770_s6 }
 0x306   : > { %v1348_v50 = vpop.permute.xlu1 %1347 }
 0x307   : > { %v1354_v51 = vsel %vm6357_vm14, %v1348_v50, 0  ;;  %v1352_v52 = vsel %vm6357_vm14, 0, %v1348_v50 }
 0x308   : > { %1378 = vrot.lane.b32.xlu1 %v1354_v51, %s6337_s27  ;;  %1376 = vrot.lane.b32.xlu0 %v1352_v52, %s6337_s27  ;;  %s6428_s27 = smov 2  }
 0x30c   : > { %1371 = vrot.lane.b32.xlu1 %v1354_v51, %s6339_s5  ;;  %1369 = vrot.lane.b32.xlu0 %v1352_v52, %s6339_s5  ;;  %s6429_s5 = smov 124  }
 0x310   : > { %1365 = vrot.lane.b32.xlu1 %v1354_v51, %s6422_s0  ;;  %1363 = vrot.lane.b32.xlu0 %v1352_v52, %s6422_s0 }
 0x314   : > { %1359 = vrot.lane.b32.xlu1 %v1354_v51, %s6344_s1  ;;  %1357 = vrot.lane.b32.xlu0 %v1352_v52, %s6344_s1 }
 0x318   : > { %1444 = vperm.xlu1 %4472, %v1436_v53   ;;  %1439 = vperm.xlu0 %4471, %v1435_v54  }
 0x31c   : > { %1458 = vperm.xlu1 %4472, %v1450_v55   ;;  %1453 = vperm.xlu0 %4471, %v1449_v56  }
 0x37a   : > { %v1379_v57 = vpop.permute.xlu1 %1378  ;;  %v1377_v58 = vpop.permute.xlu0 %1376 }
 0x37b   : > { %v1381_v59 = vsel %vm1380_vm7, %v1377_v58, %v1379_v57 }
 0x37c   : > { %4232 = vmatpush3.bf16.msra.mxu1 %v1381_v59 }
 0x37d   : > { %4233 = vmatprep.subr.bf16.mxu1 %v4718_v62 }
 0x37e   : > { %v1372_v60 = vpop.permute.xlu1 %1371  ;;  %v1370_v61 = vpop.permute.xlu0 %1369 }
 0x37f   : > { %v1374_v63 = vsel %vm6348_vm12, %v1370_v61, %v1372_v60 }
 0x380   : > { %4234 = vmatpush3.bf16.msra.mxu1 %v1374_v63 }
 0x381   : > { %4235 = vmatprep.subr.bf16.mxu1 %v4718_v62 }
 0x382   : > { %v1366_v0 = vpop.permute.xlu1 %1365  ;;  %v1364_v2 = vpop.permute.xlu0 %1363 }
 0x383   : > { %v1367_v5 = vsel %vm6347_vm9, %v1364_v2, %v1366_v0  ;;  %v1551_v0 = vld [vmem:[%s6431_s23 + $0x8] sm:$0xff]  ;;  %v1550_v2 = vld [vmem:[%s6431_s23] sm:$0xff] }
 0x384   : > { %4236 = vmatpush3.bf16.msra.mxu1 %v1367_v5 }
 0x385   : > { %4237 = vmatprep.subr.bf16.mxu1 %v4718_v62 }
 0x386   : > { %v1360_v7 = vpop.permute.xlu1 %1359  ;;  %v1358_v8 = vpop.permute.xlu0 %1357 }
 0x387   : > { %v1361_v9 = vsel %vm6346_vm10, %v1358_v8, %v1360_v7 }
 0x388   : > { %4238 = vmatpush3.bf16.msra.mxu1 %v1361_v9 }
 0x389   : > { %4239 = vmatprep.subr.bf16.mxu1 %v4718_v62 }
 0x38c   : > { %4240 = vmatpush3.bf16.msk.msra.mxu1 %vm5461_vm0, %v1348_v50 }
 0x38d   : > { %4259 = vmatprep.subr.bf16.mxu1 %v4718_v62 }
 0x38f   : > { %4242 = vmatmul.mubr.msk.bf16.vlgmr.msra.gmra.mxu1 %vm6358_vm2, %v4534_v13 }
 0x390   : > { %4275 = vmatprep.mubr.msk.bf16.mxu1 %vm4721_vm11, %v4718_v62  ;;  %4260 = vmatpush3.bf16.msk.msra.mxu1 %vm3845_vm4, %v4717_v18  ;;  %vm1590_vm4 = vcmp.eq.s32.totalorder %v5015_v20, %v4934_v6 }
 0x391   : > { %4261 = vmatprep.subr.bf16.mxu1 %v4718_v62  ;;  %vm3851_vm8 = vmpackc.low %vm1590_vm4, %vm1589_vm3 }
 0x393   : > { %v1440_v38 = vpop.permute.xlu0 %1439  ;;  %v1445_v39 = vpop.permute.xlu1 %1444 }
 0x394   : > { %4262 = vmatpush3.bf16.msk.msra.mxu1 %vm3847_vm6, %v4717_v18  ;;  %vm1588_vm6 = vcmp.eq.s32.totalorder %v5056_v24, %v4934_v6 }
 0x395   : > { %4263 = vmatprep.subr.bf16.mxu1 %v4718_v62  ;;  %vm5529_vm13 = vmpackc.low %vm1588_vm6, %vm1587_vm5 }
 0x397   : > { %v1454_v51 = vpop.permute.xlu0 %1453  ;;  %v1459_v55 = vpop.permute.xlu1 %1458 }
 0x398   : > { %4264 = vmatpush3.bf16.msk.msra.mxu1 %vm3849_vm1, %v4717_v18  ;;  %vm1586_vm1 = vcmp.eq.s32.totalorder %v5095_v28, %v4934_v6 }
 0x399   : > { %4265 = vmatprep.subr.bf16.mxu1 %v4718_v62  ;;  %vm5541_vm3 = vmpackc.low %vm1586_vm1, %vm1585_vm15 }
 0x39c   : > { %4266 = vmatpush3.bf16.msk.msra.mxu1 %vm3851_vm8, %v4717_v18 }
 0x39d   : > { %4267 = vmatprep.subr.bf16.mxu1 %v4718_v62 }
 0x3a0   : > { %4268 = vmatpush3.bf16.msk.msra.mxu1 %vm5529_vm13, %v4717_v18 }
 0x3a1   : > { %4269 = vmatprep.subr.bf16.mxu1 %v4718_v62 }
 0x3a4   : > { %4270 = vmatpush3.bf16.msk.msra.mxu1 %vm5541_vm3, %v4717_v18 }
 0x3a5   : > { %4271 = vmatprep.subr.bf16.mxu1 %v4718_v62 }
 0x44f   : > { %v1428_v41 = vpop.f32.mrf.mxu1 }
 0x450   : > { %v1447_v44 = vmul.f32 %v1440_v38, %v1428_v41 }
 0x451   : > { %v4243_v49 = vpop.f32.mrf.mxu1 }
 0x452   : > { %v1461_v53 = vadd.f32 %v1454_v51, %v1447_v44 }
 0x453   : > { %v1431_v52 = vpop.f32.mrf.mxu1 }
 0x454   : > { %v1448_v54 = vmul.f32 %v1445_v39, %v1431_v52  ;;  %v1463_v57 = vmax.f32 %v1461_v53, 0.0 }
 0x455   : > { %v4244_v56 = vpop.f32.mrf.mxu1 }
 0x456   : > { %v1462_v50 = vadd.f32 %v1459_v55, %v1448_v54  ;;  %v1662_v56 = vadd.s32 1, %v4934_v6 }
 0x458   : > { %v1464_v58 = vmax.f32 %v1462_v50, 0.0  ;;  %vm1677_vm4 = vcmp.eq.s32.totalorder %v4929_v3, %v1662_v56  ;;  %vm1678_vm8 = vcmp.eq.s32.totalorder %v4932_v4, %v1662_v56  ;;  %vm1675_vm6 = vcmp.eq.s32.totalorder %v4943_v10, %v1662_v56 }
 0x459   : > { %vm3861_vm5 = vmpackc.low %vm1678_vm8, %vm1677_vm4  ;;  %vm1676_vm15 = vcmp.eq.s32.totalorder %v4946_v11, %v1662_v56  ;;  %vm1671_vm8 = vcmp.eq.s32.totalorder %v5012_v19, %v1662_v56 }
 0x45a   : > { %v1465_v59 = vpack.c.bf16 %v1464_v58, %v1463_v57  ;;  %v4535_v57 = vld [vmem:[%s6437_s29] sm:$0xff]   ;;  %vm3863_vm1 = vmpackc.low %vm1676_vm15, %vm1675_vm6  ;;  %vm1670_vm6 = vcmp.eq.s32.totalorder %v5056_v24, %v1662_v56  ;;  %s4728_s29 = smov 96  }
 0x45c   : > { %1467 = vrot.lane.b32.xlu0 %v1465_v59, %s6428_s27 }
 0x4ce   : > { %v5475_v60 = vpop.permute.xlu0 %1467 }
 0x4cf   : > { %v1472_v61 = vsel %vm6357_vm14, %v5475_v60, 0  ;;  %v1470_v63 = vsel %vm6357_vm14, 0, %v5475_v60 }
 0x4d0   : > { %1495 = vrot.lane.b32.xlu0 %v1472_v61, %s6429_s5  ;;  %1493 = vrot.lane.b32.xlu1 %v1470_v63, %s6429_s5 }
 0x4d4   : > { %1489 = vrot.lane.b32.xlu0 %v1472_v61, %s6430_s3  ;;  %1487 = vrot.lane.b32.xlu1 %v1470_v63, %s6430_s3 }
 0x4d8   : > { %1483 = vrot.lane.b32.xlu0 %v1472_v61, %s6422_s0  ;;  %1481 = vrot.lane.b32.xlu1 %v1470_v63, %s6422_s0 }
 0x4dc   : > { %1477 = vrot.lane.b32.xlu0 %v1472_v61, %s6344_s1  ;;  %1475 = vrot.lane.b32.xlu1 %v1470_v63, %s6344_s1  ;;  %s6432_s1 = sld [smem:[#allocation24_spill]] }
 0x4e0   : > { %1559 = vperm.xlu0 %4471, %v1551_v0   ;;  %1554 = vperm.xlu1 %4472, %v1550_v2  }
 0x4e2   : > { %v1565_v5 = vld [vmem:[%s6432_s1 + $0x8] sm:$0xff]  ;;  %v1564_v7 = vld [vmem:[%s6432_s1] sm:$0xff]  ;;  %s4726_s1 = smov 64  }
 0x4e4   : > { %1573 = vperm.xlu0 %4471, %v1565_v5   ;;  %1568 = vperm.xlu1 %4472, %v1564_v7   ;;  %v4536_v5 = vld [vmem:[%s6275_s10] sm:$0xff]   ;;  %v1921_v7 = vld [vmem:[%s6276_s11 + $0x8] sm:$0xff] }
 0x542   : > { %v1496_v13 = vpop.permute.xlu0 %1495  ;;  %v1494_v38 = vpop.permute.xlu1 %1493 }
 0x543   : > { %v1497_v39 = vsel %vm1380_vm7, %v1494_v38, %v1496_v13  ;;  %v1920_v13 = vld [vmem:[%s6276_s11] sm:$0xff]  ;;  %v1923_v38 = vld [vmem:[%s6276_s11 + $0x18] sm:$0xff] }
 0x544   : > { %4246 = vmatpush3.bf16.msra.mxu0 %v1497_v39  ;;  %v1922_v39 = vld [vmem:[%s6276_s11 + $0x10] sm:$0xff] }
 0x545   : > { %4247 = vmatprep.subr.bf16.mxu0 %v4718_v62 }
 0x546   : > { %v1490_v41 = vpop.permute.xlu0 %1489  ;;  %v1488_v44 = vpop.permute.xlu1 %1487 }
 0x547   : > { %v1491_v49 = vsel %vm6348_vm12, %v1488_v44, %v1490_v41  ;;  %vm1672_vm12 = vcmp.eq.s32.totalorder %v5015_v20, %v1662_v56  ;;  %v1949_v41 = vld [vmem:[%s6277_s12 + $0x8] sm:$0xff]  ;;  %v1948_v44 = vld [vmem:[%s6277_s12] sm:$0xff] }
 0x548   : > { %4248 = vmatpush3.bf16.msra.mxu0 %v1491_v49  ;;  %v4538_v49 = vld [vmem:[%s6281_s16] sm:$0xff]  }
 0x549   : > { %4249 = vmatprep.subr.bf16.mxu0 %v4718_v62 }
 0x54a   : > { %v1484_v51 = vpop.permute.xlu0 %1483  ;;  %v1482_v52 = vpop.permute.xlu1 %1481 }
 0x54b   : > { %v1485_v53 = vsel %vm6347_vm9, %v1482_v52, %v1484_v51  ;;  %vm1674_vm9 = vcmp.eq.s32.totalorder %v4968_v16, %v1662_v56  ;;  %v1951_v51 = vld [vmem:[%s6277_s12 + $0x18] sm:$0xff]  ;;  %v1950_v52 = vld [vmem:[%s6277_s12 + $0x10] sm:$0xff] }
 0x54c   : > { %4250 = vmatpush3.bf16.msra.mxu0 %v1485_v53  ;;  %v2478_v16 = vld [vmem:[%s6283_s18 + $0x18] sm:$0xff] }
 0x54d   : > { %4251 = vmatprep.subr.bf16.mxu0 %v4718_v62 }
 0x54e   : > { %v1478_v54 = vpop.permute.xlu0 %1477  ;;  %v1476_v55 = vpop.permute.xlu1 %1475 }
 0x54f   : > { %v1479_v50 = vsel %vm6346_vm10, %v1476_v55, %v1478_v54  ;;  %vm1673_vm10 = vcmp.eq.s32.totalorder %v4965_v15, %v1662_v56 }
 0x550   : > { %4252 = vmatpush3.bf16.msra.mxu0 %v1479_v50  ;;  %vm3865_vm4 = vmpackc.low %vm1674_vm9, %vm1673_vm10  ;;  %vm1667_vm9 = vcmp.eq.s32.totalorder %v5092_v27, %v1662_v56  ;;  %vm1668_vm10 = vcmp.eq.s32.totalorder %v5095_v28, %v1662_v56 }
 0x551   : > { %4253 = vmatprep.subr.bf16.mxu0 %v4718_v62 }
 0x554   : > { %4254 = vmatpush3.bf16.msk.msra.mxu0 %vm5461_vm0, %v5475_v60 }
 0x555   : > { %4279 = vmatprep.subr.bf16.mxu0 %v4718_v62 }
 0x557   : > { %4256 = vmatmul.mubr.msk.bf16.vlgmr.msra.gmra.mxu0 %vm6358_vm2, %v4535_v57 }
 0x558   : > { %4280 = vmatpush3.bf16.msk.msra.mxu0 %vm3861_vm5, %v4717_v18  ;;  %4295 = vmatprep.mubr.msk.bf16.mxu0 %vm4721_vm11, %v4718_v62  ;;  %vm3867_vm11 = vmpackc.low %vm1672_vm12, %vm1671_vm8  ;;  %vm1669_vm5 = vcmp.eq.s32.totalorder %v5053_v23, %v1662_v56  ;;  %vm1665_vm8 = vcmp.eq.s32.totalorder %v5138_v31, %v1662_v56 }
 0x559   : > { %4281 = vmatprep.subr.bf16.mxu0 %v4718_v62  ;;  %vm5586_vm15 = vmpackc.low %vm1670_vm6, %vm1669_vm5 }
 0x55a   : > { %vm5596_vm12 = vmpackc.low %vm1668_vm10, %vm1667_vm9  ;;  %vm1581_vm9 = vcmp.eq.s32.totalorder %v4926_v1, %v4934_v6  ;;  %vm1582_vm10 = vcmp.eq.s32.totalorder %v5180_v35, %v4934_v6 }
 0x55b   : > { %v1560_v20 = vpop.permute.xlu0 %1559 }
 0x55c   : > { %4282 = vmatpush3.bf16.msk.msra.mxu0 %vm3863_vm1, %v4717_v18  ;;  %vm1583_vm1 = vcmp.eq.s32.totalorder %v5138_v31, %v4934_v6 }
 0x55d   : > { %4283 = vmatprep.subr.bf16.mxu0 %v4718_v62 }
 0x55f   : > { %v1574_v59 = vpop.permute.xlu0 %1573 }
 0x560   : > { %4284 = vmatpush3.bf16.msk.msra.mxu0 %vm3865_vm4, %v4717_v18  ;;  %vm1584_vm4 = vcmp.eq.s32.totalorder %v5141_v32, %v4934_v6  ;;  %v1555_v6 = vpop.permute.xlu1 %1554 }
 0x561   : > { %4285 = vmatprep.subr.bf16.mxu0 %v4718_v62  ;;  %vm5610_vm5 = vmpackc.low %vm1584_vm4, %vm1583_vm1  ;;  %vm1663_vm1 = vcmp.eq.s32.totalorder %v4926_v1, %v1662_v56  ;;  %vm1664_vm4 = vcmp.eq.s32.totalorder %v5180_v35, %v1662_v56 }
 0x562   : > { %4272 = vmatpush3.bf16.msk.msra.mxu1 %vm5610_vm5, %v4717_v18 }
 0x563   : > { %4273 = vmatprep.subr.bf16.mxu1 %v4718_v62 }
 0x564   : > { %4286 = vmatpush3.bf16.msk.msra.mxu0 %vm3867_vm11, %v4717_v18  ;;  %vm1666_vm11 = vcmp.eq.s32.totalorder %v5141_v32, %v1662_v56  ;;  %v1569_v31 = vpop.permute.xlu1 %1568 }
 0x565   : > { %4287 = vmatprep.subr.bf16.mxu0 %v4718_v62  ;;  %vm5617_vm6 = vmpackc.low %vm1666_vm11, %vm1665_vm8 }
 0x566   : > { %vm5632_vm8 = vmpackc.low %vm1582_vm10, %vm1581_vm9  ;;  %vm1761_vm9 = vcmask 130048   ;;  %vm6451_vm10 = vnez %v6384_v14 }
 0x567   : > { %4274 = vmatpush3.bf16.msk.msra.mxu1 %vm5632_vm8, %v4717_v18  ;;  %vm5639_vm11 = vmpackc.low %vm1664_vm4, %vm1663_vm1  ;;  %vm6452_vm1 = vnez %v6388_v21  ;;  %vm6453_vm4 = vnez %v6392_v25 }
 0x568   : > { %4288 = vmatpush3.bf16.msk.msra.mxu0 %vm5586_vm15, %v4717_v18 }
 0x569   : > { %4289 = vmatprep.subr.bf16.mxu0 %v4718_v62 }
 0x56c   : > { %4290 = vmatpush3.bf16.msk.msra.mxu0 %vm5596_vm12, %v4717_v18 }
 0x56d   : > { %4291 = vmatprep.subr.bf16.mxu0 %v4718_v62 }
 0x570   : > { %4292 = vmatpush3.bf16.msk.msra.mxu0 %vm5617_vm6, %v4717_v18 }
 0x571   : > { %4293 = vmatprep.subr.bf16.mxu0 %v4718_v62 }
 0x574   : > { %4294 = vmatpush3.bf16.msk.msra.mxu0 %vm5639_vm11, %v4717_v18 }
 0x617   : > { %v1543_v1 = vpop.f32.mrf.mxu0 }
 0x618   : > { %v1544_v19 = vadd.f32 %v1543_v1, %v5423_v48 }
 0x619   : > { %v4257_v23 = vpop.f32.mrf.mxu0 }
 0x61a   : > { %v1562_v24 = vmul.f32 %v1555_v6, %v1544_v19 }
 0x61b   : > { %v1546_v27 = vpop.f32.mrf.mxu0 }
 0x61c   : > { %v1547_v28 = vadd.f32 %v1546_v27, %v5425_v43  ;;  %v1576_v35 = vadd.f32 %v1569_v31, %v1562_v24  ;;  %v4539_v24 = vld [vmem:[%s6281_s16 + $0x8] sm:$0xff]  }
 0x61d   : > { %v4258_v32 = vpop.f32.mrf.mxu0 }
 0x61e   : > { %v1563_v62 = vmul.f32 %v1560_v20, %v1547_v28  ;;  %v1580_v58 = vpack.c.bf16 %v1547_v28, %v1544_v19  ;;  %v1578_v61 = vmax.f32 %v1576_v35, 0.0 }
 0x620   : > { %v1577_v60 = vadd.f32 %v1574_v59, %v1563_v62  ;;  %4276 = vmatmul.mubr.bf16.vlgmr.msra.gmra.mxu1 %v1580_v58  ;;  %4296 = vmatmul.mubr.bf16.vlgmr.msra.gmra.mxu0 %v1580_v58 }
 0x621   : > { %4315 = vmatprep.mubr.msk.bf16.mxu1 %vm6358_vm2, %v4536_v5  ;;  %4301 = vmatprep.mubr.msk.bf16.mxu0 %vm1761_vm9, %v4538_v49  ;;  %vm6460_vm2 = vcmask 1031168  }
 0x622   : > { %v1579_v63 = vmax.f32 %v1577_v60, 0.0  ;;  %v4537_v60 = vld [vmem:[%s6275_s10 + $0x8] sm:$0xff]  }
 0x624   : > { %v1817_v0 = vpack.c.bf16 %v1579_v63, %v1578_v61 }
 0x626   : > { %1819 = vrot.lane.b32.xlu1 %v1817_v0, %s6428_s27 }
 0x698   : > { %v5649_v48 = vpop.permute.xlu1 %1819 }
 0x699   : > { %v1824_v2 = vsel %vm6357_vm14, %v5649_v48, 0  ;;  %v1822_v43 = vsel %vm6357_vm14, 0, %v5649_v48  ;;  %vm6459_vm14 = vcmask 1022976  }
 0x69a   : > { %1847 = vrot.lane.b32.xlu1 %v1824_v2, %s6429_s5  ;;  %1845 = vrot.lane.b32.xlu0 %v1822_v43, %s6429_s5 }
 0x69e   : > { %1841 = vrot.lane.b32.xlu1 %v1824_v2, %s6430_s3  ;;  %1839 = vrot.lane.b32.xlu0 %v1822_v43, %s6430_s3 }
 0x6a2   : > { %1835 = vrot.lane.b32.xlu1 %v1824_v2, %s6422_s0  ;;  %1833 = vrot.lane.b32.xlu0 %v1822_v43, %s6422_s0 }
 0x6a6   : > { %1829 = vrot.lane.b32.xlu1 %v1824_v2, %s6450_s8  ;;  %1827 = vrot.lane.b32.xlu0 %v1822_v43, %s6450_s8 }
 0x6aa   : > { %1931 = vperm.xlu1 %4472, %v1921_v7   ;;  %1926 = vperm.xlu0 %4471, %v1920_v13  }
 0x6ae   : > { %1941 = vperm.xlu1 %4472, %v1923_v38   ;;  %1936 = vperm.xlu0 %4471, %v1922_v39  }
 0x6b2   : > { %1959 = vperm.xlu1 %4472, %v1949_v41   ;;  %1954 = vperm.xlu0 %4471, %v1948_v44  }
 0x6b6   : > { %1969 = vperm.xlu1 %4472, %v1951_v51   ;;  %1964 = vperm.xlu0 %4471, %v1950_v52  }
 0x6e0   : > { %v1655_v53 = vpop.f32.mrf.mxu1  ;;  %v1737_v54 = vpop.f32.mrf.mxu0 }
 0x6e1   : > { %v1744_v6 = vmax.f32 %v1655_v53, %v1737_v54 }
 0x6e2   : > { %v4277_v55 = vpop.f32.mrf.mxu1  ;;  %v4297_v56 = vpop.f32.mrf.mxu0 }
 0x6e4   : > { %v1658_v50 = vpop.f32.mrf.mxu1  ;;  %v1740_v57 = vpop.f32.mrf.mxu0 }
 0x6e5   : > { %v1745_v1 = vmax.f32 %v1658_v50, %v1740_v57 }
 0x6e6   : > { %v4278_v19 = vpop.f32.mrf.mxu1  ;;  %v4298_v20 = vpop.f32.mrf.mxu0 }
 0x6e7   : > { %v1750_v23 = vpack.c.bf16 %v1745_v1, %v1744_v6 }
 0x6e9   : > { %4299 = vmatprep.subr.bf16.mxu0 %v1750_v23 }
 0x6ea   : > { %4300 = vmatpush3.bf16.msra.mxu0 %v1750_v23 }
 0x6eb   : > { %4319 = vmatprep.subr.msk.bf16.mxu0 %vm6451_vm10, %v4717_v18 }
 0x6ed   : > { %4302 = vmatmul.mubr.msk.bf16.vlgmr.msra.gmra.mxu0 %vm1761_vm9, %v4539_v24  ;;  %vm6454_vm9 = vnez %v6397_v29 }
 0x6ee   : > { %4320 = vmatpush3.bf16.msk.msra.mxu0 %vm6451_vm10, %v4717_v18  ;;  %vm6455_vm10 = vnez %v6401_v33 }
 0x6ef   : > { %4321 = vmatprep.subr.msk.bf16.mxu0 %vm6452_vm1, %v4717_v18 }
 0x6f2   : > { %4322 = vmatpush3.bf16.msk.msra.mxu0 %vm6452_vm1, %v4717_v18  ;;  %vm6456_vm1 = vnez %v6405_v36 }
 0x6f3   : > { %4323 = vmatprep.subr.msk.bf16.mxu0 %vm6453_vm4, %v4717_v18 }
 0x6f6   : > { %4324 = vmatpush3.bf16.msk.msra.mxu0 %vm6453_vm4, %v4717_v18  ;;  %vm6457_vm4 = vnez %v6411_v40 }
 0x6f7   : > { %4325 = vmatprep.subr.msk.bf16.mxu0 %vm6454_vm9, %v4717_v18 }
 0x6fa   : > { %4326 = vmatpush3.bf16.msk.msra.mxu0 %vm6454_vm9, %v4717_v18  ;;  %vm6458_vm9 = vnez %v6415_v45 }
 0x6fb   : > { %4327 = vmatprep.subr.msk.bf16.mxu0 %vm6455_vm10, %v4717_v18 }
 0x6fe   : > { %4328 = vmatpush3.bf16.msk.msra.mxu0 %vm6455_vm10, %v4717_v18 }
 0x6ff   : > { %4329 = vmatprep.subr.msk.bf16.mxu0 %vm6456_vm1, %v4717_v18 }
 0x702   : > { %4330 = vmatpush3.bf16.msk.msra.mxu0 %vm6456_vm1, %v4717_v18 }
 0x703   : > { %4331 = vmatprep.subr.msk.bf16.mxu0 %vm6457_vm4, %v4717_v18 }
 0x706   : > { %4332 = vmatpush3.bf16.msk.msra.mxu0 %vm6457_vm4, %v4717_v18 }
 0x707   : > { %4333 = vmatprep.subr.msk.bf16.mxu0 %vm6458_vm9, %v4717_v18 }
 0x70a   : > { %4334 = vmatpush3.bf16.msk.msra.mxu0 %vm6458_vm9, %v4717_v18  ;;  %vm6461_vm9 = vcmask 1039360  }
 0x70b   : > { %2135 = vmatprep.subr.bf16.mxu0 %v4722_v47 }
 0x70c   : > { %v1848_v14 = vpop.permute.xlu1 %1847  ;;  %v1846_v21 = vpop.permute.xlu0 %1845 }
 0x70d   : > { %v1849_v25 = vsel %vm1380_vm7, %v1846_v21, %v1848_v14  ;;  %vm6463_vm7 = vcmask 654336  }
 0x70e   : > { %4305 = vmatprep.subr.bf16.mxu1 %v1849_v25 }
 0x70f   : > { %4306 = vmatpush3.bf16.msra.mxu1 %v1849_v25 }
 0x710   : > { %v1842_v29 = vpop.permute.xlu1 %1841  ;;  %v1840_v27 = vpop.permute.xlu0 %1839 }
 0x711   : > { %v1843_v28 = vsel %vm6459_vm14, %v1840_v27, %v1842_v29  ;;  %vm6462_vm14 = vnez %v6386_v17 }
 0x712   : > { %4307 = vmatprep.subr.bf16.mxu1 %v1843_v28 }
 0x713   : > { %4308 = vmatpush3.bf16.msra.mxu1 %v1843_v28  ;;  %v2186_v28 = vld [vmem:[%s6279_s14 + $0x10] sm:$0xff] }
 0x714   : > { %v1836_v31 = vpop.permute.xlu1 %1835  ;;  %v1834_v32 = vpop.permute.xlu0 %1833 }
 0x715   : > { %v1837_v35 = vsel %vm6460_vm2, %v1834_v32, %v1836_v31  ;;  %vm6464_vm2 = vnez %v6390_v22  ;;  %v2187_v31 = vld [vmem:[%s6279_s14 + $0x18] sm:$0xff]  ;;  %v2214_v32 = vld [vmem:[%s6280_s15 + $0x10] sm:$0xff] }
 0x716   : > { %4309 = vmatprep.subr.bf16.mxu1 %v1837_v35 }
 0x717   : > { %4310 = vmatpush3.bf16.msra.mxu1 %v1837_v35  ;;  %v2215_v35 = vld [vmem:[%s6280_s15 + $0x18] sm:$0xff] }
 0x718   : > { %v1830_v62 = vpop.permute.xlu1 %1829  ;;  %v1828_v58 = vpop.permute.xlu0 %1827 }
 0x719   : > { %v1831_v59 = vsel %vm6461_vm9, %v1828_v58, %v1830_v62  ;;  %vm6466_vm9 = vnez %v6399_v30  ;;  %v2184_v62 = vld [vmem:[%s6279_s14] sm:$0xff]  ;;  %v2185_v58 = vld [vmem:[%s6279_s14 + $0x8] sm:$0xff] }
 0x71a   : > { %4311 = vmatprep.subr.bf16.mxu1 %v1831_v59 }
 0x71b   : > { %4312 = vmatpush3.bf16.msra.mxu1 %v1831_v59  ;;  %v2212_v59 = vld [vmem:[%s6280_s15] sm:$0xff] }
 0x71c   : > { %4313 = vmatprep.subr.msk.bf16.mxu1 %vm5461_vm0, %v5649_v48 }
 0x71f   : > { %4314 = vmatpush3.bf16.msk.msra.mxu1 %vm5461_vm0, %v5649_v48  ;;  %vm6465_vm0 = vnez %v6394_v26 }
 0x720   : > { %4339 = vmatprep.subr.msk.bf16.mxu1 %vm6462_vm14, %v4717_v18 }
 0x722   : > { %4316 = vmatmul.mubr.msk.bf16.vlgmr.msra.gmra.mxu1 %vm6463_vm7, %v4537_v60  ;;  %vm6468_vm7 = vnez %v6407_v37  ;;  %v2213_v60 = vld [vmem:[%s6280_s15 + $0x8] sm:$0xff] }
 0x723   : > { %4340 = vmatpush3.bf16.msk.msra.mxu1 %vm6462_vm14, %v4717_v18  ;;  %vm6467_vm14 = vnez %v6403_v34 }
 0x724   : > { %4341 = vmatprep.subr.msk.bf16.mxu1 %vm6464_vm2, %v4717_v18 }
 0x725   : > { %v1932_v17 = vpop.permute.xlu1 %1931  ;;  %v1927_v22 = vpop.permute.xlu0 %1926 }
 0x727   : > { %4342 = vmatpush3.bf16.msk.msra.mxu1 %vm6464_vm2, %v4717_v18  ;;  %vm6469_vm2 = vnez %v6413_v42 }
 0x728   : > { %4343 = vmatprep.subr.msk.bf16.mxu1 %vm6465_vm0, %v4717_v18 }
 0x729   : > { %v1942_v26 = vpop.permute.xlu1 %1941  ;;  %v1937_v30 = vpop.permute.xlu0 %1936 }
 0x72b   : > { %4344 = vmatpush3.bf16.msk.msra.mxu1 %vm6465_vm0, %v4717_v18  ;;  %vm6470_vm0 = vnez %v6417_v46  ;;  %v2744_v46 = vld [vmem:[%s6286_s21] sm:$0xff] }
 0x72c   : > { %4345 = vmatprep.subr.msk.bf16.mxu1 %vm6466_vm9, %v4717_v18 }
 0x72d   : > { %v1960_v12 = vpop.permute.xlu1 %1959  ;;  %v1955_v63 = vpop.permute.xlu0 %1954 }
 0x72f   : > { %4346 = vmatpush3.bf16.msk.msra.mxu1 %vm6466_vm9, %v4717_v18 }
 0x730   : > { %4347 = vmatprep.subr.msk.bf16.mxu1 %vm6467_vm14, %v4717_v18 }
 0x731   : > { %v1970_v7 = vpop.permute.xlu1 %1969  ;;  %v1965_v38 = vpop.permute.xlu0 %1964 }
 0x733   : > { %4348 = vmatpush3.bf16.msk.msra.mxu1 %vm6467_vm14, %v4717_v18 }
 0x734   : > { %4349 = vmatprep.subr.msk.bf16.mxu1 %vm6468_vm7, %v4717_v18 }
 0x737   : > { %4350 = vmatpush3.bf16.msk.msra.mxu1 %vm6468_vm7, %v4717_v18 }
 0x738   : > { %4351 = vmatprep.subr.msk.bf16.mxu1 %vm6469_vm2, %v4717_v18 }
 0x73b   : > { %4352 = vmatpush3.bf16.msk.msra.mxu1 %vm6469_vm2, %v4717_v18 }
 0x73c   : > { %4353 = vmatprep.subr.msk.bf16.mxu1 %vm6470_vm0, %v4717_v18 }
 0x73f   : > { %4354 = vmatpush3.bf16.msk.msra.mxu1 %vm6470_vm0, %v4717_v18 }
 0x740   : > { %4359 = vmatprep.subr.msk.bf16.mxu1 %vm5529_vm13, %v4717_v18 }
 0x7ad   : > { %v5837_v8 = vpop.f32.mrf.mxu0 }
 0x7af   : > { %v5839_v9 = vpop.f32.mrf.mxu0 }
 0x7b1   : > { %v5841_v57 = vpop.f32.mrf.mxu0 }
 0x7b3   : > { %v5843_v10 = vpop.f32.mrf.mxu0 }
 0x7e2   : > { %v4317_v61 = vpop.f32.mrf.mxu1 }
 0x7e3   : > { %v1946_v2 = vmul.f32 %v4317_v61, %v1937_v30 }
 0x7e4   : > { %v1905_v0 = vpop.f32.mrf.mxu1 }
 0x7e5   : > { %v1944_v48 = vmul.f32 %v1927_v22, %v1905_v0  ;;  %v1974_v49 = vadd.f32 %v1965_v38, %v1946_v2  ;;  %v4542_v0 = vld [vmem:[%s6278_s13] ss:$8 sps:$4 sm:$0xff]   ;;  %v4545_v2 = vld [vmem:[%s6278_s13 + $0x10] ss:$8 sps:$4 sm:$0xff]  }
 0x7e6   : > { %v4318_v43 = vpop.f32.mrf.mxu1 }
 0x7e7   : > { %v1947_v5 = vmul.f32 %v4318_v43, %v1942_v26  ;;  %v1972_v39 = vadd.f32 %v1955_v63, %v1944_v48  ;;  %v1978_v55 = vmax.f32 %v1974_v49, 0.0  ;;  %v4543_v48 = vld [vmem:[%s6278_s13 + $0x14] ss:$8 sps:$4 sm:$0xff]  }
 0x7e8   : > { %v1908_v13 = vpop.f32.mrf.mxu1 }
 0x7e9   : > { %v1975_v41 = vadd.f32 %v1970_v7, %v1947_v5  ;;  %v1945_v44 = vmul.f32 %v1932_v17, %v1908_v13  ;;  %v1976_v53 = vmax.f32 %v1972_v39, 0.0  ;;  %v4540_v17 = vld [vmem:[%s6278_s13 + $0x4] ss:$8 sps:$4 sm:$0xff]  }
 0x7eb   : > { %v1973_v51 = vadd.f32 %v1960_v12, %v1945_v44  ;;  %v1979_v52 = vmax.f32 %v1975_v41, 0.0 }
 0x7ed   : > { %v1977_v54 = vmax.f32 %v1973_v51, 0.0  ;;  %v1981_v50 = vpack.c.bf16 %v1979_v52, %v1978_v55 }
 0x7ef   : > { %v1980_v56 = vpack.c.bf16 %v1977_v54, %v1976_v53 }
 0x7f1   : > { %4335 = vmatprep.mubr.bf16.mxu0 %v1980_v56  ;;  %4355 = vmatprep.mubr.bf16.mxu1 %v1980_v56 }
 0x7f2   : > { %4336 = vmatmul.mubr.bf16.vlgmr.msra.gmra.mxu0 %v1981_v50  ;;  %4356 = vmatmul.mubr.bf16.vlgmr.msra.gmra.mxu1 %v1981_v50 }
 0x7f3   : > { %4360 = vmatpush3.bf16.msk.msra.mxu1 %vm5529_vm13, %v4717_v18  ;;  %vm2128_vm13 = vcmask 261120  }
 0x7f4   : > { %4361 = vmatprep.subr.msk.bf16.mxu1 %vm5541_vm3, %v4717_v18  ;;  %3923 = vmatprep.mubr.msk.bf16.mxu0 %vm2128_vm13, %v4540_v17  ;;  %v2503_v17 = vld [vmem:[%s6284_s19] sm:$0xff] }
 0x7f7   : > { %4362 = vmatpush3.bf16.msk.msra.mxu1 %vm5541_vm3, %v4717_v18  ;;  %vm2246_vm3 = vcmask 523264  }
 0x7f8   : > { %4363 = vmatprep.subr.msk.bf16.mxu1 %vm5610_vm5, %v4717_v18 }
 0x7fb   : > { %4364 = vmatpush3.bf16.msk.msra.mxu1 %vm5610_vm5, %v4717_v18  ;;  %vm6472_vm5 = vcmask 15360  }
 0x7fc   : > { %4365 = vmatprep.subr.msk.bf16.mxu1 %vm5632_vm8, %v4717_v18 }
 0x7ff   : > { %4366 = vmatpush3.bf16.msk.msra.mxu1 %vm5632_vm8, %v4717_v18  ;;  %vm2860_vm8 = vcmask 785408  }
 0x800   : > { %4371 = vmatprep.subr.msk.bf16.mxu1 %vm5586_vm15, %v4717_v18 }
 0x8b2   : > { %v4337_v6 = vpop.f32.mrf.mxu0  ;;  %v4357_v1 = vpop.f32.mrf.mxu1 }
 0x8b4   : > { %v2016_v19 = vpop.f32.mrf.mxu0  ;;  %v2067_v20 = vpop.f32.mrf.mxu1 }
 0x8b6   : > { %v4338_v23 = vpop.f32.mrf.mxu0  ;;  %v4358_v24 = vpop.f32.mrf.mxu1 }
 0x8b7   : > { %v2083_v15 = vpack.c.bf16 %v4358_v24, %v4357_v1  ;;  %v2032_v29 = vpack.c.bf16 %v4338_v23, %v4337_v6 }
 0x8b8   : > { %v2070_v14 = vpop.f32.mrf.mxu1  ;;  %v2019_v25 = vpop.f32.mrf.mxu0 }
 0x8b9   : > { %v2082_v21 = vpack.c.bf16 %v2070_v14, %v2067_v20  ;;  %2096 = vrot.lane.b32.xlu0 %v2083_v15, %s6450_s8  ;;  %v2031_v27 = vpack.c.bf16 %v2019_v25, %v2016_v19 }
 0x8bb   : > { %2094 = vrot.lane.b32.xlu1 %v2082_v21, %s6450_s8 }
 0x8bd   : > { %2088 = vrot.lane.b32.xlu0 %v2032_v29, %s6450_s8 }
 0x8bf   : > { %2086 = vrot.lane.b32.xlu1 %v2031_v27, %s6450_s8 }
 0x8c1   : > { %2102 = vrot.lane.b32.xlu0 %v2032_v29, %s6422_s0 }
 0x8c3   : > { %2100 = vrot.lane.b32.xlu1 %v2031_v27, %s6422_s0 }
 0x8c5   : > { %2200 = vperm.xlu0 %4471, %v2186_v28  }
 0x8c7   : > { %2205 = vperm.xlu1 %4472, %v2187_v31  }
 0x8c9   : > { %2228 = vperm.xlu0 %4471, %v2214_v32  }
 0x8cb   : > { %2233 = vperm.xlu1 %4472, %v2215_v35  }
 0x8cd   : > { %2190 = vperm.xlu0 %4471, %v2184_v62   ;;  %v2475_v62 = vld [vmem:[%s6283_s18] sm:$0xff] }
 0x8cf   : > { %2195 = vperm.xlu1 %4472, %v2185_v58   ;;  %v2504_v58 = vld [vmem:[%s6284_s19 + $0x8] sm:$0xff] }
 0x8d1   : > { %2218 = vperm.xlu0 %4471, %v2212_v59   ;;  %v2477_v59 = vld [vmem:[%s6283_s18 + $0x10] sm:$0xff] }
 0x8d3   : > { %2223 = vperm.xlu1 %4472, %v2213_v60   ;;  %v2506_v60 = vld [vmem:[%s6284_s19 + $0x18] sm:$0xff] }
 0x92b   : > { %v2097_v22 = vpop.permute.xlu0 %2096 }
 0x92c   : > { %2136 = vmatpush1.bf16.msra.mxu0 %v2097_v22  ;;  %v4548_v22 = vld [vmem:[%s6282_s17 + $0x4] ss:$8 sps:$4 sm:$0xff]  }
 0x92d   : > { %2137 = vmatprep.subr.bf16.mxu0 %v4722_v47  ;;  %v2095_v26 = vpop.permute.xlu1 %2094 }
 0x92f   : > { %v2089_v30 = vpop.permute.xlu0 %2088 }
 0x930   : > { %2138 = vmatpush1.bf16.msra.mxu0 %v2095_v26  ;;  %v2505_v26 = vld [vmem:[%s6284_s19 + $0x10] sm:$0xff] }
 0x931   : > { %2139 = vmatprep.subr.bf16.mxu0 %v4722_v47  ;;  %v2087_v12 = vpop.permute.xlu1 %2086 }
 0x933   : > { %v2103_v61 = vpop.permute.xlu0 %2102 }
 0x934   : > { %2140 = vmatpush1.bf16.msra.mxu0 %v2089_v30 }
 0x935   : > { %2141 = vmatprep.subr.bf16.mxu0 %v4722_v47  ;;  %v2101_v63 = vpop.permute.xlu1 %2100 }
 0x938   : > { %2142 = vmatpush1.bf16.msra.mxu0 %v2087_v12 }
 0x939   : > { %2143 = vmatprep.subr.bf16.mxu0 %v4722_v47 }
 0x93c   : > { %2144 = vmatpush1.bf16.msra.mxu0 %v2083_v15 }
 0x93d   : > { %2145 = vmatprep.subr.bf16.mxu0 %v4722_v47 }
 0x940   : > { %2146 = vmatpush1.bf16.msra.mxu0 %v2082_v21  ;;  %v2201_v43 = vpop.permute.xlu0 %2200 }
 0x941   : > { %2147 = vmatprep.subr.bf16.mxu0 %v4722_v47 }
 0x942   : > { %v2206_v5 = vpop.permute.xlu1 %2205 }
 0x944   : > { %2148 = vmatpush1.bf16.msra.mxu0 %v2032_v29  ;;  %v2229_v7 = vpop.permute.xlu0 %2228 }
 0x945   : > { %2149 = vmatprep.subr.bf16.mxu0 %v4722_v47 }
 0x946   : > { %v2234_v13 = vpop.permute.xlu1 %2233 }
 0x948   : > { %2150 = vmatpush1.bf16.msra.mxu0 %v2031_v27  ;;  %v2191_v38 = vpop.permute.xlu0 %2190 }
 0x949   : > { %2163 = vmatprep.subr.bf16.mxu0 %v4722_v47 }
 0x94a   : > { %v2196_v44 = vpop.permute.xlu1 %2195 }
 0x94c   : > { %2164 = vmatpush2.bf16.msra.mxu0 %v2103_v61  ;;  %v2219_v54 = vpop.permute.xlu0 %2218 }
 0x94d   : > { %2165 = vmatprep.subr.bf16.mxu0 %v4722_v47 }
 0x94e   : > { %v2224_v1 = vpop.permute.xlu1 %2223 }
 0x950   : > { %2166 = vmatpush2.bf16.msra.mxu0 %v2101_v63 }
 0x951   : > { %2426 = vmatprep.subr.bf16.mxu0 %v4722_v47 }
 0x953   : > { %2168 = vmatmul.mubr.bf16.vlgmr.msra.gmra.mxu0 %v4542_v0 }
 0x954   : > { %3924 = vmatprep.mubr.msk.bf16.mxu0 %vm2128_vm13, %v4543_v48 }
 0x95b   : > { %2176 = vmatmul.mubr.bf16.gmra.mxu0 %v4545_v2 }
 0x95c   : > { %3949 = vmatprep.mubr.msk.bf16.mxu0 %vm2128_vm13, %v4548_v22 }
 0xa13   : > { %v2169_v39 = vpop.f32.mrf.mxu0 }
 0xa14   : > { %v2170_v41 = vadd.f32 %v2169_v39, %v5839_v9 }
 0xa15   : > { %v2171_v49 = vpop.f32.mrf.mxu0 }
 0xa16   : > { %v2208_v51 = vmul.f32 %v2191_v38, %v2170_v41 }
 0xa17   : > { %v2172_v52 = vpop.f32.mrf.mxu0 }
 0xa18   : > { %v2173_v53 = vadd.f32 %v2172_v52, %v5843_v10  ;;  %v2236_v56 = vadd.f32 %v2219_v54, %v2208_v51  ;;  %v4549_v54 = vld [vmem:[%s6282_s17 + $0x14] ss:$8 sps:$4 sm:$0xff]  }
 0xa19   : > { %v2174_v55 = vpop.f32.mrf.mxu0 }
 0xa1a   : > { %v2209_v50 = vmul.f32 %v2196_v44, %v2173_v53  ;;  %v2244_v6 = vpack.c.bf16 %v2173_v53, %v2170_v41  ;;  %v2240_v24 = vmax.f32 %v2236_v56, 0.0  ;;  %v4546_v53 = vld [vmem:[%s6282_s17] ss:$8 sps:$4 sm:$0xff]   ;;  %v4551_v55 = vld [vmem:[%s6282_s17 + $0x10] ss:$8 sps:$4 sm:$0xff]  }
 0xa1b   : > { %v2177_v19 = vpop.f32.mrf.mxu0 }
 0xa1c   : > { %v2237_v20 = vadd.f32 %v2224_v1, %v2209_v50  ;;  %v2178_v23 = vadd.f32 %v5837_v8, %v2177_v19  ;;  %4367 = vmatprep.mubr.msk.bf16.mxu1 %vm2246_vm3, %v2244_v6 }
 0xa1d   : > { %v2179_v9 = vpop.f32.mrf.mxu0 }
 0xa1e   : > { %v2241_v15 = vmax.f32 %v2237_v20, 0.0  ;;  %v2210_v14 = vmul.f32 %v2201_v43, %v2178_v23 }
 0xa1f   : > { %v2180_v21 = vpop.f32.mrf.mxu0 }
 0xa20   : > { %v2181_v10 = vadd.f32 %v5841_v57, %v2180_v21  ;;  %v2355_v25 = vpack.c.bf16 %v2241_v15, %v2240_v24  ;;  %v2238_v27 = vadd.f32 %v2229_v7, %v2210_v14 }
 0xa21   : > { %v2182_v29 = vpop.f32.mrf.mxu0 }
 0xa22   : > { %v2211_v28 = vmul.f32 %v2206_v5, %v2181_v10  ;;  %v2245_v31 = vpack.c.bf16 %v2181_v10, %v2178_v23  ;;  %2359 = vrot.lane.b32.xlu1 %v2355_v25, %s6428_s27  ;;  %v2242_v8 = vmax.f32 %v2238_v27, 0.0 }
 0xa24   : > { %v2239_v32 = vadd.f32 %v2234_v13, %v2211_v28  ;;  %4368 = vmatmul.mubr.msk.bf16.vlgmr.msra.gmra.mxu1 %vm2246_vm3, %v2245_v31 }
 0xa25   : > { %4372 = vmatpush3.bf16.msk.msra.mxu1 %vm5586_vm15, %v4717_v18  ;;  %4379 = vmatprep.mubr.msk.bf16.mxu1 %vm2246_vm3, %v2244_v6  ;;  %vm6471_vm15 = vnez %v6415_v45  ;;  %v2476_v45 = vld [vmem:[%s6283_s18 + $0x8] sm:$0xff] }
 0xa26   : > { %v2243_v35 = vmax.f32 %v2239_v32, 0.0  ;;  %4373 = vmatprep.subr.msk.bf16.mxu1 %vm5596_vm12, %v4717_v18 }
 0xa28   : > { %v2356_v57 = vpack.c.bf16 %v2243_v35, %v2242_v8 }
 0xa29   : > { %4374 = vmatpush3.bf16.msk.msra.mxu1 %vm5596_vm12, %v4717_v18  ;;  %vm2367_vm12 = vcmask 539648  }
 0xa2a   : > { %2361 = vrot.lane.b32.xlu0 %v2356_v57, %s6428_s27  ;;  %4375 = vmatprep.subr.msk.bf16.mxu1 %vm5617_vm6, %v4717_v18  ;;  %s771_s27 = scalar_lea.vmem [#allocation5], %s770_s6 }
 0xa2b   : > { %s3632_s28 = sshll.u32 %s771_s27, 4  ;;  %s3633_s28 = int_to_ptr.vmem [resolvable:$true] %s3632_s28 }
 0xa2d   : > { %4376 = vmatpush3.bf16.msk.msra.mxu1 %vm5617_vm6, %v4717_v18  ;;  %vm6473_vm6 = vmmov %vm6472_vm5 }
 0xa2e   : > { %4377 = vmatprep.subr.msk.bf16.mxu1 %vm5639_vm11, %v4717_v18 }
 0xa31   : > { %4378 = vmatpush3.bf16.msk.msra.mxu1 %vm5639_vm11, %v4717_v18 }
 0xa32   : > { %4383 = vmatprep.subr.msk.bf16.mxu1 %vm6455_vm10, %v4717_v18 }
 0xa34   : > { %4380 = vmatmul.mubr.msk.bf16.vlgmr.msra.gmra.mxu1 %vm2246_vm3, %v2245_v31 }
 0xa35   : > { %4384 = vmatpush3.bf16.msk.msra.mxu1 %vm6455_vm10, %v4717_v18 }
 0xa36   : > { %4385 = vmatprep.subr.msk.bf16.mxu1 %vm6456_vm1, %v4717_v18 }
 0xa39   : > { %4386 = vmatpush3.bf16.msk.msra.mxu1 %vm6456_vm1, %v4717_v18 }
 0xa3a   : > { %4387 = vmatprep.subr.msk.bf16.mxu1 %vm6457_vm4, %v4717_v18 }
 0xa3d   : > { %4388 = vmatpush3.bf16.msk.msra.mxu1 %vm6457_vm4, %v4717_v18 }
 0xa3e   : > { %4389 = vmatprep.subr.msk.bf16.mxu1 %vm6471_vm15, %v4717_v18 }
 0xa41   : > { %4390 = vmatpush3.bf16.msk.msra.mxu1 %vm6471_vm15, %v4717_v18 }
 0xa42   : > { %4395 = vmatprep.subr.msk.bf16.mxu1 %vm6467_vm14, %v4717_v18 }
 0xa94   : > { %v2360_v33 = vpop.permute.xlu1 %2359 }
 0xa95   : > { %v2364_v36 = vsel %vm6472_vm5, 0, %v2360_v33 }
 0xa96   : > { %v2368_v3 = vsel %vm2367_vm12, %v2364_v36, 0 }
 0xa97   : > { %2386 = vrot.lane.b32.xlu1 %v2368_v3, %s6430_s3 }
 0xa9b   : > { %2380 = vrot.lane.b32.xlu1 %v2368_v3, %s6422_s0 }
 0xa9c   : > { %v2362_v40 = vpop.permute.xlu0 %2361 }
 0xa9d   : > { %v2366_v4 = vsel %vm6473_vm6, 0, %v2362_v40 }
 0xa9e   : > { %v2370_v11 = vsel %vm2367_vm12, %v2366_v4, 0 }
 0xa9f   : > { %2388 = vrot.lane.b32.xlu0 %v2370_v11, %s6430_s3  ;;  %2374 = vrot.lane.b32.xlu1 %v2368_v3, %s6450_s8  ;;  %s6475_s3 = sld [smem:[#allocation26_spill]] }
 0xaa3   : > { %2382 = vrot.lane.b32.xlu0 %v2370_v11, %s6422_s0  ;;  %2392 = vrot.lane.b32.xlu1 %v2368_v3, %s6429_s5 }
 0xaa7   : > { %2376 = vrot.lane.b32.xlu0 %v2370_v11, %s6450_s8  ;;  %2486 = vperm.xlu1 %4472, %v2476_v45  }
 0xaab   : > { %2394 = vrot.lane.b32.xlu0 %v2370_v11, %s6429_s5  ;;  %2496 = vperm.xlu1 %4472, %v2478_v16   ;;  %s4041_s5 = sshll.u32 %s4881_s7, 4  ;;  %s4729_s7 = smov [#allocation5]  }
 0xaaf   : > { %2481 = vperm.xlu0 %4471, %v2475_v62   ;;  %2514 = vperm.xlu1 %4472, %v2504_v58  }
 0xab3   : > { %2491 = vperm.xlu0 %4471, %v2477_v59   ;;  %2524 = vperm.xlu1 %4472, %v2506_v60  }
 0xab7   : > { %2509 = vperm.xlu0 %4471, %v2503_v17  }
 0xabb   : > { %2519 = vperm.xlu0 %4471, %v2505_v26  }
 0xae4   : > { %v5995_v30 = vpop.f32.mrf.mxu1 }
 0xae6   : > { %v5997_v12 = vpop.f32.mrf.mxu1 }
 0xae8   : > { %v5999_v61 = vpop.f32.mrf.mxu1 }
 0xaea   : > { %v6001_v63 = vpop.f32.mrf.mxu1 }
 0xaf4   : > { %v6003_v0 = vpop.f32.mrf.mxu1 }
 0xaf5   : > { %v2353_v48 = vmax.f32 %v5995_v30, %v6003_v0  ;;  %v4587_v30 = vld [vmem:[#allocation2 + $0x110] sm:$0xff]  }
 0xaf6   : > { %v6007_v2 = vpop.f32.mrf.mxu1 }
 0xaf7   : > { %v2351_v43 = vmax.f32 %v5997_v12, %v6007_v2 }
 0xaf8   : > { %v6011_v5 = vpop.f32.mrf.mxu1 }
 0xaf9   : > { %v2354_v7 = vmax.f32 %v5999_v61, %v6011_v5 }
 0xafa   : > { %v6060_v34 = vpop.f32.mrf.mxu1 }
 0xb09   : > { %v2387_v38 = vpop.permute.xlu1 %2386 }
 0xb0d   : > { %v2381_v41 = vpop.permute.xlu1 %2380 }
 0xb11   : > { %v2389_v13 = vpop.permute.xlu0 %2388  ;;  %v2375_v49 = vpop.permute.xlu1 %2374 }
 0xb12   : > { %2427 = vmatpush1.bf16.msra.mxu0 %v2389_v13 }
 0xb13   : > { %2428 = vmatprep.subr.bf16.mxu0 %v4722_v47 }
 0xb15   : > { %v2383_v39 = vpop.permute.xlu0 %2382  ;;  %v2393_v52 = vpop.permute.xlu1 %2392 }
 0xb16   : > { %2429 = vmatpush1.bf16.msra.mxu0 %v2387_v38 }
 0xb17   : > { %2430 = vmatprep.subr.bf16.mxu0 %v4722_v47 }
 0xb19   : > { %v2377_v44 = vpop.permute.xlu0 %2376 }
 0xb1a   : > { %2431 = vmatpush1.bf16.msra.mxu0 %v2383_v39  ;;  %v2772_v39 = vld [vmem:[%s6287_s22] sm:$0xff] }
 0xb1b   : > { %2432 = vmatprep.subr.bf16.mxu0 %v4722_v47 }
 0xb1d   : > { %v2395_v51 = vpop.permute.xlu0 %2394 }
 0xb1e   : > { %2433 = vmatpush1.bf16.msra.mxu0 %v2381_v41  ;;  %v2745_v41 = vld [vmem:[%s6286_s21 + $0x8] sm:$0xff] }
 0xb1f   : > { %2434 = vmatprep.subr.bf16.mxu0 %v4722_v47 }
 0xb22   : > { %2435 = vmatpush1.bf16.msra.mxu0 %v2377_v44  ;;  %v2487_v50 = vpop.permute.xlu1 %2486  ;;  %v2773_v44 = vld [vmem:[%s6287_s22 + $0x8] sm:$0xff] }
 0xb23   : > { %2436 = vmatprep.subr.bf16.mxu0 %v4722_v47 }
 0xb26   : > { %2437 = vmatpush1.bf16.msra.mxu0 %v2375_v49  ;;  %v2497_v1 = vpop.permute.xlu1 %2496  ;;  %v2746_v49 = vld [vmem:[%s6286_s21 + $0x10] sm:$0xff] }
 0xb27   : > { %2438 = vmatprep.subr.bf16.mxu0 %v4722_v47 }
 0xb2a   : > { %2439 = vmatpush1.bf16.msra.mxu0 %v2370_v11  ;;  %v2482_v56 = vpop.permute.xlu0 %2481  ;;  %v2515_v21 = vpop.permute.xlu1 %2514 }
 0xb2b   : > { %2440 = vmatprep.subr.bf16.mxu0 %v4722_v47 }
 0xb2e   : > { %2441 = vmatpush1.bf16.msra.mxu0 %v2368_v3  ;;  %v2492_v6 = vpop.permute.xlu0 %2491  ;;  %v2525_v3 = vpop.permute.xlu1 %2524 }
 0xb2f   : > { %2454 = vmatprep.subr.bf16.mxu0 %v4722_v47 }
 0xb32   : > { %2455 = vmatpush2.bf16.msra.mxu0 %v2395_v51  ;;  %v2510_v9 = vpop.permute.xlu0 %2509  ;;  %v2747_v51 = vld [vmem:[%s6286_s21 + $0x18] sm:$0xff] }
 0xb33   : > { %2456 = vmatprep.subr.bf16.mxu0 %v4722_v47 }
 0xb36   : > { %2457 = vmatpush2.bf16.msra.mxu0 %v2393_v52  ;;  %v2520_v35 = vpop.permute.xlu0 %2519  ;;  %v2774_v52 = vld [vmem:[%s6287_s22 + $0x10] sm:$0xff] }
 0xb37   : > { %2695 = vmatprep.subr.bf16.mxu0 %v4722_v47 }
 0xb39   : > { %2459 = vmatmul.mubr.bf16.vlgmr.msra.gmra.mxu0 %v4546_v53  ;;  %v2775_v53 = vld [vmem:[%s6287_s22 + $0x18] sm:$0xff] }
 0xb3a   : > { %3950 = vmatprep.mubr.msk.bf16.mxu0 %vm2128_vm13, %v4549_v54  ;;  %v4554_v54 = vld [vmem:[%s6285_s20 + $0x4] ss:$8 sps:$4 sm:$0xff]  }
 0xb41   : > { %2467 = vmatmul.mubr.bf16.gmra.mxu0 %v4551_v55 }
 0xb42   : > { %3975 = vmatprep.mubr.msk.bf16.mxu0 %vm2128_vm13, %v4554_v54 }
 0xbf9   : > { %v2460_v19 = vpop.f32.mrf.mxu0 }
 0xbfa   : > { %v2499_v20 = vmul.f32 %v2482_v56, %v2460_v19 }
 0xbfb   : > { %v2462_v23 = vpop.f32.mrf.mxu0 }
 0xbfc   : > { %v2527_v15 = vadd.f32 %v2510_v9, %v2499_v20  ;;  %v4552_v20 = vld [vmem:[%s6285_s20] ss:$8 sps:$4 sm:$0xff]   ;;  %v4555_v23 = vld [vmem:[%s6285_s20 + $0x14] ss:$8 sps:$4 sm:$0xff]   ;;  %v4557_v9 = vld [vmem:[%s6285_s20 + $0x10] ss:$8 sps:$4 sm:$0xff]  }
 0xbfd   : > { %v2463_v24 = vpop.f32.mrf.mxu0 }
 0xbfe   : > { %v2500_v14 = vmul.f32 %v2487_v50, %v2463_v24  ;;  %v2531_v27 = vmax.f32 %v2527_v15, 0.0  ;;  %v4558_v24 = vld [vmem:[#allocation2 + $0x78] sm:$0xff]   ;;  %v4560_v15 = vld [vmem:[#allocation2 + $0x70] sm:$0xff]  }
 0xbff   : > { %v2465_v10 = vpop.f32.mrf.mxu0 }
 0xc00   : > { %v2528_v25 = vadd.f32 %v2515_v21, %v2500_v14  ;;  %v4566_v14 = vld [vmem:[#allocation2 + $0x178] sm:$0xff]   ;;  %v4561_v21 = vld [vmem:[#allocation2 + $0x30] sm:$0xff]  }
 0xc01   : > { %v2468_v29 = vpop.f32.mrf.mxu0  ;;  %v4567_v10 = vld [vmem:[#allocation2 + $0x138] sm:$0xff]  }
 0xc02   : > { %v2532_v28 = vmax.f32 %v2528_v25, 0.0  ;;  %v2501_v31 = vmul.f32 %v2492_v6, %v2468_v29  ;;  %v4562_v25 = vld [vmem:[#allocation2 + $0x68] sm:$0xff]   ;;  %v4570_v29 = vld [vmem:[#allocation2 + $0x170] sm:$0xff]  }
 0xc03   : > { %v2470_v32 = vpop.f32.mrf.mxu0 }
 0xc04   : > { %v2535_v8 = vpack.c.bf16 %v2532_v28, %v2531_v27  ;;  %v2529_v33 = vadd.f32 %v2520_v35, %v2501_v31  ;;  %v4571_v27 = vld [vmem:[#allocation2 + $0x130] sm:$0xff]   ;;  %v4574_v28 = vld [vmem:[#allocation2 + $0x168] sm:$0xff]   ;;  %v4564_v32 = vld [vmem:[#allocation2 + $0x60] sm:$0xff]  }
 0xc05   : > { %v2471_v57 = vpop.f32.mrf.mxu0  ;;  %v4563_v31 = vld [vmem:[#allocation2 + $0x28] sm:$0xff]   ;;  %v4565_v35 = vld [vmem:[#allocation2 + $0x20] sm:$0xff]  }
 0xc06   : > { %v2502_v36 = vmul.f32 %v2497_v1, %v2471_v57  ;;  %4391 = vmatprep.mubr.msk.bf16.mxu1 %vm2246_vm3, %v2535_v8  ;;  %v2533_v11 = vmax.f32 %v2529_v33, 0.0  ;;  %v4568_v57 = vld [vmem:[#allocation2 + $0x58] sm:$0xff]  }
 0xc07   : > { %v2473_v40 = vpop.f32.mrf.mxu0  ;;  %v4569_v33 = vld [vmem:[#allocation2 + $0x18] sm:$0xff]  }
 0xc08   : > { %v2530_v4 = vadd.f32 %v2525_v3, %v2502_v36  ;;  %v4572_v36 = vld [vmem:[#allocation2 + $0x50] sm:$0xff]  }
 0xc09   : > { %v4573_v3 = vld [vmem:[#allocation2 + $0x10] sm:$0xff]  }
 0xc0a   : > { %v2534_v45 = vmax.f32 %v2530_v4, 0.0 }
 0xc0c   : > { %v2536_v16 = vpack.c.bf16 %v2534_v45, %v2533_v11 }
 0xc0e   : > { %4392 = vmatmul.mubr.msk.bf16.vlgmr.msra.gmra.mxu1 %vm2246_vm3, %v2536_v16 }
 0xc0f   : > { %4396 = vmatpush3.bf16.msk.msra.mxu1 %vm6467_vm14, %v4717_v18  ;;  %4403 = vmatprep.mubr.msk.bf16.mxu1 %vm2246_vm3, %v2535_v8  ;;  %v4575_v8 = vld [vmem:[#allocation2 + $0x128] sm:$0xff]  }
 0xc10   : > { %4397 = vmatprep.subr.msk.bf16.mxu1 %vm6468_vm7, %v4717_v18 }
 0xc13   : > { %4398 = vmatpush3.bf16.msk.msra.mxu1 %vm6468_vm7, %v4717_v18 }
 0xc14   : > { %4399 = vmatprep.subr.msk.bf16.mxu1 %vm6469_vm2, %v4717_v18 }
 0xc17   : > { %4400 = vmatpush3.bf16.msk.msra.mxu1 %vm6469_vm2, %v4717_v18 }
 0xc18   : > { %4401 = vmatprep.subr.msk.bf16.mxu1 %vm6470_vm0, %v4717_v18 }
 0xc1b   : > { %4402 = vmatpush3.bf16.msk.msra.mxu1 %vm6470_vm0, %v4717_v18 }
 0xc1c   : > { %4133 = vmatprep.subr.bf16.mxu1 %v4558_v24 }
 0xc1e   : > { %4404 = vmatmul.mubr.msk.bf16.vlgmr.msra.gmra.mxu1 %vm2246_vm3, %v2536_v16 }
 0xcce   : > { %v4393_v37 = vpop.f32.mrf.mxu1 }
 0xcd0   : > { %v2577_v62 = vpop.f32.mrf.mxu1 }
 0xcd2   : > { %v4394_v58 = vpop.f32.mrf.mxu1 }
 0xcd3   : > { %v2593_v38 = vpack.c.bf16 %v4394_v58, %v4393_v37  ;;  %v4576_v37 = vld [vmem:[#allocation2 + $0x48] sm:$0xff]  }
 0xcd4   : > { %v2580_v59 = vpop.f32.mrf.mxu1  ;;  %v4577_v58 = vld [vmem:[#allocation2 + $0x8] sm:$0xff]  }
 0xcd5   : > { %v2592_v18 = vpack.c.bf16 %v2580_v59, %v2577_v62  ;;  %v4578_v59 = vld [vmem:[#allocation2 + $0x160] sm:$0xff]  }
 0xcde   : > { %v4405_v60 = vpop.f32.mrf.mxu1 }
 0xce0   : > { %v2628_v17 = vpop.f32.mrf.mxu1 }
 0xce2   : > { %v4406_v42 = vpop.f32.mrf.mxu1 }
 0xce3   : > { %v2644_v22 = vpack.c.bf16 %v4406_v42, %v4405_v60  ;;  %v2352_v60 = vmax.f32 %v6001_v63, %v6060_v34  ;;  %v4579_v42 = vld [vmem:[#allocation2 + $0x120] sm:$0xff]   ;;  %v4583_v63 = vld [vmem:[#allocation2 + $0x118] sm:$0xff]  }
 0xce4   : > { %v2631_v26 = vpop.f32.mrf.mxu1 }
 0xce5   : > { %v2643_v13 = vpack.c.bf16 %v2631_v26, %v2628_v17  ;;  %2657 = vrot.lane.b32.xlu0 %v2644_v22, %s6450_s8 }
 0xce7   : > { %2655 = vrot.lane.b32.xlu1 %v2643_v13, %s6450_s8 }
 0xce9   : > { %2649 = vrot.lane.b32.xlu0 %v2593_v38, %s6450_s8 }
 0xceb   : > { %2647 = vrot.lane.b32.xlu1 %v2592_v18, %s6450_s8  ;;  %s6230_s8 = scalar_lea.hbm %s6475_s3, %s4041_s5 }
 0xced   : > { %2663 = vrot.lane.b32.xlu0 %v2593_v38, %s6422_s0 }
 0xcef   : > { %2661 = vrot.lane.b32.xlu1 %v2592_v18, %s6422_s0  ;;  %s4727_s0 = smov 32  }
 0xcf1   : > { %2750 = vperm.xlu0 %4471, %v2744_v46   ;;  %v4582_v46 = vld [vmem:[#allocation2 + $0x158] sm:$0xff]  }
 0xcf3   : > { %2778 = vperm.xlu1 %4472, %v2772_v39  }
 0xcf5   : > { %2755 = vperm.xlu0 %4471, %v2745_v41  }
 0xcf7   : > { %2783 = vperm.xlu1 %4472, %v2773_v44  }
 0xcf9   : > { %2760 = vperm.xlu0 %4471, %v2746_v49  }
 0xcfb   : > { %2765 = vperm.xlu1 %4472, %v2747_v51  }
 0xcfd   : > { %2788 = vperm.xlu0 %4471, %v2774_v52  }
 0xcff   : > { %2793 = vperm.xlu1 %4472, %v2775_v53   ;;  %v4584_v53 = vld [vmem:[#allocation2 + $0xf8] sm:$0xff]  }
 0xd57   : > { %v2658_v55 = vpop.permute.xlu0 %2657 }
 0xd58   : > { %2696 = vmatpush1.bf16.msra.mxu0 %v2658_v55 }
 0xd59   : > { %2697 = vmatprep.subr.bf16.mxu0 %v4722_v47  ;;  %v2656_v56 = vpop.permute.xlu1 %2655 }
 0xd5b   : > { %v2650_v50 = vpop.permute.xlu0 %2649 }
 0xd5c   : > { %2698 = vmatpush1.bf16.msra.mxu0 %v2656_v56 }
 0xd5d   : > { %2699 = vmatprep.subr.bf16.mxu0 %v4722_v47  ;;  %v2648_v6 = vpop.permute.xlu1 %2647 }
 0xd5f   : > { %v2664_v1 = vpop.permute.xlu0 %2663 }
 0xd60   : > { %2700 = vmatpush1.bf16.msra.mxu0 %v2650_v50 }
 0xd61   : > { %2701 = vmatprep.subr.bf16.mxu0 %v4722_v47  ;;  %v2662_v19 = vpop.permute.xlu1 %2661 }
 0xd64   : > { %2702 = vmatpush1.bf16.msra.mxu0 %v2648_v6  ;;  %v4586_v6 = vld [vmem:[#allocation2 + $0x150] sm:$0xff]  }
 0xd65   : > { %2703 = vmatprep.subr.bf16.mxu0 %v4722_v47 }
 0xd68   : > { %2704 = vmatpush1.bf16.msra.mxu0 %v2644_v22 }
 0xd69   : > { %2705 = vmatprep.subr.bf16.mxu0 %v4722_v47 }
 0xd6c   : > { %2706 = vmatpush1.bf16.msra.mxu0 %v2643_v13  ;;  %v2751_v40 = vpop.permute.xlu0 %2750 }
 0xd6d   : > { %2707 = vmatprep.subr.bf16.mxu0 %v4722_v47 }
 0xd6e   : > { %v2779_v4 = vpop.permute.xlu1 %2778 }
 0xd70   : > { %2708 = vmatpush1.bf16.msra.mxu0 %v2593_v38  ;;  %v2756_v11 = vpop.permute.xlu0 %2755 }
 0xd71   : > { %2709 = vmatprep.subr.bf16.mxu0 %v4722_v47 }
 0xd72   : > { %v2784_v22 = vpop.permute.xlu1 %2783 }
 0xd74   : > { %2710 = vmatpush1.bf16.msra.mxu0 %v2592_v18  ;;  %v4580_v18 = vld [vmem:[#allocation2 + $0x40] sm:$0xff]   ;;  %v2761_v12 = vpop.permute.xlu0 %2760 }
 0xd75   : > { %2723 = vmatprep.subr.bf16.mxu0 %v4722_v47 }
 0xd76   : > { %v2766_v54 = vpop.permute.xlu1 %2765 }
 0xd78   : > { %2724 = vmatpush2.bf16.msra.mxu0 %v2664_v1  ;;  %v2789_v0 = vpop.permute.xlu0 %2788 }
 0xd79   : > { %2725 = vmatprep.subr.bf16.mxu0 %v4722_v47  ;;  %v4559_v47 = vld [vmem:[#allocation2 + $0x38] sm:$0xff]  }
 0xd7a   : > { %4134 = vmatpush3.bf16.msra.mxu1 %v4559_v47 }
 0xd7b   : > { %4135 = vmatprep.subr.bf16.mxu1 %v4560_v15 }
 0xd7c   : > { %2726 = vmatpush2.bf16.msra.mxu0 %v2662_v19 }
 0xd7d   : > { %4177 = vmatprep.subr.bf16.mxu0 %v4566_v14 }
 0xd7e   : > { %4136 = vmatpush3.bf16.msra.mxu1 %v4561_v21 }
 0xd7f   : > { %2728 = vmatmul.mubr.bf16.vlgmr.msra.gmra.mxu0 %v4552_v20  ;;  %4137 = vmatprep.subr.bf16.mxu1 %v4562_v25 }
 0xd80   : > { %3976 = vmatprep.mubr.msk.bf16.mxu0 %vm2128_vm13, %v4555_v23  ;;  %4178 = vmatpush3.bf16.msra.mxu0 %v4567_v10 }
 0xd81   : > { %4179 = vmatprep.subr.bf16.mxu0 %v4570_v29  ;;  %v4590_v29 = vld [vmem:[#allocation2 + $0x148] sm:$0xff]  }
 0xd82   : > { %4138 = vmatpush3.bf16.msra.mxu1 %v4563_v31  ;;  %v2794_v31 = vpop.permute.xlu1 %2793 }
 0xd83   : > { %4139 = vmatprep.subr.bf16.mxu1 %v4564_v32 }
 0xd84   : > { %4180 = vmatpush3.bf16.msra.mxu0 %v4571_v27 }
 0xd85   : > { %4181 = vmatprep.subr.bf16.mxu0 %v4574_v28 }
 0xd86   : > { %4140 = vmatpush3.bf16.msra.mxu1 %v4565_v35 }
 0xd87   : > { %2736 = vmatmul.mubr.bf16.gmra.mxu0 %v4557_v9  ;;  %4141 = vmatprep.subr.bf16.mxu1 %v4568_v57 }
 0xd88   : > { %4182 = vmatpush3.bf16.msra.mxu0 %v4575_v8 }
 0xd89   : > { %4183 = vmatprep.subr.bf16.mxu0 %v4578_v59 }
 0xd8a   : > { %4142 = vmatpush3.bf16.msra.mxu1 %v4569_v33  ;;  %v4594_v33 = vld [vmem:[#allocation2 + $0x140] sm:$0xff]  }
 0xd8b   : > { %4143 = vmatprep.subr.bf16.mxu1 %v4572_v36 }
 0xd8c   : > { %4184 = vmatpush3.bf16.msra.mxu0 %v4579_v42 }
 0xd8d   : > { %4185 = vmatprep.subr.bf16.mxu0 %v4582_v46 }
 0xd8e   : > { %4144 = vmatpush3.bf16.msra.mxu1 %v4573_v3 }
 0xd8f   : > { %4145 = vmatprep.subr.bf16.mxu1 %v4576_v37 }
 0xd90   : > { %4186 = vmatpush3.bf16.msra.mxu0 %v4583_v63 }
 0xd91   : > { %4187 = vmatprep.subr.bf16.mxu0 %v4586_v6 }
 0xd92   : > { %4146 = vmatpush3.bf16.msra.mxu1 %v4577_v58 }
 0xd93   : > { %4147 = vmatprep.subr.bf16.mxu1 %v4580_v18 }
 0xd94   : > { %4188 = vmatpush3.bf16.msra.mxu0 %v4587_v30 }
 0xd95   : > { %4189 = vmatprep.subr.bf16.mxu0 %v4590_v29 }
 0xe3f   : > { %v2729_v45 = vpop.f32.mrf.mxu0 }
 0xe40   : > { %v2730_v16 = vadd.f32 %v2729_v45, %v2351_v43  ;;  %v4581_v43 = vld [vmem:[#allocation2] sm:$0xff]  }
 0xe41   : > { %v2731_v62 = vpop.f32.mrf.mxu0  ;;  %4148 = vmatpush3.bf16.msra.mxu1 %v4581_v43 }
 0xe42   : > { %v2768_v17 = vmul.f32 %v2751_v40, %v2730_v16  ;;  %4155 = vmatprep.subr.bf16.mxu1 %v4584_v53 }
 0xe43   : > { %v2732_v26 = vpop.f32.mrf.mxu0 }
 0xe44   : > { %v2796_v13 = vadd.f32 %v2779_v4, %v2768_v17  ;;  %v2733_v38 = vadd.f32 %v2732_v26, %v2352_v60 }
 0xe45   : > { %v2734_v2 = vpop.f32.mrf.mxu0 }
 0xe46   : > { %v6120_v39 = vmax.f32 %v2796_v13, 0.0  ;;  %v2769_v41 = vmul.f32 %v2756_v11, %v2733_v38  ;;  %v4595_v11 = vld [vmem:[#allocation2 + $0x100] sm:$0xff]  }
 0xe47   : > { %v2737_v34 = vpop.f32.mrf.mxu0 }
 0xe48   : > { %v2797_v44 = vadd.f32 %v2784_v22, %v2769_v41  ;;  %v2738_v49 = vadd.f32 %v2737_v34, %v2353_v48  ;;  %v2809_v51 = vrot.slane %v6120_v39, 2  ;;  %v2823_v52 = vrot.slane %v6120_v39, 6 }
 0xe49   : > { %v2739_v55 = vpop.f32.mrf.mxu0  ;;  %v2805_v56 = vrot.slane %v6120_v39, 1  ;;  %v2819_v50 = vrot.slane %v6120_v39, 5  ;;  %v2813_v9 = vrot.slane %v6120_v39, 3  ;;  %v2827_v24 = vrot.slane %v6120_v39, 7 }
 0xe4a   : > { %v6129_v1 = vmax.f32 %v2797_v44, 0.0  ;;  %v2770_v19 = vmul.f32 %v2761_v12, %v2738_v49  ;;  %v4478_v20 = vpack.i.bf16 %v2809_v51, %v2823_v52  ;;  %v2817_v63 = vrot.slane %v6120_v39, 4 }
 0xe4b   : > { %v2740_v48 = vpop.f32.mrf.mxu0  ;;  %v4473_v23 = vpack.i.bf16 %v2805_v56, %v2819_v50  ;;  %v4483_v32 = vpack.i.bf16 %v2813_v9, %v2827_v24 }
 0xe4c   : > { %v2798_v47 = vadd.f32 %v2789_v0, %v2770_v19  ;;  %v2741_v15 = vadd.f32 %v2740_v48, %v2354_v7  ;;  %4479 = vrot.lane.b32.xlu1 %v4478_v20, %s4726_s1  ;;  %v2832_v14 = vrot.slane %v6129_v1, 1  ;;  %v2846_v21 = vrot.slane %v6129_v1, 5  ;;  %v4591_v7 = vld [vmem:[#allocation2 + $0x108] sm:$0xff]  }
 0xe4d   : > { %4474 = vrot.lane.b32.xlu0 %v4473_v23, %s4727_s0  ;;  %v2840_v10 = vrot.slane %v6129_v1, 3  ;;  %v2742_v25 = vpop.f32.mrf.mxu0  ;;  %v2854_v5 = vrot.slane %v6129_v1, 7  ;;  %v2836_v8 = vrot.slane %v6129_v1, 2  ;;  %v2850_v35 = vrot.slane %v6129_v1, 6  ;;  %4190 = vmatpush3.bf16.msra.mxu0 %v4591_v7 }
 0xe4e   : > { %v6141_v27 = vmax.f32 %v2798_v47, 0.0  ;;  %v2771_v28 = vmul.f32 %v2766_v54, %v2741_v15  ;;  %v4488_v61 = vpack.i.bf16 %v2832_v14, %v2846_v21  ;;  %4191 = vmatprep.subr.bf16.mxu0 %v4594_v33  ;;  %v2844_v23 = vrot.slane %v6129_v1, 4  ;;  %v4585_v15 = vld [vmem:[#allocation2 + $0xb8] sm:$0xff]   ;;  %v4588_v21 = vld [vmem:[#allocation2 + $0xf0] sm:$0xff]  }
 0xe4f   : > { %v4498_v3 = vpack.i.bf16 %v2840_v10, %v2854_v5  ;;  %v4493_v45 = vpack.i.bf16 %v2836_v8, %v2850_v35  ;;  %v4592_v35 = vld [vmem:[#allocation2 + $0xe8] sm:$0xff]  }
 0xe50   : > { %v2799_v57 = vadd.f32 %v2794_v31, %v2771_v28  ;;  %4489 = vrot.lane.b32.xlu1 %v4488_v61, %s4727_s0  ;;  %v2876_v40 = vrot.slane %v6141_v27, 2  ;;  %v2890_v4 = vrot.slane %v6141_v27, 6  ;;  %v2872_v16 = vrot.slane %v6141_v27, 1  ;;  %v4589_v61 = vld [vmem:[#allocation2 + $0xb0] sm:$0xff]  }
 0xe51   : > { %4484 = vrot.lane.b32.xlu0 %v4483_v32, %s4728_s29  ;;  %v2886_v37 = vrot.slane %v6141_v27, 5  ;;  %4192 = vmatpush3.bf16.msra.mxu0 %v4595_v11  ;;  %v2880_v17 = vrot.slane %v6141_v27, 3  ;;  %v2894_v42 = vrot.slane %v6141_v27, 7  ;;  %v2884_v7 = vrot.slane %v6141_v27, 4  ;;  %v4593_v11 = vld [vmem:[#allocation2 + $0xa8] sm:$0xff]  }
 0xe52   : > { %v6148_v36 = vmax.f32 %v2799_v57, 0.0  ;;  %v4508_v62 = vpack.i.bf16 %v2876_v40, %v2890_v4 }
 0xe53   : > { %v4503_v60 = vpack.i.bf16 %v2872_v16, %v2886_v37  ;;  %v4513_v38 = vpack.i.bf16 %v2880_v17, %v2894_v42  ;;  %v4596_v37 = vld [vmem:[#allocation2 + $0xe0] sm:$0xff]  }
 0xe54   : > { %4499 = vrot.lane.b32.xlu1 %v4498_v3, %s4728_s29  ;;  %v2899_v58 = vrot.slane %v6148_v36, 1  ;;  %v2913_v59 = vrot.slane %v6148_v36, 5  ;;  %v2907_v26 = vrot.slane %v6148_v36, 3  ;;  %v2921_v13 = vrot.slane %v6148_v36, 7  ;;  %v4597_v42 = vld [vmem:[#allocation2 + $0xa0] sm:$0xff]  }
 0xe55   : > { %4494 = vrot.lane.b32.xlu0 %v4493_v45, %s4726_s1  ;;  %v2903_v18 = vrot.slane %v6148_v36, 2  ;;  %v2917_v12 = vrot.slane %v6148_v36, 6 }
 0xe56   : > { %v4518_v22 = vpack.i.bf16 %v2899_v58, %v2913_v59  ;;  %v4528_v2 = vpack.i.bf16 %v2907_v26, %v2921_v13  ;;  %v4599_v26 = vld [vmem:[#allocation2 + $0x98] sm:$0xff]   ;;  %v4600_v13 = vld [vmem:[#allocation2 + $0xd0] sm:$0xff]  }
 0xe57   : > { %v4523_v43 = vpack.i.bf16 %v2903_v18, %v2917_v12  ;;  %v4601_v18 = vld [vmem:[#allocation2 + $0x90] sm:$0xff]  }
 0xe58   : > { %4509 = vrot.lane.b32.xlu1 %v4508_v62, %s4726_s1 }
 0xe59   : > { %4504 = vrot.lane.b32.xlu0 %v4503_v60, %s4727_s0 }
 0xe5c   : > { %4519 = vrot.lane.b32.xlu1 %v4518_v22, %s4727_s0  ;;  %v4598_v22 = vld [vmem:[#allocation2 + $0xd8] sm:$0xff]   ;;  %s4652_s0 = sshll.u32 %s4729_s7, 4  ;;  %s4653_s0 = int_to_ptr.vmem [resolvable:$false] %s4652_s0 }
 0xe5d   : > { %4514 = vrot.lane.b32.xlu0 %v4513_v38, %s4728_s29  ;;  %p4655_p11 = scmp.lt.s32.totalorder %s3633_s28, %s4653_s0 }
 0xe60   : > { %4529 = vrot.lane.b32.xlu1 %v4528_v2, %s4728_s29  ;;  %v4602_v2 = vld [vmem:[#allocation2 + $0xc8] sm:$0xff]   ;;  %s4654_s29 = scalar_lea.vmem %s4653_s0, 32 }
 0xe61   : > { %4524 = vrot.lane.b32.xlu0 %v4523_v43, %s4726_s1  ;;  %s4648_s1 = scalar_lea.vmem %s3633_s28, 16 }
 0xe62   : > { %p4649_p8 = scmp.ne.s32.totalorder %s3633_s28, %s4648_s1  ;;  %p4656_p12 = scmp.lt.s32.totalorder %s4654_s29, %s4648_s1 }
 0xe64   : > { %p4650_p9 = pnand %p4649_p8, %p4898_p5  ;;  %p4657_p13 = por %p4656_p12, %p4655_p11 }
 0xe66   : > { %p4651_p10 = pneg %p4650_p9 }
 0xe68   : > { %p4658_p0 = pnand %p4657_p13, %p4651_p10 }
 0xebe   : > { %v4480_v46 = vpop.permute.xlu1 %4479 }
 0xebf   : > { %v4475_v41 = vpop.permute.xlu0 %4474  ;;  %v4482_v49 = vunpack.i.h.bf16 %v4480_v46  ;;  %v4481_v51 = vunpack.i.l.bf16 %v4480_v46 }
 0xec0   : > { %v4477_v34 = vunpack.i.h.bf16 %v4475_v41  ;;  %v4476_v44 = vunpack.i.l.bf16 %v4475_v41 }
 0xec2   : > { %v2858_v52 = vsel %vm2128_vm13, %v6120_v39, %v4477_v34  ;;  %v2862_v53 = vsel %vm2128_vm13, %v2817_v63, %v4476_v44  ;;  %v6174_v54 = vpop.permute.xlu1 %4489  ;;  %v4603_v44 = vld [vmem:[#allocation2 + $0x88] sm:$0xff]  }
 0xec3   : > { %v4485_v55 = vpop.permute.xlu0 %4484  ;;  %v2859_v6 = vsel %vm2246_vm3, %v2858_v52, %v4482_v49  ;;  %v2863_v19 = vsel %vm2246_vm3, %v2862_v53, %v4481_v51  ;;  %v4491_v20 = vunpack.i.l.bf16 %v6174_v54  ;;  %v4492_v43 = vunpack.i.h.bf16 %v6174_v54  ;;  %v4604_v51 = vld [vmem:[#allocation2 + $0xc0] sm:$0xff]  }
 0xec4   : > { %v4487_v56 = vunpack.i.h.bf16 %v4485_v55  ;;  %v4486_v50 = vunpack.i.l.bf16 %v4485_v55  ;;  %v2911_v49 = vrot.slane %v6148_v36, 4 }
 0xec5   : > { %v2868_v10 = vsel %vm2128_vm13, %v2844_v23, %v4491_v20  ;;  %v2865_v52 = vsel %vm2128_vm13, %v6129_v1, %v4492_v43  ;;  %v4609_v23 = vld [vmem:[#allocation2 + $0x1b0] sm:$0xff]  }
 0xec6   : > { %v2861_v30 = vsel %vm2860_vm8, %v2859_v6, %v4487_v56  ;;  %v6180_v0 = vpop.permute.xlu1 %4499  ;;  %v2864_v39 = vsel %vm2860_vm8, %v2863_v19, %v4486_v50  ;;  %v4605_v6 = vld [vmem:[#allocation2 + $0x80] sm:$0xff]   ;;  %v4606_v19 = vld [vmem:[#allocation2 + $0x1f8] sm:$0xff]  }
 0xec7   : > { %v3065_v48 = vpack.c.bf16 %v2861_v30, %v2861_v30  ;;  %v6184_v9 = vpop.permute.xlu0 %4494  ;;  %v4501_v24 = vunpack.i.l.bf16 %v6180_v0  ;;  %v3066_v47 = vpack.c.bf16 %v2864_v39, %v2864_v39  ;;  %v4502_v53 = vunpack.i.h.bf16 %v6180_v0  ;;  %v4607_v39 = vld [vmem:[#allocation2 + $0x1b8] sm:$0xff]   ;;  %v4608_v0 = vld [vmem:[#allocation2 + $0x1f0] sm:$0xff]  }
 0xec8   : > { %v4496_v14 = vunpack.i.l.bf16 %v6184_v9  ;;  %v4497_v46 = vunpack.i.h.bf16 %v6184_v9  ;;  %v4610_v9 = vld [vmem:[#allocation2 + $0x1e8] sm:$0xff]  }
 0xec9   : > { %3490 = vmatprep.mubr.bf16.mxu1 %v3066_v47  ;;  %v4612_v47 = vld [vmem:[#allocation2 + $0x1e0] sm:$0xff]  }
 0xeca   : > { %v2869_v25 = vsel %vm2246_vm3, %v2868_v10, %v4496_v14  ;;  %3491 = vmatmul.mubr.bf16.vlgmr.msra.gmra.mxu1 %v3065_v48  ;;  %v4510_v29 = vpop.permute.xlu1 %4509  ;;  %v2866_v54 = vsel %vm2246_vm3, %v2865_v52, %v4497_v46  ;;  %v4614_v14 = vld [vmem:[#allocation2 + $0x1d8] sm:$0xff]   ;;  %v4616_v10 = vld [vmem:[#allocation2 + $0x1d0] sm:$0xff]  }
 0xecb   : > { %4156 = vmatpush3.bf16.msra.mxu1 %v4585_v15  ;;  %v4505_v28 = vpop.permute.xlu0 %4504  ;;  %v2870_v5 = vsel %vm2860_vm8, %v2869_v25, %v4501_v24  ;;  %v4512_v57 = vunpack.i.h.bf16 %v4510_v29  ;;  %v4511_v33 = vunpack.i.l.bf16 %v4510_v29  ;;  %v2867_v20 = vsel %vm2860_vm8, %v2866_v54, %v4502_v53  ;;  %v4611_v24 = vld [vmem:[#allocation2 + $0x1a8] sm:$0xff]   ;;  %v4613_v15 = vld [vmem:[#allocation2 + $0x1a0] sm:$0xff]   ;;  %v4617_v25 = vld [vmem:[#allocation2 + $0x190] sm:$0xff]  }
 0xecc   : > { %v4507_v31 = vunpack.i.h.bf16 %v4505_v28  ;;  %v4506_v32 = vunpack.i.l.bf16 %v4505_v28  ;;  %4157 = vmatprep.subr.bf16.mxu1 %v4588_v21  ;;  %v3068_v8 = vpack.c.bf16 %v2870_v5, %v2870_v5  ;;  %v3067_v1 = vpack.c.bf16 %v2867_v20, %v2867_v20  ;;  %v4615_v21 = vld [vmem:[#allocation2 + $0x198] sm:$0xff]   ;;  %v4618_v29 = vld [vmem:[#allocation2 + $0x1c8] sm:$0xff]  }
 0xecd   : > { %v4619_v5 = vld [vmem:[#allocation2 + $0x188] sm:$0xff]  }
 0xece   : > { %v2925_v3 = vsel %vm2128_vm13, %v6141_v27, %v4507_v31  ;;  %v2928_v40 = vsel %vm2128_vm13, %v2884_v7, %v4506_v32  ;;  %3530 = vmatprep.mubr.bf16.mxu1 %v3068_v8  ;;  %v6199_v38 = vpop.permute.xlu1 %4519  ;;  %v4620_v7 = vld [vmem:[#allocation2 + $0x1c0] sm:$0xff]  }
 0xecf   : > { %4158 = vmatpush3.bf16.msra.mxu1 %v4589_v61  ;;  %v4515_v4 = vpop.permute.xlu0 %4514  ;;  %v2926_v62 = vsel %vm2246_vm3, %v2925_v3, %v4512_v57  ;;  %v2929_v58 = vsel %vm2246_vm3, %v2928_v40, %v4511_v33  ;;  %v4521_v41 = vunpack.i.l.bf16 %v6199_v38  ;;  %v4522_v28 = vunpack.i.h.bf16 %v6199_v38 }
 0xed0   : > { %v4517_v45 = vunpack.i.h.bf16 %v4515_v4  ;;  %v4516_v16 = vunpack.i.l.bf16 %v4515_v4  ;;  %4159 = vmatprep.subr.bf16.mxu1 %v4592_v35  ;;  %v4621_v35 = vld [vmem:[#allocation2 + $0x180] sm:$0xff]  }
 0xed1   : > { %v2934_v55 = vsel %vm2128_vm13, %v2911_v49, %v4521_v41  ;;  %v2931_v31 = vsel %vm2128_vm13, %v6148_v36, %v4522_v28 }
 0xed2   : > { %v2927_v59 = vsel %vm2860_vm8, %v2926_v62, %v4517_v45  ;;  %v2930_v60 = vsel %vm2860_vm8, %v2929_v58, %v4516_v16  ;;  %v4530_v34 = vpop.permute.xlu1 %4529 }
 0xed3   : > { %v3069_v17 = vpack.c.bf16 %v2927_v59, %v2927_v59  ;;  %4160 = vmatpush3.bf16.msra.mxu1 %v4593_v11  ;;  %v3070_v27 = vpack.c.bf16 %v2930_v60, %v2930_v60  ;;  %v6201_v12 = vpop.permute.xlu0 %4524  ;;  %v4531_v56 = vunpack.i.l.bf16 %v4530_v34  ;;  %v4532_v32 = vunpack.i.h.bf16 %v4530_v34 }
 0xed4   : > { %4161 = vmatprep.subr.bf16.mxu1 %v4596_v37  ;;  %v4526_v63 = vunpack.i.l.bf16 %v6201_v12  ;;  %v4527_v61 = vunpack.i.h.bf16 %v6201_v12 }
 0xed5   : > { %3570 = vmatprep.mubr.bf16.mxu0 %v3070_v27  ;;  %v3073_v27 = vld [vmem:[%s6289_s24] sm:$0x1] }
 0xed6   : > { %3571 = vmatmul.mubr.bf16.vlgmr.msra.gmra.mxu0 %v3069_v17  ;;  %v2935_v50 = vsel %vm2246_vm3, %v2934_v55, %v4526_v63  ;;  %v2932_v8 = vsel %vm2246_vm3, %v2931_v31, %v4527_v61 }
 0xed7   : > { %4162 = vmatpush3.bf16.msra.mxu1 %v4597_v42  ;;  %v2936_v30 = vsel %vm2860_vm8, %v2935_v50, %v4531_v56  ;;  %v2933_v57 = vsel %vm2860_vm8, %v2932_v8, %v4532_v32 }
 0xed8   : > { %4163 = vmatprep.subr.bf16.mxu1 %v4598_v22  ;;  %v3072_v48 = vpack.c.bf16 %v2936_v30, %v2936_v30  ;;  %v3071_v33 = vpack.c.bf16 %v2933_v57, %v2933_v57 }
 0xedb   : > { %4164 = vmatpush3.bf16.msra.mxu1 %v4599_v26 }
 0xedc   : > { %4165 = vmatprep.subr.bf16.mxu1 %v4600_v13 }
 0xedf   : > { %4166 = vmatpush3.bf16.msra.mxu1 %v4601_v18 }
 0xee0   : > { %4167 = vmatprep.subr.bf16.mxu1 %v4602_v2 }
 0xee3   : > { %4168 = vmatpush3.bf16.msra.mxu1 %v4603_v44 }
 0xee4   : > { %4169 = vmatprep.subr.bf16.mxu1 %v4604_v51 }
 0xee7   : > { %4170 = vmatpush3.bf16.msra.mxu1 %v4605_v6 }
 0xee8   : > { %4199 = vmatprep.subr.bf16.mxu1 %v4606_v19 }
 0xeea   : > { %3531 = vmatmul.mubr.bf16.vlgmr.msra.gmra.mxu1 %v3067_v1 }
 0xeeb   : > { %4200 = vmatpush3.bf16.msra.mxu1 %v4607_v39  ;;  %3610 = vmatprep.mubr.bf16.mxu1 %v3072_v48 }
 0xeec   : > { %4201 = vmatprep.subr.bf16.mxu1 %v4608_v0 }
 0xeef   : > { %4202 = vmatpush3.bf16.msra.mxu1 %v4609_v23 }
 0xef0   : > { %4203 = vmatprep.subr.bf16.mxu1 %v4610_v9 }
 0xef3   : > { %4204 = vmatpush3.bf16.msra.mxu1 %v4611_v24 }
 0xef4   : > { %4205 = vmatprep.subr.bf16.mxu1 %v4612_v47 }
 0xef7   : > { %4206 = vmatpush3.bf16.msra.mxu1 %v4613_v15 }
 0xef8   : > { %4207 = vmatprep.subr.bf16.mxu1 %v4614_v14 }
 0xefb   : > { %4208 = vmatpush3.bf16.msra.mxu1 %v4615_v21 }
 0xefc   : > { %4209 = vmatprep.subr.bf16.mxu1 %v4616_v10 }
 0xeff   : > { %4210 = vmatpush3.bf16.msra.mxu1 %v4617_v25 }
 0xf00   : > { %4211 = vmatprep.subr.bf16.mxu1 %v4618_v29 }
 0xf03   : > { %4212 = vmatpush3.bf16.msra.mxu1 %v4619_v5 }
 0xf04   : > { %4213 = vmatprep.subr.bf16.mxu1 %v4620_v7 }
 0xf07   : > { %4214 = vmatpush3.bf16.msra.mxu1 %v4621_v35 }
 0xf0a   : > { %3611 = vmatmul.mubr.bf16.vlgmr.msra.gmra.mxu1 %v3071_v33 }
 0xf8a   : > { %v4149_v3 = vpop.f32.mrf.mxu1 }
 0xf8c   : > { %v4150_v40 = vpop.f32.mrf.mxu1 }
 0xf8d   : > { %v4151_v17 = vadd.f32 %v4150_v40, %v4149_v3 }
 0xf8e   : > { %v4152_v4 = vpop.f32.mrf.mxu1 }
 0xf8f   : > { %v3493_v22 = vadd.f32 %v4151_v17, %v3073_v27 }
 0xf90   : > { %v4153_v11 = vpop.f32.mrf.mxu1 }
 0xf96   : > { %v4193_v45 = vpop.f32.mrf.mxu0 }
 0xf98   : > { %v4194_v16 = vpop.f32.mrf.mxu0 }
 0xf99   : > { %v4195_v38 = vadd.f32 %v4194_v16, %v4193_v45 }
 0xf9a   : > { %v4196_v36 = vpop.f32.mrf.mxu0 }
 0xf9c   : > { %v4197_v37 = vpop.f32.mrf.mxu0 }
 0xfaa   : > { %v4171_v62 = vpop.f32.mrf.mxu1 }
 0xfac   : > { %v4172_v58 = vpop.f32.mrf.mxu1 }
 0xfad   : > { %v4173_v42 = vadd.f32 %v4172_v58, %v4171_v62 }
 0xfae   : > { %v4174_v59 = vpop.f32.mrf.mxu1 }
 0xfaf   : > { %v3533_v26 = vadd.f32 %v4173_v42, %v3493_v22 }
 0xfb0   : > { %v4175_v60 = vpop.f32.mrf.mxu1 }
 0xfb1   : > { %v3573_v12 = vadd.f32 %v4195_v38, %v3533_v26 }
 0xfca   : > { %v4215_v13 = vpop.f32.mrf.mxu1 }
 0xfcc   : > { %v4216_v18 = vpop.f32.mrf.mxu1 }
 0xfcd   : > { %v4217_v2 = vadd.f32 %v4216_v18, %v4215_v13 }
 0xfce   : > { %v4218_v43 = vpop.f32.mrf.mxu1 }
 0xfcf   : > { %v3613_v46 = vadd.f32 %v4217_v2, %v3573_v12 }
 0xfd0   : > { %v4219_v41 = vpop.f32.mrf.mxu1 }
 0xfd1   : > { %3618 = vst [vmem:[%s771_s27] sm:$0x1] %v3613_v46 }
 0xfd2   : > { %4661 = shalt.err (!%p4658_p0)
}
 0xfd3   : > { %s4662_s9 = scalar_lea.hbm %s6230_s8, 16  ;;  %s4666_s5 = scalar_lea.hbm %s6475_s3, 32 }
 0xfd4   : > { %p4663_p1 = scmp.ne.s32.totalorder %s6230_s8, %s4662_s9  ;;  %p4667_p4 = scmp.lt.s32.totalorder %s6230_s8, %s6475_s3 }
 0xfd5   : > { %p4668_p7 = scmp.lt.s32.totalorder %s4666_s5, %s4662_s9 }
 0xfd6   : > { %p4664_p2 = pnand %p4663_p1, %p4898_p5 }
 0xfd7   : > { %p4669_p6 = por %p4668_p7, %p4667_p4 }
 0xfd8   : > { %p4665_p3 = pneg %p4664_p2 }
 0xfda   : > { %p4670_p8 = pnand %p4669_p6, %p4665_p3 }
 0xfdc   : > { %4673 = shalt.err (!%p4670_p8)
}
 0xfdd   : > { %4411 = dma.vmem_to_hbm [thread:$0]  (%p4898_p5), %s3633_s28, 16, %s6230_s8, %s3620_s4  }
 0xfde PF: > { %s6476_s25 = sld [smem:[#allocation10_spill]] }
 0xfdf   : > { %s6477_s1 = sld [smem:[#allocation8_spill]] }
 0xfe0   : > { %s6478_s7 = sld [smem:[#allocation14_spill]] }
 0xfe4   : > { %p4423_p9 = scmp.ge.s32.totalorder %s6476_s25, 2 }
 0xfe5   : > { %s3644_s0 = sand.u32 1, %s6477_s1  }
 0xfe6   : > { %p6479_p10 = scmp.ne.s32.totalorder %s6478_s7, 0  ;;  %s3645_s29 = scalar_lea.sflag [#allocation4], %s3644_s0 }
 0xfe8   : > { %p4418_p11 = pnand %p4423_p9, %p6479_p10 }
 0xfea   : > { %p4419_p12 = pneg %p4418_p11 }
 0xfec   : > { %4695 = dma.done.wait (%p4419_p12), %s3645_s29, 16  }
 0xfed   : > { %4697 = vsyncadd (%p4419_p12), %s3645_s29, 4294967280  ;;  %s6480_s30 = sld [smem:[#allocation11_spill]]  ;;  %s6483_s29 = smov %s4704_s2 }
 0xfee   : > { %s6481_s9 = sld [smem:[#allocation9_spill]] }
 0xfef   : > { %s6482_s6 = sld [smem:[#allocation12_spill]] }
 0xff3   : > { %p36_p13 = scmp.ge.s32.totalorder %s6480_s30, 4  }
 0xff4   : > { %s6484_s2 = smov %s6481_s9 }
 0xff5   :  { %38 = sbr.rel (!%p36_p13) target bundleno = 17 (0x11), region = 160 }
 0xffa   :  { %3649 = vsyncpa [#allocation3], 1 }
 0xffb   :  { %3651 = vsyncpa [#allocation3 + $0x1], 1 }
 0xffc   :  { %3652 = vsyncpa [#allocation4], 1 }
 0xffd   :  { %3654 = vsyncpa [#allocation4 + $0x1], 1 }

</bundles_post_ra>
